<compile_context>
chip_gen: v5e
topology: v5e:2x2
jax: 0.10.0
libtpu: 0.0.40
codegen_flags: <defaults>
</compile_context>

<pallas_src>
import math

import jax
import jax.numpy as jnp
from jax.experimental import pallas as pl
from jax.experimental.pallas import tpu as pltpu


# ----------------------------------------------------------------------------
# Fully fused decoder kernel (all layers + final LayerNorm + LM head).
# ----------------------------------------------------------------------------
def _layernorm(v, g, b, eps=1e-5):
    mu = jnp.mean(v, axis=-1, keepdims=True)
    var = jnp.mean((v - mu) ** 2, axis=-1, keepdims=True)
    return (v - mu) * jax.lax.rsqrt(var + eps) * g + b


def make_decoder_kernel(B, S, D, H, L):
    hd = D // H
    BS = B * S
    inv_sqrt2 = 1.0 / math.sqrt(2.0)

    def kernel(x_ref,                              # (BS, D) embedded activations
               wqkv_ref, bqkv_ref,                 # (L, D, 3D), (L, 1, 3D); 1/sqrt(hd) folded into Q
               wo_ref, bo_ref,                     # (L, D, D) = Wo.T per layer, (L, 1, D)
               g1_ref, b1_ref, g2_ref, b2_ref,     # (L, 1, D) LayerNorm params
               w1_ref, w2_ref,                     # (L, D, 4D), (L, 4D, D); LoRA folded, no bias
               gf_ref, bf_ref,                     # (1, D) final LayerNorm
               wh_ref,                             # (D, Vpad) LM head (pre-transposed, lane-padded)
               out_ref):                           # (BS, Vpad)
        x = x_ref[...]                                                   # (BS, D)

        # causal keep-mask, built once and reused by every layer / head
        row = jax.lax.broadcasted_iota(jnp.int32, (1, S, S), 1)
        col = jax.lax.broadcasted_iota(jnp.int32, (1, S, S), 2)
        keep = col <= row                                                # (1, S, S) bool

        for l in range(L):          # static unrolled layer loop (weights stacked on L)
            xn = _layernorm(x, g1_ref[l], b1_ref[l])                     # ln_1, (BS, D)

            # fused lane-dense QKV projection: one (BS, D) @ (D, 3D) matmul
            qkv = jnp.dot(xn, wqkv_ref[l],
                          preferred_element_type=jnp.float32) + bqkv_ref[l]      # (BS, 3D)
            qkv3 = qkv.reshape(B, S, 3 * D)                              # leading-dim split only

            wo = wo_ref[l]                                               # (D, D)
            attn_out = jnp.zeros((BS, D), jnp.float32)
            for h in range(H):      # tiny per-head score/AV einsums (S=8, hd=32)
                q_h = qkv3[:, :, h * hd:(h + 1) * hd]                    # (B, S, hd), scale folded
                k_h = qkv3[:, :, D + h * hd:D + (h + 1) * hd]
                v_h = qkv3[:, :, 2 * D + h * hd:2 * D + (h + 1) * hd]
                s = jnp.einsum('bqd,bkd->bqk', q_h, k_h,
                               preferred_element_type=jnp.float32)       # (B, S, S)
                s = jnp.where(keep, s, -1e9)
                m = jnp.max(s, axis=-1, keepdims=True)
                p = jnp.exp(s - m)
                p = p * pl.reciprocal(jnp.sum(p, axis=-1, keepdims=True),
                                      approx=True)                       # divide on the EUP
                o_h = jnp.einsum('bqk,bkd->bqd', p, v_h,
                                 preferred_element_type=jnp.float32)     # (B, S, hd)
                # head-h rows of Wo.T -> dense 128 output lanes; accumulate, no (H,S,D) slab
                attn_out = attn_out + jnp.dot(o_h.reshape(BS, hd),
                                              wo[h * hd:(h + 1) * hd, :],
                                              preferred_element_type=jnp.float32)

            x1 = xn + attn_out + bo_ref[l]     # residual off ln_1(x), as in the PyTorch Block
            x2 = _layernorm(x1, g2_ref[l], b2_ref[l])                    # ln_2

            # MLP (LoRA folded): fc1 -> exact GELU (erf, matches nn.GELU()) -> fc2
            h1 = jnp.dot(x2, w1_ref[l], preferred_element_type=jnp.float32)      # (BS, 4D)
            gelu = 0.5 * h1 * (1.0 + jax.lax.erf(h1 * inv_sqrt2))
            m2 = jnp.dot(gelu, w2_ref[l], preferred_element_type=jnp.float32)    # (BS, D)
            x = x2 + m2

        # epilogue: final LayerNorm + LM head (output lanes pre-padded to multiple of 128)
        hn = _layernorm(x, gf_ref[...], bf_ref[...])
        out_ref[...] = jnp.dot(hn, wh_ref[...], preferred_element_type=jnp.float32)

    return kernel


def decoder_forward(tokens, tok_emb, pos_emb, packed, H, V):
    """tokens: (S, B) int32 (PyTorch seq-first). Returns (logits (S, B, V), attn_maps)."""
    S, B = tokens.shape
    D = tok_emb.shape[1]
    L = packed[0].shape[0]
    Vpad = packed[-1].shape[1]

    # TODO(synk): embedding lookups are data-dependent gathers; kept in plain JAX
    # (a Pallas DMA-gather is not worthwhile at vocab=97 / seq=8).
    # Batch-major gather -> no (S,B,D)<->(B,S,D) HBM transpose of the activation.
    h = jnp.take(tok_emb, tokens.T, axis=0) + pos_emb[None, :S, :]       # (B, S, D)
    x = h.reshape(B * S, D)

    kernel = make_decoder_kernel(B, S, D, H, L)
    logits_p = pl.pallas_call(
        kernel,
        out_shape=jax.ShapeDtypeStruct((B * S, Vpad), jnp.float32),
        compiler_params=pltpu.CompilerParams(vmem_limit_bytes=32 * 1024 * 1024),
    )(x, *packed)

    # only the tiny (B,S,V) logits get transposed back to the module's seq-first layout
    logits = logits_p.reshape(B, S, Vpad)[:, :, :V].transpose(1, 0, 2)   # (S, B, V)
    attention_maps = [0 for _ in range(L)]   # need_attn_weights=False path
    return logits, attention_maps


# ----------------------------------------------------------------------------
# Parameter construction / packing (wrapper side, plain JAX, done once)
# ----------------------------------------------------------------------------
def init_block_raw(key, D, lora_rank):
    """Raw PyTorch-convention parameters for one Block (LoRA_rank path)."""
    ks = jax.random.split(key, 14)
    f32 = jnp.float32
    in_w = jax.random.normal(ks[0], (3 * D, D), f32) * 0.05      # attn.in_proj_weight
    in_b = jax.random.normal(ks[1], (3 * D,), f32) * 0.05        # attn.in_proj_bias
    out_w = jax.random.normal(ks[2], (D, D), f32) * 0.05         # attn.out_proj.weight
    out_b = jax.random.normal(ks[3], (D,), f32) * 0.05           # attn.out_proj.bias
    g1 = 1.0 + 0.01 * jax.random.normal(ks[4], (D,), f32)
    b1 = 0.01 * jax.random.normal(ks[5], (D,), f32)
    g2 = 1.0 + 0.01 * jax.random.normal(ks[6], (D,), f32)
    b2 = 0.01 * jax.random.normal(ks[7], (D,), f32)
    w1 = jax.random.normal(ks[8], (4 * D, D), f32) * 0.05        # fc1.W (frozen)
    a1 = jax.random.normal(ks[9], (4 * D, lora_rank), f32) / lora_rank
    bm1 = jax.random.normal(ks[10], (D, lora_rank), f32) / lora_rank
    w2 = jax.random.normal(ks[11], (D, 4 * D), f32) * 0.05       # fc2.W (frozen)
    a2 = jax.random.normal(ks[12], (D, lora_rank), f32) / lora_rank
    bm2 = jax.random.normal(ks[13], (4 * D, lora_rank), f32) / lora_rank
    w1_eff = w1 + a1 @ bm1.T     # LoRALinear: x@W.T + (x@B)@A.T == x @ (W + A@B.T).T
    w2_eff = w2 + a2 @ bm2.T
    return (in_w, in_b, out_w, out_b, g1, b1, g2, b2, w1_eff, w2_eff)


def pack_decoder_params(raws, gf, bf, head_w, D, H, V):
    """Stack per-layer params on a leading L axis, (in,out)-transpose, fold scale, pad head."""
    hd = D // H
    scale = 1.0 / math.sqrt(hd)
    wqkv_l, bqkv_l, wo_l, bo_l = [], [], [], []
    g1_l, b1_l, g2_l, b2_l, w1_l, w2_l = [], [], [], [], [], []
    for raw in raws:
        in_w, in_b, out_w, out_b, g1, b1, g2, b2, w1_eff, w2_eff = raw
        wq, wk, wv = in_w[:D], in_w[D:2 * D], in_w[2 * D:]
        bq, bk, bv = in_b[:D], in_b[D:2 * D], in_b[2 * D:]
        # fold the 1/sqrt(hd) attention scale into the Q projection (weight + bias)
        wqkv_l.append(jnp.concatenate([wq.T * scale, wk.T, wv.T], axis=1))   # (D, 3D)
        bqkv_l.append(jnp.concatenate([bq * scale, bk, bv]).reshape(1, 3 * D))
        wo_l.append(out_w.T)                                                 # (D, D) = Wo.T
        bo_l.append(out_b.reshape(1, D))
        g1_l.append(g1.reshape(1, D)); b1_l.append(b1.reshape(1, D))
        g2_l.append(g2.reshape(1, D)); b2_l.append(b2.reshape(1, D))
        w1_l.append(w1_eff.T)                                                # (D, 4D)
        w2_l.append(w2_eff.T)                                                # (4D, D)
    stack = lambda xs: jnp.stack(xs, axis=0)
    Vpad = ((V + 127) // 128) * 128
    wh = jnp.zeros((D, Vpad), jnp.float32).at[:, :V].set(head_w.T)           # padded once here
    return (stack(wqkv_l), stack(bqkv_l), stack(wo_l), stack(bo_l),
            stack(g1_l), stack(b1_l), stack(g2_l), stack(b2_l),
            stack(w1_l), stack(w2_l),
            gf.reshape(1, D), bf.reshape(1, D), wh)


# ----------------------------------------------------------------------------
# Plain-JAX reference (mirrors the PyTorch module semantics)
# ----------------------------------------------------------------------------
def ref_block(x_bsd, raw, H):
    in_w, in_b, out_w, out_b, g1, b1, g2, b2, w1_eff, w2_eff = raw
    B, S, D = x_bsd.shape
    hd = D // H
    eps = 1e-5

    def ln(v, g, b):
        mu = jnp.mean(v, -1, keepdims=True)
        var = jnp.mean((v - mu) ** 2, -1, keepdims=True)
        return (v - mu) / jnp.sqrt(var + eps) * g + b

    xn = ln(x_bsd, g1, b1)
    qkv = xn @ in_w.T + in_b
    q, k, v = qkv[..., :D], qkv[..., D:2 * D], qkv[..., 2 * D:]
    q = q.reshape(B, S, H, hd).transpose(0, 2, 1, 3)
    k = k.reshape(B, S, H, hd).transpose(0, 2, 1, 3)
    v = v.reshape(B, S, H, hd).transpose(0, 2, 1, 3)
    s = jnp.einsum('bhqd,bhkd->bhqk', q, k) / math.sqrt(hd)
    mask = jnp.triu(jnp.ones((S, S), bool), k=1)
    s = jnp.where(mask, -jnp.inf, s)
    p = jax.nn.softmax(s, axis=-1)
    o = jnp.einsum('bhqk,bhkd->bhqd', p, v).transpose(0, 2, 1, 3).reshape(B, S, D)
    a = o @ out_w.T + out_b
    x1 = xn + a
    x2 = ln(x1, g2, b2)
    h1 = x2 @ w1_eff.T
    g = 0.5 * h1 * (1.0 + jax.lax.erf(h1 / math.sqrt(2.0)))
    m2 = g @ w2_eff.T
    return x2 + m2


def ref_decoder(tokens, tok_emb, pos_emb, raws, gf, bf, head_w, H):
    S, B = tokens.shape
    h = jnp.take(tok_emb, tokens, axis=0)
    h = h + jnp.take(pos_emb, jnp.arange(S), axis=0)[:, None, :]
    hb = jnp.transpose(h, (1, 0, 2))
    for raw in raws:
        hb = ref_block(hb, raw, H)
    eps = 1e-5
    mu = jnp.mean(hb, -1, keepdims=True)
    var = jnp.mean((hb - mu) ** 2, -1, keepdims=True)
    hn = (hb - mu) / jnp.sqrt(var + eps) * gf + bf
    logits = hn @ head_w.T
    return jnp.transpose(logits, (1, 0, 2))


if __name__ == "__main__":
    # Shapes consistent with Decoder defaults: dim=128, num_heads=4, num_tokens=97,
    # num_layers=2, LoRA_rank=4; seq=8, batch=2.
    S, B, D, H = 8, 2, 128, 4
    V, NUM_LAYERS, LORA_RANK = 97, 2, 4
    f32 = jnp.float32

    key = jax.random.PRNGKey(0)
    k_emb, k_pos, k_blocks, k_final, k_tok = jax.random.split(key, 5)

    tok_emb = jax.random.normal(k_emb, (V, D), f32) * 0.02
    pos_emb = jax.random.normal(k_pos, (S, D), f32) * 0.02

    block_keys = jax.random.split(k_blocks, NUM_LAYERS)
    raws = [init_block_raw(bk, D, LORA_RANK) for bk in block_keys]

    kf1, kf2, kf3 = jax.random.split(k_final, 3)
    gf = 1.0 + 0.01 * jax.random.normal(kf1, (D,), f32)
    bf = 0.01 * jax.random.normal(kf2, (D,), f32)
    head_w = jax.random.normal(kf3, (V, D), f32) * 0.05

    packed = pack_decoder_params(raws, gf, bf, head_w, D, H, V)
    tokens = jax.random.randint(k_tok, (S, B), 0, V)

    logits, attn_maps = decoder_forward(tokens, tok_emb, pos_emb, packed, H, V)
    logits = jax.block_until_ready(logits)

    ref = ref_decoder(tokens, tok_emb, pos_emb, raws, gf, bf, head_w, H)
    assert logits.shape == (S, B, V)
    max_err = jnp.max(jnp.abs(logits - ref))
    assert jnp.allclose(logits, ref, atol=2e-3, rtol=2e-3), f"max abs err {max_err}"

    print("KERNEL_OK")
</pallas_src>

<mosaic_0001>
module attributes {stable_mosaic.version = 11 : i64} {
  func.func @kernel(%arg0: memref<16x128xf32, #tpu.memory_space<vmem>>, %arg1: memref<2x128x384xf32, #tpu.memory_space<vmem>>, %arg2: memref<2x1x384xf32, #tpu.memory_space<vmem>>, %arg3: memref<2x128x128xf32, #tpu.memory_space<vmem>>, %arg4: memref<2x1x128xf32, #tpu.memory_space<vmem>>, %arg5: memref<2x1x128xf32, #tpu.memory_space<vmem>>, %arg6: memref<2x1x128xf32, #tpu.memory_space<vmem>>, %arg7: memref<2x1x128xf32, #tpu.memory_space<vmem>>, %arg8: memref<2x1x128xf32, #tpu.memory_space<vmem>>, %arg9: memref<2x128x512xf32, #tpu.memory_space<vmem>>, %arg10: memref<2x512x128xf32, #tpu.memory_space<vmem>>, %arg11: memref<1x128xf32, #tpu.memory_space<vmem>>, %arg12: memref<1x128xf32, #tpu.memory_space<vmem>>, %arg13: memref<128x128xf32, #tpu.memory_space<vmem>>, %arg14: memref<16x128xf32, #tpu.memory_space<vmem>>) attributes {dimension_semantics = [], scalar_prefetch = 0 : i64, scratch_operands = 0 : i64, tpu.core_type = #tpu.core_type<tc>} {
    %c0 = arith.constant 0 : index
    %c0_0 = arith.constant 0 : index
    %0 = vector.load %arg0[%c0, %c0_0] : memref<16x128xf32, #tpu.memory_space<vmem>>, vector<16x128xf32>
    %1 = tpu.iota {dimensions = array<i32: 1>} : vector<1x8x8xi32>
    %2 = tpu.iota {dimensions = array<i32: 2>} : vector<1x8x8xi32>
    %3 = arith.cmpi sle, %2, %1 : vector<1x8x8xi32>
    %c0_1 = arith.constant 0 : index
    %c0_2 = arith.constant 0 : index
    %c0_3 = arith.constant 0 : index
    %4 = vector.load %arg5[%c0_1, %c0_2, %c0_3] : memref<2x1x128xf32, #tpu.memory_space<vmem>>, vector<1x1x128xf32>
    %5 = vector.shape_cast %4 : vector<1x1x128xf32> to vector<1x128xf32>
    %c0_4 = arith.constant 0 : index
    %c0_5 = arith.constant 0 : index
    %c0_6 = arith.constant 0 : index
    %6 = vector.load %arg6[%c0_4, %c0_5, %c0_6] : memref<2x1x128xf32, #tpu.memory_space<vmem>>, vector<1x1x128xf32>
    %7 = vector.shape_cast %6 : vector<1x1x128xf32> to vector<1x128xf32>
    %cst = arith.constant dense<0.000000e+00> : vector<16xf32>
    %8 = vector.multi_reduction <add>, %0, %cst [1] : vector<16x128xf32> to vector<16xf32>
    %9 = vector.shape_cast %8 : vector<16xf32> to vector<16x1xf32>
    %cst_7 = arith.constant 1.280000e+02 : f32
    %10 = vector.broadcast %cst_7 : f32 to vector<16x1xf32>
    %11 = arith.divf %9, %10 : vector<16x1xf32>
    %12 = vector.broadcast %11 : vector<16x1xf32> to vector<16x128xf32>
    %13 = arith.subf %0, %12 : vector<16x128xf32>
    %14 = arith.mulf %13, %13 : vector<16x128xf32>
    %cst_8 = arith.constant dense<0.000000e+00> : vector<16xf32>
    %15 = vector.multi_reduction <add>, %14, %cst_8 [1] : vector<16x128xf32> to vector<16xf32>
    %16 = vector.shape_cast %15 : vector<16xf32> to vector<16x1xf32>
    %cst_9 = arith.constant 1.280000e+02 : f32
    %17 = vector.broadcast %cst_9 : f32 to vector<16x1xf32>
    %18 = arith.divf %16, %17 : vector<16x1xf32>
    %19 = vector.broadcast %11 : vector<16x1xf32> to vector<16x128xf32>
    %20 = arith.subf %0, %19 : vector<16x128xf32>
    %cst_10 = arith.constant 9.99999974E-6 : f32
    %21 = vector.broadcast %cst_10 : f32 to vector<16x1xf32>
    %22 = arith.addf %18, %21 : vector<16x1xf32>
    %23 = math.rsqrt %22 : vector<16x1xf32>
    %24 = vector.broadcast %23 : vector<16x1xf32> to vector<16x128xf32>
    %25 = arith.mulf %20, %24 : vector<16x128xf32>
    %26 = vector.broadcast %5 : vector<1x128xf32> to vector<16x128xf32>
    %27 = arith.mulf %25, %26 : vector<16x128xf32>
    %28 = vector.broadcast %7 : vector<1x128xf32> to vector<16x128xf32>
    %29 = arith.addf %27, %28 : vector<16x128xf32>
    %c0_11 = arith.constant 0 : index
    %c0_12 = arith.constant 0 : index
    %c0_13 = arith.constant 0 : index
    %30 = vector.load %arg1[%c0_11, %c0_12, %c0_13] : memref<2x128x384xf32, #tpu.memory_space<vmem>>, vector<1x128x384xf32>
    %31 = vector.shape_cast %30 : vector<1x128x384xf32> to vector<128x384xf32>
    %cst_14 = arith.constant dense<0.000000e+00> : vector<16x384xf32>
    %32 = tpu.matmul %29, %31, %cst_14 {dimension_numbers = #tpu.dot_dimension_numbers<[1], [0], [0], [1], [0, 0, 1, 1], [], []>} : vector<16x128xf32>, vector<128x384xf32>, vector<16x384xf32> -> vector<16x384xf32>
    %c0_15 = arith.constant 0 : index
    %c0_16 = arith.constant 0 : index
    %c0_17 = arith.constant 0 : index
    %33 = vector.load %arg2[%c0_15, %c0_16, %c0_17] : memref<2x1x384xf32, #tpu.memory_space<vmem>>, vector<1x1x384xf32>
    %34 = vector.shape_cast %33 : vector<1x1x384xf32> to vector<1x384xf32>
    %35 = vector.broadcast %34 : vector<1x384xf32> to vector<16x384xf32>
    %36 = arith.addf %32, %35 : vector<16x384xf32>
    %37 = vector.shape_cast %36 : vector<16x384xf32> to vector<2x8x384xf32>
    %c0_18 = arith.constant 0 : index
    %c0_19 = arith.constant 0 : index
    %c0_20 = arith.constant 0 : index
    %38 = vector.load %arg3[%c0_18, %c0_19, %c0_20] : memref<2x128x128xf32, #tpu.memory_space<vmem>>, vector<1x128x128xf32>
    %39 = vector.shape_cast %38 : vector<1x128x128xf32> to vector<128x128xf32>
    %cst_21 = arith.constant 0.000000e+00 : f32
    %40 = vector.broadcast %cst_21 : f32 to vector<16x128xf32>
    %41 = vector.extract_strided_slice %37 {offsets = [0, 0, 0], sizes = [2, 8, 32], strides = [1, 1, 1]} : vector<2x8x384xf32> to vector<2x8x32xf32>
    %42 = vector.extract_strided_slice %37 {offsets = [0, 0, 128], sizes = [2, 8, 32], strides = [1, 1, 1]} : vector<2x8x384xf32> to vector<2x8x32xf32>
    %43 = vector.extract_strided_slice %37 {offsets = [0, 0, 256], sizes = [2, 8, 32], strides = [1, 1, 1]} : vector<2x8x384xf32> to vector<2x8x32xf32>
    "tpu.trace_start"() <{level = 10 : i32, message = "bqd,bkd->bqk"}> : () -> ()
    %cst_22 = arith.constant dense<0.000000e+00> : vector<2x8x8xf32>
    %44 = tpu.matmul %41, %42, %cst_22 {dimension_numbers = #tpu.dot_dimension_numbers<[2], [2], [1], [1], [0, 0, 0, 1, 1, 1], [0], [0]>} : vector<2x8x32xf32>, vector<2x8x32xf32>, vector<2x8x8xf32> -> vector<2x8x8xf32>
    %cst_23 = arith.constant -1.000000e+09 : f32
    "tpu.trace_stop"() : () -> ()
    %45 = vector.shape_cast %3 : vector<1x8x8xi1> to vector<1x8x8xi1>
    %46 = vector.broadcast %45 : vector<1x8x8xi1> to vector<2x8x8xi1>
    %47 = vector.broadcast %cst_23 : f32 to vector<2x8x8xf32>
    %48 = arith.select %46, %44, %47 : vector<2x8x8xi1>, vector<2x8x8xf32>
    %cst_24 = arith.constant dense<0xFF800000> : vector<2x8xf32>
    %49 = vector.multi_reduction <maximumf>, %48, %cst_24 [2] : vector<2x8x8xf32> to vector<2x8xf32>
    %50 = vector.shape_cast %49 : vector<2x8xf32> to vector<2x8x1xf32>
    %51 = vector.broadcast %50 : vector<2x8x1xf32> to vector<2x8x8xf32>
    %52 = arith.subf %48, %51 : vector<2x8x8xf32>
    %53 = math.exp %52 : vector<2x8x8xf32>
    %cst_25 = arith.constant dense<0.000000e+00> : vector<2x8xf32>
    %54 = vector.multi_reduction <add>, %53, %cst_25 [2] : vector<2x8x8xf32> to vector<2x8xf32>
    %55 = vector.shape_cast %54 : vector<2x8xf32> to vector<2x8x1xf32>
    %56 = tpu.reciprocal %55 {approx = true} : vector<2x8x1xf32> -> vector<2x8x1xf32>
    %57 = vector.broadcast %56 : vector<2x8x1xf32> to vector<2x8x8xf32>
    %58 = arith.mulf %53, %57 : vector<2x8x8xf32>
    "tpu.trace_start"() <{level = 10 : i32, message = "bqk,bkd->bqd"}> : () -> ()
    %cst_26 = arith.constant dense<0.000000e+00> : vector<2x8x32xf32>
    %59 = tpu.matmul %58, %43, %cst_26 {dimension_numbers = #tpu.dot_dimension_numbers<[2], [1], [1], [2], [0, 0, 0, 1, 1, 2], [0], [0]>} : vector<2x8x8xf32>, vector<2x8x32xf32>, vector<2x8x32xf32> -> vector<2x8x32xf32>
    "tpu.trace_stop"() : () -> ()
    %60 = vector.shape_cast %59 : vector<2x8x32xf32> to vector<16x32xf32>
    %61 = vector.extract_strided_slice %39 {offsets = [0, 0], sizes = [32, 128], strides = [1, 1]} : vector<128x128xf32> to vector<32x128xf32>
    %cst_27 = arith.constant dense<0.000000e+00> : vector<16x128xf32>
    %62 = tpu.matmul %60, %61, %cst_27 {dimension_numbers = #tpu.dot_dimension_numbers<[1], [0], [0], [1], [0, 0, 1, 1], [], []>} : vector<16x32xf32>, vector<32x128xf32>, vector<16x128xf32> -> vector<16x128xf32>
    %63 = arith.addf %40, %62 : vector<16x128xf32>
    %64 = vector.extract_strided_slice %37 {offsets = [0, 0, 32], sizes = [2, 8, 32], strides = [1, 1, 1]} : vector<2x8x384xf32> to vector<2x8x32xf32>
    %65 = vector.extract_strided_slice %37 {offsets = [0, 0, 160], sizes = [2, 8, 32], strides = [1, 1, 1]} : vector<2x8x384xf32> to vector<2x8x32xf32>
    %66 = vector.extract_strided_slice %37 {offsets = [0, 0, 288], sizes = [2, 8, 32], strides = [1, 1, 1]} : vector<2x8x384xf32> to vector<2x8x32xf32>
    "tpu.trace_start"() <{level = 10 : i32, message = "bqd,bkd->bqk"}> : () -> ()
    %cst_28 = arith.constant dense<0.000000e+00> : vector<2x8x8xf32>
    %67 = tpu.matmul %64, %65, %cst_28 {dimension_numbers = #tpu.dot_dimension_numbers<[2], [2], [1], [1], [0, 0, 0, 1, 1, 1], [0], [0]>} : vector<2x8x32xf32>, vector<2x8x32xf32>, vector<2x8x8xf32> -> vector<2x8x8xf32>
    %cst_29 = arith.constant -1.000000e+09 : f32
    "tpu.trace_stop"() : () -> ()
    %68 = vector.shape_cast %3 : vector<1x8x8xi1> to vector<1x8x8xi1>
    %69 = vector.broadcast %68 : vector<1x8x8xi1> to vector<2x8x8xi1>
    %70 = vector.broadcast %cst_29 : f32 to vector<2x8x8xf32>
    %71 = arith.select %69, %67, %70 : vector<2x8x8xi1>, vector<2x8x8xf32>
    %cst_30 = arith.constant dense<0xFF800000> : vector<2x8xf32>
    %72 = vector.multi_reduction <maximumf>, %71, %cst_30 [2] : vector<2x8x8xf32> to vector<2x8xf32>
    %73 = vector.shape_cast %72 : vector<2x8xf32> to vector<2x8x1xf32>
    %74 = vector.broadcast %73 : vector<2x8x1xf32> to vector<2x8x8xf32>
    %75 = arith.subf %71, %74 : vector<2x8x8xf32>
    %76 = math.exp %75 : vector<2x8x8xf32>
    %cst_31 = arith.constant dense<0.000000e+00> : vector<2x8xf32>
    %77 = vector.multi_reduction <add>, %76, %cst_31 [2] : vector<2x8x8xf32> to vector<2x8xf32>
    %78 = vector.shape_cast %77 : vector<2x8xf32> to vector<2x8x1xf32>
    %79 = tpu.reciprocal %78 {approx = true} : vector<2x8x1xf32> -> vector<2x8x1xf32>
    %80 = vector.broadcast %79 : vector<2x8x1xf32> to vector<2x8x8xf32>
    %81 = arith.mulf %76, %80 : vector<2x8x8xf32>
    "tpu.trace_start"() <{level = 10 : i32, message = "bqk,bkd->bqd"}> : () -> ()
    %cst_32 = arith.constant dense<0.000000e+00> : vector<2x8x32xf32>
    %82 = tpu.matmul %81, %66, %cst_32 {dimension_numbers = #tpu.dot_dimension_numbers<[2], [1], [1], [2], [0, 0, 0, 1, 1, 2], [0], [0]>} : vector<2x8x8xf32>, vector<2x8x32xf32>, vector<2x8x32xf32> -> vector<2x8x32xf32>
    "tpu.trace_stop"() : () -> ()
    %83 = vector.shape_cast %82 : vector<2x8x32xf32> to vector<16x32xf32>
    %84 = vector.extract_strided_slice %39 {offsets = [32, 0], sizes = [32, 128], strides = [1, 1]} : vector<128x128xf32> to vector<32x128xf32>
    %cst_33 = arith.constant dense<0.000000e+00> : vector<16x128xf32>
    %85 = tpu.matmul %83, %84, %cst_33 {dimension_numbers = #tpu.dot_dimension_numbers<[1], [0], [0], [1], [0, 0, 1, 1], [], []>} : vector<16x32xf32>, vector<32x128xf32>, vector<16x128xf32> -> vector<16x128xf32>
    %86 = arith.addf %63, %85 : vector<16x128xf32>
    %87 = vector.extract_strided_slice %37 {offsets = [0, 0, 64], sizes = [2, 8, 32], strides = [1, 1, 1]} : vector<2x8x384xf32> to vector<2x8x32xf32>
    %88 = vector.extract_strided_slice %37 {offsets = [0, 0, 192], sizes = [2, 8, 32], strides = [1, 1, 1]} : vector<2x8x384xf32> to vector<2x8x32xf32>
    %89 = vector.extract_strided_slice %37 {offsets = [0, 0, 320], sizes = [2, 8, 32], strides = [1, 1, 1]} : vector<2x8x384xf32> to vector<2x8x32xf32>
    "tpu.trace_start"() <{level = 10 : i32, message = "bqd,bkd->bqk"}> : () -> ()
    %cst_34 = arith.constant dense<0.000000e+00> : vector<2x8x8xf32>
    %90 = tpu.matmul %87, %88, %cst_34 {dimension_numbers = #tpu.dot_dimension_numbers<[2], [2], [1], [1], [0, 0, 0, 1, 1, 1], [0], [0]>} : vector<2x8x32xf32>, vector<2x8x32xf32>, vector<2x8x8xf32> -> vector<2x8x8xf32>
    %cst_35 = arith.constant -1.000000e+09 : f32
    "tpu.trace_stop"() : () -> ()
    %91 = vector.shape_cast %3 : vector<1x8x8xi1> to vector<1x8x8xi1>
    %92 = vector.broadcast %91 : vector<1x8x8xi1> to vector<2x8x8xi1>
    %93 = vector.broadcast %cst_35 : f32 to vector<2x8x8xf32>
    %94 = arith.select %92, %90, %93 : vector<2x8x8xi1>, vector<2x8x8xf32>
    %cst_36 = arith.constant dense<0xFF800000> : vector<2x8xf32>
    %95 = vector.multi_reduction <maximumf>, %94, %cst_36 [2] : vector<2x8x8xf32> to vector<2x8xf32>
    %96 = vector.shape_cast %95 : vector<2x8xf32> to vector<2x8x1xf32>
    %97 = vector.broadcast %96 : vector<2x8x1xf32> to vector<2x8x8xf32>
    %98 = arith.subf %94, %97 : vector<2x8x8xf32>
    %99 = math.exp %98 : vector<2x8x8xf32>
    %cst_37 = arith.constant dense<0.000000e+00> : vector<2x8xf32>
    %100 = vector.multi_reduction <add>, %99, %cst_37 [2] : vector<2x8x8xf32> to vector<2x8xf32>
    %101 = vector.shape_cast %100 : vector<2x8xf32> to vector<2x8x1xf32>
    %102 = tpu.reciprocal %101 {approx = true} : vector<2x8x1xf32> -> vector<2x8x1xf32>
    %103 = vector.broadcast %102 : vector<2x8x1xf32> to vector<2x8x8xf32>
    %104 = arith.mulf %99, %103 : vector<2x8x8xf32>
    "tpu.trace_start"() <{level = 10 : i32, message = "bqk,bkd->bqd"}> : () -> ()
    %cst_38 = arith.constant dense<0.000000e+00> : vector<2x8x32xf32>
    %105 = tpu.matmul %104, %89, %cst_38 {dimension_numbers = #tpu.dot_dimension_numbers<[2], [1], [1], [2], [0, 0, 0, 1, 1, 2], [0], [0]>} : vector<2x8x8xf32>, vector<2x8x32xf32>, vector<2x8x32xf32> -> vector<2x8x32xf32>
    "tpu.trace_stop"() : () -> ()
    %106 = vector.shape_cast %105 : vector<2x8x32xf32> to vector<16x32xf32>
    %107 = vector.extract_strided_slice %39 {offsets = [64, 0], sizes = [32, 128], strides = [1, 1]} : vector<128x128xf32> to vector<32x128xf32>
    %cst_39 = arith.constant dense<0.000000e+00> : vector<16x128xf32>
    %108 = tpu.matmul %106, %107, %cst_39 {dimension_numbers = #tpu.dot_dimension_numbers<[1], [0], [0], [1], [0, 0, 1, 1], [], []>} : vector<16x32xf32>, vector<32x128xf32>, vector<16x128xf32> -> vector<16x128xf32>
    %109 = arith.addf %86, %108 : vector<16x128xf32>
    %110 = vector.extract_strided_slice %37 {offsets = [0, 0, 96], sizes = [2, 8, 32], strides = [1, 1, 1]} : vector<2x8x384xf32> to vector<2x8x32xf32>
    %111 = vector.extract_strided_slice %37 {offsets = [0, 0, 224], sizes = [2, 8, 32], strides = [1, 1, 1]} : vector<2x8x384xf32> to vector<2x8x32xf32>
    %112 = vector.extract_strided_slice %37 {offsets = [0, 0, 352], sizes = [2, 8, 32], strides = [1, 1, 1]} : vector<2x8x384xf32> to vector<2x8x32xf32>
    "tpu.trace_start"() <{level = 10 : i32, message = "bqd,bkd->bqk"}> : () -> ()
    %cst_40 = arith.constant dense<0.000000e+00> : vector<2x8x8xf32>
    %113 = tpu.matmul %110, %111, %cst_40 {dimension_numbers = #tpu.dot_dimension_numbers<[2], [2], [1], [1], [0, 0, 0, 1, 1, 1], [0], [0]>} : vector<2x8x32xf32>, vector<2x8x32xf32>, vector<2x8x8xf32> -> vector<2x8x8xf32>
    %cst_41 = arith.constant -1.000000e+09 : f32
    "tpu.trace_stop"() : () -> ()
    %114 = vector.shape_cast %3 : vector<1x8x8xi1> to vector<1x8x8xi1>
    %115 = vector.broadcast %114 : vector<1x8x8xi1> to vector<2x8x8xi1>
    %116 = vector.broadcast %cst_41 : f32 to vector<2x8x8xf32>
    %117 = arith.select %115, %113, %116 : vector<2x8x8xi1>, vector<2x8x8xf32>
    %cst_42 = arith.constant dense<0xFF800000> : vector<2x8xf32>
    %118 = vector.multi_reduction <maximumf>, %117, %cst_42 [2] : vector<2x8x8xf32> to vector<2x8xf32>
    %119 = vector.shape_cast %118 : vector<2x8xf32> to vector<2x8x1xf32>
    %120 = vector.broadcast %119 : vector<2x8x1xf32> to vector<2x8x8xf32>
    %121 = arith.subf %117, %120 : vector<2x8x8xf32>
    %122 = math.exp %121 : vector<2x8x8xf32>
    %cst_43 = arith.constant dense<0.000000e+00> : vector<2x8xf32>
    %123 = vector.multi_reduction <add>, %122, %cst_43 [2] : vector<2x8x8xf32> to vector<2x8xf32>
    %124 = vector.shape_cast %123 : vector<2x8xf32> to vector<2x8x1xf32>
    %125 = tpu.reciprocal %124 {approx = true} : vector<2x8x1xf32> -> vector<2x8x1xf32>
    %126 = vector.broadcast %125 : vector<2x8x1xf32> to vector<2x8x8xf32>
    %127 = arith.mulf %122, %126 : vector<2x8x8xf32>
    "tpu.trace_start"() <{level = 10 : i32, message = "bqk,bkd->bqd"}> : () -> ()
    %cst_44 = arith.constant dense<0.000000e+00> : vector<2x8x32xf32>
    %128 = tpu.matmul %127, %112, %cst_44 {dimension_numbers = #tpu.dot_dimension_numbers<[2], [1], [1], [2], [0, 0, 0, 1, 1, 2], [0], [0]>} : vector<2x8x8xf32>, vector<2x8x32xf32>, vector<2x8x32xf32> -> vector<2x8x32xf32>
    "tpu.trace_stop"() : () -> ()
    %129 = vector.shape_cast %128 : vector<2x8x32xf32> to vector<16x32xf32>
    %130 = vector.extract_strided_slice %39 {offsets = [96, 0], sizes = [32, 128], strides = [1, 1]} : vector<128x128xf32> to vector<32x128xf32>
    %cst_45 = arith.constant dense<0.000000e+00> : vector<16x128xf32>
    %131 = tpu.matmul %129, %130, %cst_45 {dimension_numbers = #tpu.dot_dimension_numbers<[1], [0], [0], [1], [0, 0, 1, 1], [], []>} : vector<16x32xf32>, vector<32x128xf32>, vector<16x128xf32> -> vector<16x128xf32>
    %132 = arith.addf %109, %131 : vector<16x128xf32>
    %133 = arith.addf %29, %132 : vector<16x128xf32>
    %c0_46 = arith.constant 0 : index
    %c0_47 = arith.constant 0 : index
    %c0_48 = arith.constant 0 : index
    %134 = vector.load %arg4[%c0_46, %c0_47, %c0_48] : memref<2x1x128xf32, #tpu.memory_space<vmem>>, vector<1x1x128xf32>
    %135 = vector.shape_cast %134 : vector<1x1x128xf32> to vector<1x128xf32>
    %136 = vector.broadcast %135 : vector<1x128xf32> to vector<16x128xf32>
    %137 = arith.addf %133, %136 : vector<16x128xf32>
    %c0_49 = arith.constant 0 : index
    %c0_50 = arith.constant 0 : index
    %c0_51 = arith.constant 0 : index
    %138 = vector.load %arg7[%c0_49, %c0_50, %c0_51] : memref<2x1x128xf32, #tpu.memory_space<vmem>>, vector<1x1x128xf32>
    %139 = vector.shape_cast %138 : vector<1x1x128xf32> to vector<1x128xf32>
    %c0_52 = arith.constant 0 : index
    %c0_53 = arith.constant 0 : index
    %c0_54 = arith.constant 0 : index
    %140 = vector.load %arg8[%c0_52, %c0_53, %c0_54] : memref<2x1x128xf32, #tpu.memory_space<vmem>>, vector<1x1x128xf32>
    %141 = vector.shape_cast %140 : vector<1x1x128xf32> to vector<1x128xf32>
    %cst_55 = arith.constant dense<0.000000e+00> : vector<16xf32>
    %142 = vector.multi_reduction <add>, %137, %cst_55 [1] : vector<16x128xf32> to vector<16xf32>
    %143 = vector.shape_cast %142 : vector<16xf32> to vector<16x1xf32>
    %cst_56 = arith.constant 1.280000e+02 : f32
    %144 = vector.broadcast %cst_56 : f32 to vector<16x1xf32>
    %145 = arith.divf %143, %144 : vector<16x1xf32>
    %146 = vector.broadcast %145 : vector<16x1xf32> to vector<16x128xf32>
    %147 = arith.subf %137, %146 : vector<16x128xf32>
    %148 = arith.mulf %147, %147 : vector<16x128xf32>
    %cst_57 = arith.constant dense<0.000000e+00> : vector<16xf32>
    %149 = vector.multi_reduction <add>, %148, %cst_57 [1] : vector<16x128xf32> to vector<16xf32>
    %150 = vector.shape_cast %149 : vector<16xf32> to vector<16x1xf32>
    %cst_58 = arith.constant 1.280000e+02 : f32
    %151 = vector.broadcast %cst_58 : f32 to vector<16x1xf32>
    %152 = arith.divf %150, %151 : vector<16x1xf32>
    %153 = vector.broadcast %145 : vector<16x1xf32> to vector<16x128xf32>
    %154 = arith.subf %137, %153 : vector<16x128xf32>
    %cst_59 = arith.constant 9.99999974E-6 : f32
    %155 = vector.broadcast %cst_59 : f32 to vector<16x1xf32>
    %156 = arith.addf %152, %155 : vector<16x1xf32>
    %157 = math.rsqrt %156 : vector<16x1xf32>
    %158 = vector.broadcast %157 : vector<16x1xf32> to vector<16x128xf32>
    %159 = arith.mulf %154, %158 : vector<16x128xf32>
    %160 = vector.broadcast %139 : vector<1x128xf32> to vector<16x128xf32>
    %161 = arith.mulf %159, %160 : vector<16x128xf32>
    %162 = vector.broadcast %141 : vector<1x128xf32> to vector<16x128xf32>
    %163 = arith.addf %161, %162 : vector<16x128xf32>
    %c0_60 = arith.constant 0 : index
    %c0_61 = arith.constant 0 : index
    %c0_62 = arith.constant 0 : index
    %164 = vector.load %arg9[%c0_60, %c0_61, %c0_62] : memref<2x128x512xf32, #tpu.memory_space<vmem>>, vector<1x128x512xf32>
    %165 = vector.shape_cast %164 : vector<1x128x512xf32> to vector<128x512xf32>
    %cst_63 = arith.constant dense<0.000000e+00> : vector<16x512xf32>
    %166 = tpu.matmul %163, %165, %cst_63 {dimension_numbers = #tpu.dot_dimension_numbers<[1], [0], [0], [1], [0, 0, 1, 1], [], []>} : vector<16x128xf32>, vector<128x512xf32>, vector<16x512xf32> -> vector<16x512xf32>
    %cst_64 = arith.constant 5.000000e-01 : f32
    %167 = vector.broadcast %cst_64 : f32 to vector<16x512xf32>
    %168 = arith.mulf %167, %166 : vector<16x512xf32>
    %cst_65 = arith.constant 0.707106769 : f32
    %169 = vector.broadcast %cst_65 : f32 to vector<16x512xf32>
    %170 = arith.mulf %166, %169 : vector<16x512xf32>
    %171 = math.erf %170 : vector<16x512xf32>
    %cst_66 = arith.constant 1.000000e+00 : f32
    %172 = vector.broadcast %cst_66 : f32 to vector<16x512xf32>
    %173 = arith.addf %172, %171 : vector<16x512xf32>
    %174 = arith.mulf %168, %173 : vector<16x512xf32>
    %c0_67 = arith.constant 0 : index
    %c0_68 = arith.constant 0 : index
    %c0_69 = arith.constant 0 : index
    %175 = vector.load %arg10[%c0_67, %c0_68, %c0_69] : memref<2x512x128xf32, #tpu.memory_space<vmem>>, vector<1x512x128xf32>
    %176 = vector.shape_cast %175 : vector<1x512x128xf32> to vector<512x128xf32>
    %cst_70 = arith.constant dense<0.000000e+00> : vector<16x128xf32>
    %177 = tpu.matmul %174, %176, %cst_70 {dimension_numbers = #tpu.dot_dimension_numbers<[1], [0], [0], [1], [0, 0, 1, 1], [], []>} : vector<16x512xf32>, vector<512x128xf32>, vector<16x128xf32> -> vector<16x128xf32>
    %178 = arith.addf %163, %177 : vector<16x128xf32>
    %c1 = arith.constant 1 : index
    %c0_71 = arith.constant 0 : index
    %c0_72 = arith.constant 0 : index
    %179 = vector.load %arg5[%c1, %c0_71, %c0_72] : memref<2x1x128xf32, #tpu.memory_space<vmem>>, vector<1x1x128xf32>
    %180 = vector.shape_cast %179 : vector<1x1x128xf32> to vector<1x128xf32>
    %c1_73 = arith.constant 1 : index
    %c0_74 = arith.constant 0 : index
    %c0_75 = arith.constant 0 : index
    %181 = vector.load %arg6[%c1_73, %c0_74, %c0_75] : memref<2x1x128xf32, #tpu.memory_space<vmem>>, vector<1x1x128xf32>
    %182 = vector.shape_cast %181 : vector<1x1x128xf32> to vector<1x128xf32>
    %cst_76 = arith.constant dense<0.000000e+00> : vector<16xf32>
    %183 = vector.multi_reduction <add>, %178, %cst_76 [1] : vector<16x128xf32> to vector<16xf32>
    %184 = vector.shape_cast %183 : vector<16xf32> to vector<16x1xf32>
    %cst_77 = arith.constant 1.280000e+02 : f32
    %185 = vector.broadcast %cst_77 : f32 to vector<16x1xf32>
    %186 = arith.divf %184, %185 : vector<16x1xf32>
    %187 = vector.broadcast %186 : vector<16x1xf32> to vector<16x128xf32>
    %188 = arith.subf %178, %187 : vector<16x128xf32>
    %189 = arith.mulf %188, %188 : vector<16x128xf32>
    %cst_78 = arith.constant dense<0.000000e+00> : vector<16xf32>
    %190 = vector.multi_reduction <add>, %189, %cst_78 [1] : vector<16x128xf32> to vector<16xf32>
    %191 = vector.shape_cast %190 : vector<16xf32> to vector<16x1xf32>
    %cst_79 = arith.constant 1.280000e+02 : f32
    %192 = vector.broadcast %cst_79 : f32 to vector<16x1xf32>
    %193 = arith.divf %191, %192 : vector<16x1xf32>
    %194 = vector.broadcast %186 : vector<16x1xf32> to vector<16x128xf32>
    %195 = arith.subf %178, %194 : vector<16x128xf32>
    %cst_80 = arith.constant 9.99999974E-6 : f32
    %196 = vector.broadcast %cst_80 : f32 to vector<16x1xf32>
    %197 = arith.addf %193, %196 : vector<16x1xf32>
    %198 = math.rsqrt %197 : vector<16x1xf32>
    %199 = vector.broadcast %198 : vector<16x1xf32> to vector<16x128xf32>
    %200 = arith.mulf %195, %199 : vector<16x128xf32>
    %201 = vector.broadcast %180 : vector<1x128xf32> to vector<16x128xf32>
    %202 = arith.mulf %200, %201 : vector<16x128xf32>
    %203 = vector.broadcast %182 : vector<1x128xf32> to vector<16x128xf32>
    %204 = arith.addf %202, %203 : vector<16x128xf32>
    %c1_81 = arith.constant 1 : index
    %c0_82 = arith.constant 0 : index
    %c0_83 = arith.constant 0 : index
    %205 = vector.load %arg1[%c1_81, %c0_82, %c0_83] : memref<2x128x384xf32, #tpu.memory_space<vmem>>, vector<1x128x384xf32>
    %206 = vector.shape_cast %205 : vector<1x128x384xf32> to vector<128x384xf32>
    %cst_84 = arith.constant dense<0.000000e+00> : vector<16x384xf32>
    %207 = tpu.matmul %204, %206, %cst_84 {dimension_numbers = #tpu.dot_dimension_numbers<[1], [0], [0], [1], [0, 0, 1, 1], [], []>} : vector<16x128xf32>, vector<128x384xf32>, vector<16x384xf32> -> vector<16x384xf32>
    %c1_85 = arith.constant 1 : index
    %c0_86 = arith.constant 0 : index
    %c0_87 = arith.constant 0 : index
    %208 = vector.load %arg2[%c1_85, %c0_86, %c0_87] : memref<2x1x384xf32, #tpu.memory_space<vmem>>, vector<1x1x384xf32>
    %209 = vector.shape_cast %208 : vector<1x1x384xf32> to vector<1x384xf32>
    %210 = vector.broadcast %209 : vector<1x384xf32> to vector<16x384xf32>
    %211 = arith.addf %207, %210 : vector<16x384xf32>
    %212 = vector.shape_cast %211 : vector<16x384xf32> to vector<2x8x384xf32>
    %c1_88 = arith.constant 1 : index
    %c0_89 = arith.constant 0 : index
    %c0_90 = arith.constant 0 : index
    %213 = vector.load %arg3[%c1_88, %c0_89, %c0_90] : memref<2x128x128xf32, #tpu.memory_space<vmem>>, vector<1x128x128xf32>
    %214 = vector.shape_cast %213 : vector<1x128x128xf32> to vector<128x128xf32>
    %cst_91 = arith.constant 0.000000e+00 : f32
    %215 = vector.broadcast %cst_91 : f32 to vector<16x128xf32>
    %216 = vector.extract_strided_slice %212 {offsets = [0, 0, 0], sizes = [2, 8, 32], strides = [1, 1, 1]} : vector<2x8x384xf32> to vector<2x8x32xf32>
    %217 = vector.extract_strided_slice %212 {offsets = [0, 0, 128], sizes = [2, 8, 32], strides = [1, 1, 1]} : vector<2x8x384xf32> to vector<2x8x32xf32>
    %218 = vector.extract_strided_slice %212 {offsets = [0, 0, 256], sizes = [2, 8, 32], strides = [1, 1, 1]} : vector<2x8x384xf32> to vector<2x8x32xf32>
    "tpu.trace_start"() <{level = 10 : i32, message = "bqd,bkd->bqk"}> : () -> ()
    %cst_92 = arith.constant dense<0.000000e+00> : vector<2x8x8xf32>
    %219 = tpu.matmul %216, %217, %cst_92 {dimension_numbers = #tpu.dot_dimension_numbers<[2], [2], [1], [1], [0, 0, 0, 1, 1, 1], [0], [0]>} : vector<2x8x32xf32>, vector<2x8x32xf32>, vector<2x8x8xf32> -> vector<2x8x8xf32>
    %cst_93 = arith.constant -1.000000e+09 : f32
    "tpu.trace_stop"() : () -> ()
    %220 = vector.shape_cast %3 : vector<1x8x8xi1> to vector<1x8x8xi1>
    %221 = vector.broadcast %220 : vector<1x8x8xi1> to vector<2x8x8xi1>
    %222 = vector.broadcast %cst_93 : f32 to vector<2x8x8xf32>
    %223 = arith.select %221, %219, %222 : vector<2x8x8xi1>, vector<2x8x8xf32>
    %cst_94 = arith.constant dense<0xFF800000> : vector<2x8xf32>
    %224 = vector.multi_reduction <maximumf>, %223, %cst_94 [2] : vector<2x8x8xf32> to vector<2x8xf32>
    %225 = vector.shape_cast %224 : vector<2x8xf32> to vector<2x8x1xf32>
    %226 = vector.broadcast %225 : vector<2x8x1xf32> to vector<2x8x8xf32>
    %227 = arith.subf %223, %226 : vector<2x8x8xf32>
    %228 = math.exp %227 : vector<2x8x8xf32>
    %cst_95 = arith.constant dense<0.000000e+00> : vector<2x8xf32>
    %229 = vector.multi_reduction <add>, %228, %cst_95 [2] : vector<2x8x8xf32> to vector<2x8xf32>
    %230 = vector.shape_cast %229 : vector<2x8xf32> to vector<2x8x1xf32>
    %231 = tpu.reciprocal %230 {approx = true} : vector<2x8x1xf32> -> vector<2x8x1xf32>
    %232 = vector.broadcast %231 : vector<2x8x1xf32> to vector<2x8x8xf32>
    %233 = arith.mulf %228, %232 : vector<2x8x8xf32>
    "tpu.trace_start"() <{level = 10 : i32, message = "bqk,bkd->bqd"}> : () -> ()
    %cst_96 = arith.constant dense<0.000000e+00> : vector<2x8x32xf32>
    %234 = tpu.matmul %233, %218, %cst_96 {dimension_numbers = #tpu.dot_dimension_numbers<[2], [1], [1], [2], [0, 0, 0, 1, 1, 2], [0], [0]>} : vector<2x8x8xf32>, vector<2x8x32xf32>, vector<2x8x32xf32> -> vector<2x8x32xf32>
    "tpu.trace_stop"() : () -> ()
    %235 = vector.shape_cast %234 : vector<2x8x32xf32> to vector<16x32xf32>
    %236 = vector.extract_strided_slice %214 {offsets = [0, 0], sizes = [32, 128], strides = [1, 1]} : vector<128x128xf32> to vector<32x128xf32>
    %cst_97 = arith.constant dense<0.000000e+00> : vector<16x128xf32>
    %237 = tpu.matmul %235, %236, %cst_97 {dimension_numbers = #tpu.dot_dimension_numbers<[1], [0], [0], [1], [0, 0, 1, 1], [], []>} : vector<16x32xf32>, vector<32x128xf32>, vector<16x128xf32> -> vector<16x128xf32>
    %238 = arith.addf %215, %237 : vector<16x128xf32>
    %239 = vector.extract_strided_slice %212 {offsets = [0, 0, 32], sizes = [2, 8, 32], strides = [1, 1, 1]} : vector<2x8x384xf32> to vector<2x8x32xf32>
    %240 = vector.extract_strided_slice %212 {offsets = [0, 0, 160], sizes = [2, 8, 32], strides = [1, 1, 1]} : vector<2x8x384xf32> to vector<2x8x32xf32>
    %241 = vector.extract_strided_slice %212 {offsets = [0, 0, 288], sizes = [2, 8, 32], strides = [1, 1, 1]} : vector<2x8x384xf32> to vector<2x8x32xf32>
    "tpu.trace_start"() <{level = 10 : i32, message = "bqd,bkd->bqk"}> : () -> ()
    %cst_98 = arith.constant dense<0.000000e+00> : vector<2x8x8xf32>
    %242 = tpu.matmul %239, %240, %cst_98 {dimension_numbers = #tpu.dot_dimension_numbers<[2], [2], [1], [1], [0, 0, 0, 1, 1, 1], [0], [0]>} : vector<2x8x32xf32>, vector<2x8x32xf32>, vector<2x8x8xf32> -> vector<2x8x8xf32>
    %cst_99 = arith.constant -1.000000e+09 : f32
    "tpu.trace_stop"() : () -> ()
    %243 = vector.shape_cast %3 : vector<1x8x8xi1> to vector<1x8x8xi1>
    %244 = vector.broadcast %243 : vector<1x8x8xi1> to vector<2x8x8xi1>
    %245 = vector.broadcast %cst_99 : f32 to vector<2x8x8xf32>
    %246 = arith.select %244, %242, %245 : vector<2x8x8xi1>, vector<2x8x8xf32>
    %cst_100 = arith.constant dense<0xFF800000> : vector<2x8xf32>
    %247 = vector.multi_reduction <maximumf>, %246, %cst_100 [2] : vector<2x8x8xf32> to vector<2x8xf32>
    %248 = vector.shape_cast %247 : vector<2x8xf32> to vector<2x8x1xf32>
    %249 = vector.broadcast %248 : vector<2x8x1xf32> to vector<2x8x8xf32>
    %250 = arith.subf %246, %249 : vector<2x8x8xf32>
    %251 = math.exp %250 : vector<2x8x8xf32>
    %cst_101 = arith.constant dense<0.000000e+00> : vector<2x8xf32>
    %252 = vector.multi_reduction <add>, %251, %cst_101 [2] : vector<2x8x8xf32> to vector<2x8xf32>
    %253 = vector.shape_cast %252 : vector<2x8xf32> to vector<2x8x1xf32>
    %254 = tpu.reciprocal %253 {approx = true} : vector<2x8x1xf32> -> vector<2x8x1xf32>
    %255 = vector.broadcast %254 : vector<2x8x1xf32> to vector<2x8x8xf32>
    %256 = arith.mulf %251, %255 : vector<2x8x8xf32>
    "tpu.trace_start"() <{level = 10 : i32, message = "bqk,bkd->bqd"}> : () -> ()
    %cst_102 = arith.constant dense<0.000000e+00> : vector<2x8x32xf32>
    %257 = tpu.matmul %256, %241, %cst_102 {dimension_numbers = #tpu.dot_dimension_numbers<[2], [1], [1], [2], [0, 0, 0, 1, 1, 2], [0], [0]>} : vector<2x8x8xf32>, vector<2x8x32xf32>, vector<2x8x32xf32> -> vector<2x8x32xf32>
    "tpu.trace_stop"() : () -> ()
    %258 = vector.shape_cast %257 : vector<2x8x32xf32> to vector<16x32xf32>
    %259 = vector.extract_strided_slice %214 {offsets = [32, 0], sizes = [32, 128], strides = [1, 1]} : vector<128x128xf32> to vector<32x128xf32>
    %cst_103 = arith.constant dense<0.000000e+00> : vector<16x128xf32>
    %260 = tpu.matmul %258, %259, %cst_103 {dimension_numbers = #tpu.dot_dimension_numbers<[1], [0], [0], [1], [0, 0, 1, 1], [], []>} : vector<16x32xf32>, vector<32x128xf32>, vector<16x128xf32> -> vector<16x128xf32>
    %261 = arith.addf %238, %260 : vector<16x128xf32>
    %262 = vector.extract_strided_slice %212 {offsets = [0, 0, 64], sizes = [2, 8, 32], strides = [1, 1, 1]} : vector<2x8x384xf32> to vector<2x8x32xf32>
    %263 = vector.extract_strided_slice %212 {offsets = [0, 0, 192], sizes = [2, 8, 32], strides = [1, 1, 1]} : vector<2x8x384xf32> to vector<2x8x32xf32>
    %264 = vector.extract_strided_slice %212 {offsets = [0, 0, 320], sizes = [2, 8, 32], strides = [1, 1, 1]} : vector<2x8x384xf32> to vector<2x8x32xf32>
    "tpu.trace_start"() <{level = 10 : i32, message = "bqd,bkd->bqk"}> : () -> ()
    %cst_104 = arith.constant dense<0.000000e+00> : vector<2x8x8xf32>
    %265 = tpu.matmul %262, %263, %cst_104 {dimension_numbers = #tpu.dot_dimension_numbers<[2], [2], [1], [1], [0, 0, 0, 1, 1, 1], [0], [0]>} : vector<2x8x32xf32>, vector<2x8x32xf32>, vector<2x8x8xf32> -> vector<2x8x8xf32>
    %cst_105 = arith.constant -1.000000e+09 : f32
    "tpu.trace_stop"() : () -> ()
    %266 = vector.shape_cast %3 : vector<1x8x8xi1> to vector<1x8x8xi1>
    %267 = vector.broadcast %266 : vector<1x8x8xi1> to vector<2x8x8xi1>
    %268 = vector.broadcast %cst_105 : f32 to vector<2x8x8xf32>
    %269 = arith.select %267, %265, %268 : vector<2x8x8xi1>, vector<2x8x8xf32>
    %cst_106 = arith.constant dense<0xFF800000> : vector<2x8xf32>
    %270 = vector.multi_reduction <maximumf>, %269, %cst_106 [2] : vector<2x8x8xf32> to vector<2x8xf32>
    %271 = vector.shape_cast %270 : vector<2x8xf32> to vector<2x8x1xf32>
    %272 = vector.broadcast %271 : vector<2x8x1xf32> to vector<2x8x8xf32>
    %273 = arith.subf %269, %272 : vector<2x8x8xf32>
    %274 = math.exp %273 : vector<2x8x8xf32>
    %cst_107 = arith.constant dense<0.000000e+00> : vector<2x8xf32>
    %275 = vector.multi_reduction <add>, %274, %cst_107 [2] : vector<2x8x8xf32> to vector<2x8xf32>
    %276 = vector.shape_cast %275 : vector<2x8xf32> to vector<2x8x1xf32>
    %277 = tpu.reciprocal %276 {approx = true} : vector<2x8x1xf32> -> vector<2x8x1xf32>
    %278 = vector.broadcast %277 : vector<2x8x1xf32> to vector<2x8x8xf32>
    %279 = arith.mulf %274, %278 : vector<2x8x8xf32>
    "tpu.trace_start"() <{level = 10 : i32, message = "bqk,bkd->bqd"}> : () -> ()
    %cst_108 = arith.constant dense<0.000000e+00> : vector<2x8x32xf32>
    %280 = tpu.matmul %279, %264, %cst_108 {dimension_numbers = #tpu.dot_dimension_numbers<[2], [1], [1], [2], [0, 0, 0, 1, 1, 2], [0], [0]>} : vector<2x8x8xf32>, vector<2x8x32xf32>, vector<2x8x32xf32> -> vector<2x8x32xf32>
    "tpu.trace_stop"() : () -> ()
    %281 = vector.shape_cast %280 : vector<2x8x32xf32> to vector<16x32xf32>
    %282 = vector.extract_strided_slice %214 {offsets = [64, 0], sizes = [32, 128], strides = [1, 1]} : vector<128x128xf32> to vector<32x128xf32>
    %cst_109 = arith.constant dense<0.000000e+00> : vector<16x128xf32>
    %283 = tpu.matmul %281, %282, %cst_109 {dimension_numbers = #tpu.dot_dimension_numbers<[1], [0], [0], [1], [0, 0, 1, 1], [], []>} : vector<16x32xf32>, vector<32x128xf32>, vector<16x128xf32> -> vector<16x128xf32>
    %284 = arith.addf %261, %283 : vector<16x128xf32>
    %285 = vector.extract_strided_slice %212 {offsets = [0, 0, 96], sizes = [2, 8, 32], strides = [1, 1, 1]} : vector<2x8x384xf32> to vector<2x8x32xf32>
    %286 = vector.extract_strided_slice %212 {offsets = [0, 0, 224], sizes = [2, 8, 32], strides = [1, 1, 1]} : vector<2x8x384xf32> to vector<2x8x32xf32>
    %287 = vector.extract_strided_slice %212 {offsets = [0, 0, 352], sizes = [2, 8, 32], strides = [1, 1, 1]} : vector<2x8x384xf32> to vector<2x8x32xf32>
    "tpu.trace_start"() <{level = 10 : i32, message = "bqd,bkd->bqk"}> : () -> ()
    %cst_110 = arith.constant dense<0.000000e+00> : vector<2x8x8xf32>
    %288 = tpu.matmul %285, %286, %cst_110 {dimension_numbers = #tpu.dot_dimension_numbers<[2], [2], [1], [1], [0, 0, 0, 1, 1, 1], [0], [0]>} : vector<2x8x32xf32>, vector<2x8x32xf32>, vector<2x8x8xf32> -> vector<2x8x8xf32>
    %cst_111 = arith.constant -1.000000e+09 : f32
    "tpu.trace_stop"() : () -> ()
    %289 = vector.shape_cast %3 : vector<1x8x8xi1> to vector<1x8x8xi1>
    %290 = vector.broadcast %289 : vector<1x8x8xi1> to vector<2x8x8xi1>
    %291 = vector.broadcast %cst_111 : f32 to vector<2x8x8xf32>
    %292 = arith.select %290, %288, %291 : vector<2x8x8xi1>, vector<2x8x8xf32>
    %cst_112 = arith.constant dense<0xFF800000> : vector<2x8xf32>
    %293 = vector.multi_reduction <maximumf>, %292, %cst_112 [2] : vector<2x8x8xf32> to vector<2x8xf32>
    %294 = vector.shape_cast %293 : vector<2x8xf32> to vector<2x8x1xf32>
    %295 = vector.broadcast %294 : vector<2x8x1xf32> to vector<2x8x8xf32>
    %296 = arith.subf %292, %295 : vector<2x8x8xf32>
    %297 = math.exp %296 : vector<2x8x8xf32>
    %cst_113 = arith.constant dense<0.000000e+00> : vector<2x8xf32>
    %298 = vector.multi_reduction <add>, %297, %cst_113 [2] : vector<2x8x8xf32> to vector<2x8xf32>
    %299 = vector.shape_cast %298 : vector<2x8xf32> to vector<2x8x1xf32>
    %300 = tpu.reciprocal %299 {approx = true} : vector<2x8x1xf32> -> vector<2x8x1xf32>
    %301 = vector.broadcast %300 : vector<2x8x1xf32> to vector<2x8x8xf32>
    %302 = arith.mulf %297, %301 : vector<2x8x8xf32>
    "tpu.trace_start"() <{level = 10 : i32, message = "bqk,bkd->bqd"}> : () -> ()
    %cst_114 = arith.constant dense<0.000000e+00> : vector<2x8x32xf32>
    %303 = tpu.matmul %302, %287, %cst_114 {dimension_numbers = #tpu.dot_dimension_numbers<[2], [1], [1], [2], [0, 0, 0, 1, 1, 2], [0], [0]>} : vector<2x8x8xf32>, vector<2x8x32xf32>, vector<2x8x32xf32> -> vector<2x8x32xf32>
    "tpu.trace_stop"() : () -> ()
    %304 = vector.shape_cast %303 : vector<2x8x32xf32> to vector<16x32xf32>
    %305 = vector.extract_strided_slice %214 {offsets = [96, 0], sizes = [32, 128], strides = [1, 1]} : vector<128x128xf32> to vector<32x128xf32>
    %cst_115 = arith.constant dense<0.000000e+00> : vector<16x128xf32>
    %306 = tpu.matmul %304, %305, %cst_115 {dimension_numbers = #tpu.dot_dimension_numbers<[1], [0], [0], [1], [0, 0, 1, 1], [], []>} : vector<16x32xf32>, vector<32x128xf32>, vector<16x128xf32> -> vector<16x128xf32>
    %307 = arith.addf %284, %306 : vector<16x128xf32>
    %308 = arith.addf %204, %307 : vector<16x128xf32>
    %c1_116 = arith.constant 1 : index
    %c0_117 = arith.constant 0 : index
    %c0_118 = arith.constant 0 : index
    %309 = vector.load %arg4[%c1_116, %c0_117, %c0_118] : memref<2x1x128xf32, #tpu.memory_space<vmem>>, vector<1x1x128xf32>
    %310 = vector.shape_cast %309 : vector<1x1x128xf32> to vector<1x128xf32>
    %311 = vector.broadcast %310 : vector<1x128xf32> to vector<16x128xf32>
    %312 = arith.addf %308, %311 : vector<16x128xf32>
    %c1_119 = arith.constant 1 : index
    %c0_120 = arith.constant 0 : index
    %c0_121 = arith.constant 0 : index
    %313 = vector.load %arg7[%c1_119, %c0_120, %c0_121] : memref<2x1x128xf32, #tpu.memory_space<vmem>>, vector<1x1x128xf32>
    %314 = vector.shape_cast %313 : vector<1x1x128xf32> to vector<1x128xf32>
    %c1_122 = arith.constant 1 : index
    %c0_123 = arith.constant 0 : index
    %c0_124 = arith.constant 0 : index
    %315 = vector.load %arg8[%c1_122, %c0_123, %c0_124] : memref<2x1x128xf32, #tpu.memory_space<vmem>>, vector<1x1x128xf32>
    %316 = vector.shape_cast %315 : vector<1x1x128xf32> to vector<1x128xf32>
    %cst_125 = arith.constant dense<0.000000e+00> : vector<16xf32>
    %317 = vector.multi_reduction <add>, %312, %cst_125 [1] : vector<16x128xf32> to vector<16xf32>
    %318 = vector.shape_cast %317 : vector<16xf32> to vector<16x1xf32>
    %cst_126 = arith.constant 1.280000e+02 : f32
    %319 = vector.broadcast %cst_126 : f32 to vector<16x1xf32>
    %320 = arith.divf %318, %319 : vector<16x1xf32>
    %321 = vector.broadcast %320 : vector<16x1xf32> to vector<16x128xf32>
    %322 = arith.subf %312, %321 : vector<16x128xf32>
    %323 = arith.mulf %322, %322 : vector<16x128xf32>
    %cst_127 = arith.constant dense<0.000000e+00> : vector<16xf32>
    %324 = vector.multi_reduction <add>, %323, %cst_127 [1] : vector<16x128xf32> to vector<16xf32>
    %325 = vector.shape_cast %324 : vector<16xf32> to vector<16x1xf32>
    %cst_128 = arith.constant 1.280000e+02 : f32
    %326 = vector.broadcast %cst_128 : f32 to vector<16x1xf32>
    %327 = arith.divf %325, %326 : vector<16x1xf32>
    %328 = vector.broadcast %320 : vector<16x1xf32> to vector<16x128xf32>
    %329 = arith.subf %312, %328 : vector<16x128xf32>
    %cst_129 = arith.constant 9.99999974E-6 : f32
    %330 = vector.broadcast %cst_129 : f32 to vector<16x1xf32>
    %331 = arith.addf %327, %330 : vector<16x1xf32>
    %332 = math.rsqrt %331 : vector<16x1xf32>
    %333 = vector.broadcast %332 : vector<16x1xf32> to vector<16x128xf32>
    %334 = arith.mulf %329, %333 : vector<16x128xf32>
    %335 = vector.broadcast %314 : vector<1x128xf32> to vector<16x128xf32>
    %336 = arith.mulf %334, %335 : vector<16x128xf32>
    %337 = vector.broadcast %316 : vector<1x128xf32> to vector<16x128xf32>
    %338 = arith.addf %336, %337 : vector<16x128xf32>
    %c1_130 = arith.constant 1 : index
    %c0_131 = arith.constant 0 : index
    %c0_132 = arith.constant 0 : index
    %339 = vector.load %arg9[%c1_130, %c0_131, %c0_132] : memref<2x128x512xf32, #tpu.memory_space<vmem>>, vector<1x128x512xf32>
    %340 = vector.shape_cast %339 : vector<1x128x512xf32> to vector<128x512xf32>
    %cst_133 = arith.constant dense<0.000000e+00> : vector<16x512xf32>
    %341 = tpu.matmul %338, %340, %cst_133 {dimension_numbers = #tpu.dot_dimension_numbers<[1], [0], [0], [1], [0, 0, 1, 1], [], []>} : vector<16x128xf32>, vector<128x512xf32>, vector<16x512xf32> -> vector<16x512xf32>
    %cst_134 = arith.constant 5.000000e-01 : f32
    %342 = vector.broadcast %cst_134 : f32 to vector<16x512xf32>
    %343 = arith.mulf %342, %341 : vector<16x512xf32>
    %cst_135 = arith.constant 0.707106769 : f32
    %344 = vector.broadcast %cst_135 : f32 to vector<16x512xf32>
    %345 = arith.mulf %341, %344 : vector<16x512xf32>
    %346 = math.erf %345 : vector<16x512xf32>
    %cst_136 = arith.constant 1.000000e+00 : f32
    %347 = vector.broadcast %cst_136 : f32 to vector<16x512xf32>
    %348 = arith.addf %347, %346 : vector<16x512xf32>
    %349 = arith.mulf %343, %348 : vector<16x512xf32>
    %c1_137 = arith.constant 1 : index
    %c0_138 = arith.constant 0 : index
    %c0_139 = arith.constant 0 : index
    %350 = vector.load %arg10[%c1_137, %c0_138, %c0_139] : memref<2x512x128xf32, #tpu.memory_space<vmem>>, vector<1x512x128xf32>
    %351 = vector.shape_cast %350 : vector<1x512x128xf32> to vector<512x128xf32>
    %cst_140 = arith.constant dense<0.000000e+00> : vector<16x128xf32>
    %352 = tpu.matmul %349, %351, %cst_140 {dimension_numbers = #tpu.dot_dimension_numbers<[1], [0], [0], [1], [0, 0, 1, 1], [], []>} : vector<16x512xf32>, vector<512x128xf32>, vector<16x128xf32> -> vector<16x128xf32>
    %353 = arith.addf %338, %352 : vector<16x128xf32>
    %c0_141 = arith.constant 0 : index
    %c0_142 = arith.constant 0 : index
    %354 = vector.load %arg11[%c0_141, %c0_142] : memref<1x128xf32, #tpu.memory_space<vmem>>, vector<1x128xf32>
    %c0_143 = arith.constant 0 : index
    %c0_144 = arith.constant 0 : index
    %355 = vector.load %arg12[%c0_143, %c0_144] : memref<1x128xf32, #tpu.memory_space<vmem>>, vector<1x128xf32>
    %cst_145 = arith.constant dense<0.000000e+00> : vector<16xf32>
    %356 = vector.multi_reduction <add>, %353, %cst_145 [1] : vector<16x128xf32> to vector<16xf32>
    %357 = vector.shape_cast %356 : vector<16xf32> to vector<16x1xf32>
    %cst_146 = arith.constant 1.280000e+02 : f32
    %358 = vector.broadcast %cst_146 : f32 to vector<16x1xf32>
    %359 = arith.divf %357, %358 : vector<16x1xf32>
    %360 = vector.broadcast %359 : vector<16x1xf32> to vector<16x128xf32>
    %361 = arith.subf %353, %360 : vector<16x128xf32>
    %362 = arith.mulf %361, %361 : vector<16x128xf32>
    %cst_147 = arith.constant dense<0.000000e+00> : vector<16xf32>
    %363 = vector.multi_reduction <add>, %362, %cst_147 [1] : vector<16x128xf32> to vector<16xf32>
    %364 = vector.shape_cast %363 : vector<16xf32> to vector<16x1xf32>
    %cst_148 = arith.constant 1.280000e+02 : f32
    %365 = vector.broadcast %cst_148 : f32 to vector<16x1xf32>
    %366 = arith.divf %364, %365 : vector<16x1xf32>
    %367 = vector.broadcast %359 : vector<16x1xf32> to vector<16x128xf32>
    %368 = arith.subf %353, %367 : vector<16x128xf32>
    %cst_149 = arith.constant 9.99999974E-6 : f32
    %369 = vector.broadcast %cst_149 : f32 to vector<16x1xf32>
    %370 = arith.addf %366, %369 : vector<16x1xf32>
    %371 = math.rsqrt %370 : vector<16x1xf32>
    %372 = vector.broadcast %371 : vector<16x1xf32> to vector<16x128xf32>
    %373 = arith.mulf %368, %372 : vector<16x128xf32>
    %374 = vector.broadcast %354 : vector<1x128xf32> to vector<16x128xf32>
    %375 = arith.mulf %373, %374 : vector<16x128xf32>
    %376 = vector.broadcast %355 : vector<1x128xf32> to vector<16x128xf32>
    %377 = arith.addf %375, %376 : vector<16x128xf32>
    %c0_150 = arith.constant 0 : index
    %c0_151 = arith.constant 0 : index
    %378 = vector.load %arg13[%c0_150, %c0_151] : memref<128x128xf32, #tpu.memory_space<vmem>>, vector<128x128xf32>
    %cst_152 = arith.constant dense<0.000000e+00> : vector<16x128xf32>
    %379 = tpu.matmul %377, %378, %cst_152 {dimension_numbers = #tpu.dot_dimension_numbers<[1], [0], [0], [1], [0, 0, 1, 1], [], []>} : vector<16x128xf32>, vector<128x128xf32>, vector<16x128xf32> -> vector<16x128xf32>
    %c0_153 = arith.constant 0 : index
    %c0_154 = arith.constant 0 : index
    %380 = vector.load %arg14[%c0_153, %c0_154] : memref<16x128xf32, #tpu.memory_space<vmem>>, vector<16x128xf32>
    tpu.vector_store %arg14[%c0_153, %c0_154], %379 {strides = array<i32>} : memref<16x128xf32, #tpu.memory_space<vmem>>, vector<16x128xf32>,
    return
  }
}

</mosaic_0001>

<bundles_post_ra>
// kernel: tpu_custom_call.1
= control target key start
LH: loop header
LB: loop body
LE: loop exit
PB: predicated region body
PF: predicated region fallthrough
CT: control target
= control target key end

     0   :  { %19 = vsyncpa [#allocation3], 0  ;;  %s5115_s0 = inlined_call_operand.hbm [shape: f32[16,128], index: 0, kind: input, shape index: {}]   ;;  %s5116_s1 = inlined_call_operand.hbm [shape: f32[2,128,384], index: 1, kind: input, shape index: {}]   ;;  %s5117_s2 = inlined_call_operand.hbm [shape: f32[2,1,384], index: 2, kind: input, shape index: {}]   ;;  %s5118_s3 = inlined_call_operand.hbm [shape: f32[2,128,128], index: 3, kind: input, shape index: {}]   ;;  %s5119_s4 = inlined_call_operand.vmem [shape: f32[2,1,128], index: 4, kind: input, shape index: {}]   ;;  %s5120_s5 = inlined_call_operand.vmem [shape: f32[2,1,128], index: 5, kind: input, shape index: {}]   ;;  %s5121_s6 = inlined_call_operand.hbm [shape: f32[2,1,128], index: 6, kind: input, shape index: {}]   ;;  %s5122_s7 = inlined_call_operand.vmem [shape: f32[2,1,128], index: 7, kind: input, shape index: {}]   ;;  %s5123_s8 = inlined_call_operand.hbm [shape: f32[2,1,128], index: 8, kind: input, shape index: {}]   ;;  %s5124_s9 = inlined_call_operand.hbm [shape: f32[2,128,512], index: 9, kind: input, shape index: {}]   ;;  %s5125_s10 = inlined_call_operand.hbm [shape: f32[2,512,128], index: 10, kind: input, shape index: {}]   ;;  %s5126_s11 = inlined_call_operand.vmem [shape: f32[1,128], index: 11, kind: input, shape index: {}]   ;;  %s5127_s12 = inlined_call_operand.vmem [shape: f32[1,128], index: 12, kind: input, shape index: {}]   ;;  %s5128_s13 = inlined_call_operand.hbm [shape: f32[128,128], index: 13, kind: input, shape index: {}]   ;;  %s5129_s14 = inlined_call_operand.hbm [shape: f32[16,128], index: 14, kind: output, shape index: {}]  }
   0x1   :  { %20 = vsyncpa [#allocation6], 0 }
   0x2   :  { %21 = vsyncpa [#allocation9], 0 }
   0x3   :  { %22 = vsyncpa [#allocation12], 0 }
   0x4   :  { %23 = vsyncpa [#allocation15], 0  ;;  %s42_s15 = sshll.u32 %s5116_s1, 4  ;;  %s43_s15 = int_to_ptr.hbm [resolvable:$true] %s42_s15 }
   0x5   :  { %24 = vsyncpa [#allocation4], 0  ;;  %s3938_s16 = smov [#allocation5]   ;;  %s3939_s18 = smov 384  }
   0x6   :  { %s44_s17 = sshll.u32 %s3938_s16, 4  ;;  %s3940_s19 = smov 24   ;;  %s45_s17 = int_to_ptr.vmem [resolvable:$true] %s44_s17 }
   0x7   :  { %50 = dma.hbm_to_vmem [thread:$0]  %s43_s15, 12288, %s45_s17, [#allocation6], %s3939_s18, %s3939_s18, %s3940_s19  }
   0x8   :  { %s68_s22 = sshll.u32 %s5118_s3, 4  ;;  %s3941_s23 = smov [#allocation8]   ;;  %s69_s22 = int_to_ptr.hbm [resolvable:$true] %s68_s22 }
   0x9   :  { %s70_s24 = sshll.u32 %s3941_s23, 4  ;;  %s3942_s25 = smov 128   ;;  %s71_s24 = int_to_ptr.vmem [resolvable:$true] %s70_s24 }
   0xa   :  { %s3943_s26 = smov 8   ;;  %s100_s28 = sshll.u32 %s5123_s8, 4  ;;  %s101_s28 = int_to_ptr.hbm [resolvable:$true] %s100_s28 }
   0xb   :  { %76 = dma.hbm_to_vmem [thread:$0]  %s69_s22, 4096, %s71_s24, [#allocation9], %s3942_s25, %s3942_s25, %s3943_s26  }
   0xc   :  { %s3944_s29 = smov [#allocation11]   ;;  %s126_s16 = sshll.u32 %s5125_s10, 4  ;;  %s127_s16 = int_to_ptr.hbm [resolvable:$true] %s126_s16 }
   0xd   :  { %s102_s30 = sshll.u32 %s3944_s29, 4  ;;  %s3945_s17 = smov 16   ;;  %s103_s30 = int_to_ptr.vmem [resolvable:$true] %s102_s30 }
   0xe   :  { %s3946_s18 = smov 1   ;;  %s3947_s19 = smov [#allocation14]  }
   0xf   :  { %108 = dma.hbm_to_vmem [thread:$0]  %s101_s28, 32, %s103_s30, [#allocation12], %s3945_s17, %s3945_s17, %s3946_s18  }
  0x10   :  { %s128_s20 = sshll.u32 %s3947_s19, 4  ;;  %s29_s8 = sshll.u32 %s5115_s0, 4  ;;  %s129_s20 = int_to_ptr.vmem [resolvable:$true] %s128_s20  ;;  %s30_s8 = int_to_ptr.hbm [resolvable:$true] %s29_s8 }
  0x11   :  { %134 = dma.hbm_to_vmem [thread:$0]  %s127_s16, 16384, %s129_s20, [#allocation15], %s3942_s25, %s3942_s25, %s3943_s26  }
  0x12   :  { %s55_s24 = sshll.u32 %s5117_s2, 4  ;;  %s3948_s1 = smov [#allocation2]   ;;  %s56_s24 = int_to_ptr.hbm [resolvable:$true] %s55_s24 }
  0x13   :  { %s31_s27 = sshll.u32 %s3948_s1, 4  ;;  %s3949_s28 = smov [#allocation7]   ;;  %s32_s27 = int_to_ptr.vmem [resolvable:$true] %s31_s27 }
  0x14   :  { %37 = dma.hbm_to_vmem [thread:$0]  %s30_s8, 256, %s32_s27, [#allocation3], %s3942_s25, %s3942_s25, %s3943_s26  }
  0x15   :  { %s57_s0 = sshll.u32 %s3949_s28, 4  ;;  %s3950_s29 = smov 48   ;;  %s58_s0 = int_to_ptr.vmem [resolvable:$true] %s57_s0 }
  0x16   :  { %s3951_s30 = smov 3   ;;  %s85_s16 = sshll.u32 %s5121_s6, 4  ;;  %s86_s16 = int_to_ptr.hbm [resolvable:$true] %s85_s16 }
  0x17   :  { %63 = dma.hbm_to_vmem [thread:$0]  %s56_s24, 96, %s58_s0, [#allocation6], %s3950_s29, %s3950_s29, %s3951_s30  }
  0x18   :  { %s3952_s2 = smov [#allocation10]   ;;  %s113_s22 = sshll.u32 %s5124_s9, 4  ;;  %s114_s22 = int_to_ptr.hbm [resolvable:$true] %s113_s22 }
  0x19   :  { %s87_s19 = sshll.u32 %s3952_s2, 4  ;;  %s3953_s8 = smov [#allocation13]   ;;  %s88_s19 = int_to_ptr.vmem [resolvable:$true] %s87_s19 }
  0x1a   :  { %93 = dma.hbm_to_vmem [thread:$0]  %s86_s16, 32, %s88_s19, [#allocation9], %s3945_s17, %s3945_s17, %s3946_s18  }
  0x1b   :  { %s115_s10 = sshll.u32 %s3953_s8, 4  ;;  %s3954_s23 = smov 512   ;;  %s116_s10 = int_to_ptr.vmem [resolvable:$true] %s115_s10 }
  0x1c   :  { %s3955_s24 = smov 32   ;;  %s143_s27 = sshll.u32 %s5128_s13, 4  ;;  %s144_s27 = int_to_ptr.hbm [resolvable:$true] %s143_s27 }
  0x1d   :  { %121 = dma.hbm_to_vmem [thread:$0]  %s114_s22, 16384, %s116_s10, [#allocation12], %s3954_s23, %s3954_s23, %s3955_s24  }
  0x1e   :  { %s3956_s28 = smov [#allocation16]  }
  0x1f   :  { %s145_s0 = sshll.u32 %s3956_s28, 4  ;;  %s146_s0 = int_to_ptr.vmem [resolvable:$true] %s145_s0 }
  0x20   :  { %151 = dma.hbm_to_vmem [thread:$0]  %s144_s27, 2048, %s146_s0, [#allocation15], %s3942_s25, %s3942_s25, %s3943_s26  }
  0x21   :  { %3926 = dma.done.wait [#allocation3], 256  }
  0x22   :  { %3927 = vsyncadd [#allocation3], 4294967040 }
  0x23   :  { %3928 = dma.done.wait [#allocation6], 12384  }
  0x24   :  { %3929 = vsyncadd [#allocation6], 4294954912 }
  0x25   :  { %3930 = dma.done.wait [#allocation9], 4128  }
  0x26   :  { %3931 = vsyncadd [#allocation9], 4294963168 }
  0x27   :  { %3932 = dma.done.wait [#allocation12], 16416  }
  0x28   :  { %3933 = vsyncadd [#allocation12], 4294950880 }
  0x29   :  { %3934 = dma.done.wait [#allocation15], 18432  }
  0x2a   :  { %3935 = vsyncadd [#allocation15], 4294948864  ;;  %v188_v0 = vld [vmem:[#allocation2] sm:$0xff]  ;;  %v189_v1 = vld [vmem:[#allocation2 + $0x8] sm:$0xff]  ;;  %v3957_v2 = vmov 128.0   ;;  %vm395_vm7 = vcmask 261120  }
  0x2b   :  { %197 = vadd.xlane.f32.xlu0 %v188_v0  ;;  %3568 = vrcp.f32 %v3957_v2  ;;  %v299_v5 = vld [vmem:[#allocation5 + $0x168] sm:$0xff]  ;;  %v300_v6 = vld [vmem:[#allocation5 + $0x170] sm:$0xff]  ;;  %v301_v7 = vld [vmem:[#allocation5 + $0x178] sm:$0xff]  ;;  %vm452_vm9 = vcmask 64512   ;;  %s3958_s17 = smov 96   ;;  %s3959_s18 = smov 64  }
  0x2c   :  { %310 = vmatpush.msra.mxu0 %v299_v5  ;;  %333 = vmatpush.msra.mxu1 %v300_v6  ;;  %v296_v8 = vld [vmem:[#allocation5 + $0x150] sm:$0xff]  ;;  %v297_v9 = vld [vmem:[#allocation5 + $0x158] sm:$0xff]  ;;  %v298_v10 = vld [vmem:[#allocation5 + $0x160] sm:$0xff] }
  0x2d   :  { %356 = vmatpush.msra.mxu2 %v301_v7  ;;  %v293_v23 = vld [vmem:[#allocation5 + $0x138] sm:$0xff]  ;;  %v294_v24 = vld [vmem:[#allocation5 + $0x140] sm:$0xff]  ;;  %v295_v25 = vld [vmem:[#allocation5 + $0x148] sm:$0xff] }
  0x2e   :  { %311 = vmatpush.msra.mxu0 %v296_v8  ;;  %334 = vmatpush.msra.mxu1 %v297_v9  ;;  %v290_v26 = vld [vmem:[#allocation5 + $0x120] sm:$0xff]  ;;  %v291_v27 = vld [vmem:[#allocation5 + $0x128] sm:$0xff]  ;;  %v292_v28 = vld [vmem:[#allocation5 + $0x130] sm:$0xff] }
  0x2f   :  { %357 = vmatpush.msra.mxu2 %v298_v10  ;;  %v287_v29 = vld [vmem:[#allocation5 + $0x108] sm:$0xff]  ;;  %v288_v30 = vld [vmem:[#allocation5 + $0x110] sm:$0xff]  ;;  %v289_v31 = vld [vmem:[#allocation5 + $0x118] sm:$0xff] }
  0x30   :  { %312 = vmatpush.msra.mxu0 %v293_v23  ;;  %335 = vmatpush.msra.mxu1 %v294_v24  ;;  %v284_v32 = vld [vmem:[#allocation5 + $0xf0] sm:$0xff]  ;;  %v285_v33 = vld [vmem:[#allocation5 + $0xf8] sm:$0xff]  ;;  %v286_v34 = vld [vmem:[#allocation5 + $0x100] sm:$0xff] }
  0x31   :  { %v3569_v3 = vpop.eup %3568  ;;  %358 = vmatpush.msra.mxu2 %v295_v25  ;;  %v281_v35 = vld [vmem:[#allocation5 + $0xd8] sm:$0xff]  ;;  %v282_v36 = vld [vmem:[#allocation5 + $0xe0] sm:$0xff]  ;;  %v283_v37 = vld [vmem:[#allocation5 + $0xe8] sm:$0xff] }
  0x32   :  { %v202_v4 = vmul.f32 128.0, %v3569_v3  ;;  %vm206_vm0 = vweird.f32 %v3569_v3  ;;  %313 = vmatpush.msra.mxu0 %v290_v26  ;;  %336 = vmatpush.msra.mxu1 %v291_v27  ;;  %v278_v38 = vld [vmem:[#allocation5 + $0xc0] sm:$0xff]  ;;  %v279_v39 = vld [vmem:[#allocation5 + $0xc8] sm:$0xff]  ;;  %v280_v40 = vld [vmem:[#allocation5 + $0xd0] sm:$0xff] }
  0x33   :  { %199 = vadd.xlane.f32.xlu0 %v189_v1  ;;  %359 = vmatpush.msra.mxu2 %v292_v28  ;;  %v275_v41 = vld [vmem:[#allocation5 + $0xa8] sm:$0xff]  ;;  %v276_v42 = vld [vmem:[#allocation5 + $0xb0] sm:$0xff]  ;;  %v277_v43 = vld [vmem:[#allocation5 + $0xb8] sm:$0xff] }
  0x34   :  { %v203_v11 = vsub.f32 1.0, %v202_v4  ;;  %314 = vmatpush.msra.mxu0 %v287_v29  ;;  %337 = vmatpush.msra.mxu1 %v288_v30  ;;  %v272_v44 = vld [vmem:[#allocation5 + $0x90] sm:$0xff]  ;;  %v273_v45 = vld [vmem:[#allocation5 + $0x98] sm:$0xff]  ;;  %v274_v46 = vld [vmem:[#allocation5 + $0xa0] sm:$0xff] }
  0x35   :  { %360 = vmatpush.msra.mxu2 %v289_v31  ;;  %v269_v47 = vld [vmem:[#allocation5 + $0x78] sm:$0xff]  ;;  %v270_v48 = vld [vmem:[#allocation5 + $0x80] sm:$0xff]  ;;  %v271_v49 = vld [vmem:[#allocation5 + $0x88] sm:$0xff] }
  0x36   :  { %v204_v12 = vmul.f32 %v3569_v3, %v203_v11  ;;  %315 = vmatpush.msra.mxu0 %v284_v32  ;;  %338 = vmatpush.msra.mxu1 %v285_v33  ;;  %v266_v50 = vld [vmem:[#allocation5 + $0x60] sm:$0xff]  ;;  %v267_v51 = vld [vmem:[#allocation5 + $0x68] sm:$0xff]  ;;  %v268_v52 = vld [vmem:[#allocation5 + $0x70] sm:$0xff] }
  0x37   :  { %361 = vmatpush.msra.mxu2 %v286_v34  ;;  %v263_v53 = vld [vmem:[#allocation5 + $0x48] sm:$0xff]  ;;  %v264_v54 = vld [vmem:[#allocation5 + $0x50] sm:$0xff]  ;;  %v265_v55 = vld [vmem:[#allocation5 + $0x58] sm:$0xff] }
  0x38   :  { %v205_v13 = vadd.f32 %v3569_v3, %v204_v12  ;;  %316 = vmatpush.msra.mxu0 %v281_v35  ;;  %339 = vmatpush.msra.mxu1 %v282_v36  ;;  %v260_v56 = vld [vmem:[#allocation5 + $0x30] sm:$0xff]  ;;  %v261_v57 = vld [vmem:[#allocation5 + $0x38] sm:$0xff]  ;;  %v262_v58 = vld [vmem:[#allocation5 + $0x40] sm:$0xff] }
  0x39   :  { %362 = vmatpush.msra.mxu2 %v283_v37  ;;  %v257_v59 = vld [vmem:[#allocation5 + $0x18] sm:$0xff]  ;;  %v258_v60 = vld [vmem:[#allocation5 + $0x20] sm:$0xff]  ;;  %v259_v61 = vld [vmem:[#allocation5 + $0x28] sm:$0xff] }
  0x3a   :  { %v4082_v14 = vsel %vm206_vm0, %v3569_v3, %v205_v13  ;;  %317 = vmatpush.msra.mxu0 %v278_v38  ;;  %340 = vmatpush.msra.mxu1 %v279_v39  ;;  %v254_v62 = vld [vmem:[#allocation5] sm:$0xff]  ;;  %v255_v63 = vld [vmem:[#allocation5 + $0x8] sm:$0xff] }
  0x3b   :  { %363 = vmatpush.msra.mxu2 %v280_v40  ;;  %v302_v31 = vld [vmem:[#allocation7] sm:$0x7] }
  0x3c   :  { %318 = vmatpush.msra.mxu0 %v275_v41  ;;  %341 = vmatpush.msra.mxu1 %v276_v42  ;;  %v305_v32 = vperm.slane %v302_v31, 1  ;;  %v304_v33 = vperm.slane %v302_v31, 0  ;;  %v306_v37 = vperm.slane %v302_v31, 2 }
  0x3d   :  { %364 = vmatpush.msra.mxu2 %v277_v43 }
  0x3e   :  { %319 = vmatpush.msra.mxu0 %v272_v44  ;;  %342 = vmatpush.msra.mxu1 %v273_v45 }
  0x3f   :  { %365 = vmatpush.msra.mxu2 %v274_v46  ;;  %v190_v46 = vlaneseq }
  0x40   :  { %320 = vmatpush.msra.mxu0 %v269_v47  ;;  %343 = vmatpush.msra.mxu1 %v270_v48 }
  0x41   :  { %366 = vmatpush.msra.mxu2 %v271_v49  ;;  %v191_v47 = vshrl.u32 %v190_v46, 7  ;;  %v193_v48 = vand.u32 127, %v190_v46  ;;  %v385_v46 = vld [vmem:[#allocation8 + $0x30] sm:$0xff] }
  0x42   :  { %321 = vmatpush.msra.mxu0 %v266_v50  ;;  %344 = vmatpush.msra.mxu1 %v267_v51 }
  0x43   :  { %367 = vmatpush.msra.mxu2 %v268_v52  ;;  %vm4133_vm8 = vcmp.le.s32.totalorder %v193_v48, %v191_v47  ;;  %v384_v47 = vld [vmem:[#allocation8 + $0x28] sm:$0xff] }
  0x44   :  { %322 = vmatpush.msra.mxu0 %v263_v53  ;;  %345 = vmatpush.msra.mxu1 %v264_v54 }
  0x45   :  { %368 = vmatpush.msra.mxu2 %v265_v55 }
  0x46   :  { %323 = vmatpush.msra.mxu0 %v260_v56  ;;  %346 = vmatpush.msra.mxu1 %v261_v57 }
  0x47   :  { %369 = vmatpush.msra.mxu2 %v262_v58 }
  0x48   :  { %324 = vmatpush.msra.mxu0 %v257_v59  ;;  %347 = vmatpush.msra.mxu1 %v258_v60 }
  0x49   :  { %370 = vmatpush.msra.mxu2 %v259_v61 }
  0x4a   :  { %325 = vmatpush.msra.mxu0 %v254_v62  ;;  %348 = vmatpush.msra.mxu1 %v255_v63 }
  0x9e   :  { %v198_v15 = vpop.xlane.xlu0 %197 }
  0x9f   :  { %v208_v16 = vmul.f32 %v4082_v14, %v198_v15 }
  0xa1   :  { %v4085_v17 = vsub.f32 %v188_v0, %v208_v16  ;;  %v256_v0 = vld [vmem:[#allocation5 + $0x10] sm:$0xff] }
  0xa2   :  { %371 = vmatpush.msra.mxu2 %v256_v0  ;;  %v3556_v16 = vld [vmem:[%s5120_s5] ss:$0 sm:$0xff] }
  0xa3   :  { %v212_v18 = vmul.f32 %v4085_v17, %v4085_v17 }
  0xa5   :  { %214 = vadd.xlane.f32.xlu1 %v212_v18 }
  0xa6   :  { %v200_v19 = vpop.xlane.xlu0 %199 }
  0xa7   :  { %v209_v20 = vmul.f32 %v4082_v14, %v200_v19 }
  0xa9   :  { %v4090_v21 = vsub.f32 %v189_v1, %v209_v20 }
  0xab   :  { %v213_v22 = vmul.f32 %v4090_v21, %v4090_v21 }
  0xad   :  { %216 = vadd.xlane.f32.xlu1 %v213_v22  ;;  %v3557_v22 = vld [vmem:[#allocation10] ss:$0 sm:$0xff] }
 0x118   :  { %v215_v1 = vpop.xlane.xlu1 %214 }
 0x119   :  { %v218_v2 = vmul.f32 %v215_v1, %v4082_v14 }
 0x11b   :  { %v220_v3 = vadd.f32 1e-05, %v218_v2 }
 0x11d   :  { %3570 = vrsqrt.f32 %v220_v3  ;;  %vm228_vm2 = vweird.f32 %v220_v3 }
 0x120   :  { %v217_v4 = vpop.xlane.xlu1 %216 }
 0x121   :  { %v219_v5 = vmul.f32 %v217_v4, %v4082_v14 }
 0x123   :  { %v3571_v6 = vpop.eup %3570  ;;  %v221_v7 = vadd.f32 1e-05, %v219_v5 }
 0x124   :  { %v223_v8 = vmul.f32 %v3571_v6, %v220_v3  ;;  %vm229_vm1 = vweird.f32 %v3571_v6 }
 0x125   :  { %3572 = vrsqrt.f32 %v221_v7  ;;  %vm230_vm3 = vmor %vm228_vm2, %vm229_vm1  ;;  %vm238_vm5 = vweird.f32 %v221_v7 }
 0x126   :  { %v224_v9 = vmul.f32 %v3571_v6, %v223_v8 }
 0x128   :  { %v225_v10 = vmul.f32 0.5, %v224_v9 }
 0x12a   :  { %v226_v11 = vsub.f32 1.5, %v225_v10  ;;  %v382_v10 = vld [vmem:[#allocation8 + $0x18] sm:$0xff] }
 0x12b   :  { %v3573_v12 = vpop.eup %3572 }
 0x12c   :  { %v227_v13 = vmul.f32 %v3571_v6, %v226_v11  ;;  %v233_v15 = vmul.f32 %v3573_v12, %v221_v7  ;;  %vm239_vm4 = vweird.f32 %v3573_v12 }
 0x12d   :  { %vm240_vm6 = vmor %vm238_vm5, %vm239_vm4 }
 0x12e   :  { %v231_v18 = vsel %vm230_vm3, %v3571_v6, %v227_v13  ;;  %v234_v19 = vmul.f32 %v3573_v12, %v233_v15  ;;  %v380_v15 = vld [vmem:[#allocation8 + $0x8] sm:$0xff] }
 0x12f   :  { %v242_v20 = vmul.f32 %v231_v18, %v4085_v17 }
 0x130   :  { %v235_v23 = vmul.f32 0.5, %v234_v19 }
 0x131   :  { %v247_v24 = vmul.f32 %v3556_v16, %v242_v20 }
 0x132   :  { %v236_v25 = vsub.f32 1.5, %v235_v23 }
 0x133   :  { %v4100_v26 = vadd.f32 %v3557_v22, %v247_v24 }
 0x134   :  { %v237_v27 = vmul.f32 %v3573_v12, %v236_v25 }
 0x135   :  { %326 = vmatmul.f32.vlgmr.msra.gmra.mxu0 %v4100_v26  ;;  %349 = vmatmul.f32.vlgmr.msra.gmra.mxu1 %v4100_v26 }
 0x136   :  { %v241_v28 = vsel %vm240_vm6, %v3573_v12, %v237_v27  ;;  %372 = vmatmul.f32.vlgmr.msra.gmra.mxu2 %v4100_v26  ;;  %v381_v12 = vld [vmem:[#allocation8 + $0x10] sm:$0xff] }
 0x137   :  { %v243_v29 = vmul.f32 %v241_v28, %v4090_v21 }
 0x139   :  { %v248_v17 = vmul.f32 %v3556_v16, %v243_v29  ;;  %v379_v16 = vld [vmem:[#allocation8] sm:$0xff] }
 0x13b   :  { %v4106_v30 = vadd.f32 %v3557_v22, %v248_v17 }
 0x13d   :  { %329 = vmatmul.f32.gmra.mxu0 %v4106_v30  ;;  %352 = vmatmul.f32.gmra.mxu1 %v4106_v30 }
 0x13e   :  { %375 = vmatmul.f32.gmra.mxu2 %v4106_v30 }
 0x1b2   :  { %v327_v34 = vpop.f32.mrf.mxu0  ;;  %v350_v35 = vpop.f32.mrf.mxu1 }
 0x1b3   :  { %v4111_v36 = vadd.f32 %v350_v35, %v305_v32  ;;  %v4115_v21 = vadd.f32 %v327_v34, %v304_v33 }
 0x1b5   :  { %3450 = vmatpush.xpose.msk.msrb.mxu1 %vm395_vm7, %v4111_v36 }
 0x1b8   :  { %3451 = vmatmul.msk.f32.vlgmr.msrb.gmra.mxu1 %vm395_vm7, %v4115_v21 }
 0x1b9   :  { %v373_v38 = vpop.f32.mrf.mxu2 }
 0x1ba   :  { %v353_v39 = vpop.f32.mrf.mxu1  ;;  %v330_v40 = vpop.f32.mrf.mxu0  ;;  %v4121_v42 = vadd.f32 %v373_v38, %v306_v37 }
 0x1bb   :  { %v4119_v41 = vadd.f32 %v353_v39, %v305_v32  ;;  %v4125_v43 = vadd.f32 %v330_v40, %v304_v33 }
 0x1bd   :  { %3452 = vmatpush.xpose.msk.msra.mxu3 %vm395_vm7, %v4119_v41 }
 0x1c0   :  { %3453 = vmatmul.msk.f32.vlgmr.msra.gmra.mxu3 %vm395_vm7, %v4125_v43 }
 0x1c1   :  { %493 = vmatpush.msrb.mxu3 %v4121_v42  ;;  %v376_v44 = vpop.f32.mrf.mxu2 }
 0x1c2   :  { %v4130_v45 = vadd.f32 %v376_v44, %v306_v37  ;;  %v386_v44 = vld [vmem:[#allocation8 + $0x38] sm:$0xff] }
 0x1c3   :  { %673 = vmatpush.msrb.mxu2 %v386_v44 }
 0x1c4   :  { %516 = vmatpush.msra.mxu3 %v4130_v45 }
 0x1c5   :  { %674 = vmatpush.msrb.mxu2 %v385_v46 }
 0x1c7   :  { %675 = vmatpush.msrb.mxu2 %v384_v47  ;;  %v387_v47 = vld [vmem:[#allocation8 + $0x40] sm:$0xff] }
 0x235   :  { %v419_v50 = vpop.f32.mrf.mxu1 }
 0x236   :  { %v450_v51 = vsel %vm4133_vm8, %v419_v50, -1e+09 }
 0x237   :  { %v453_v52 = vsel %vm452_vm9, %v450_v51, -inf }
 0x238   :  { %454 = vmax.xlane.f32.xlu2 %v453_v52 }
 0x243   :  { %v445_v53 = vpop.f32.mrf.mxu3 }
 0x244   :  { %v451_v54 = vsel %vm4133_vm8, %v445_v53, -1e+09 }
 0x245   :  { %v456_v55 = vsel %vm452_vm9, %v451_v54, -inf }
 0x246   :  { %457 = vmax.xlane.f32.xlu2 %v456_v55 }
 0x25e   :  { %523 = vrot.lane.b32.xlu2 %v4111_v36, %s3958_s17 }
 0x266   :  { %549 = vrot.lane.b32.xlu2 %v4125_v43, %s3958_s17 }
 0x2ab   :  { %v455_v56 = vpop.xlane.xlu2 %454 }
 0x2ac   :  { %v459_v57 = vsub.f32 %v450_v51, %v455_v56 }
 0x2ae   :  { %v461_v58 = vmul.f32 1.442695, %v459_v57 }
 0x2b0   :  { %3574 = vpow2.f32 %v461_v58 }
 0x2b6   :  { %v3575_v59 = vpop.eup %3574 }
 0x2b7   :  { %v465_v60 = vsel %vm452_vm9, %v3575_v59, 0.0 }
 0x2b8   :  { %466 = vadd.xlane.f32.xlu0 %v465_v60  ;;  %v383_v60 = vld [vmem:[#allocation8 + $0x20] sm:$0xff] }
 0x2b9   :  { %v458_v61 = vpop.xlane.xlu2 %457  ;;  %676 = vmatpush.msrb.mxu2 %v383_v60 }
 0x2ba   :  { %v460_v62 = vsub.f32 %v451_v54, %v458_v61 }
 0x2bc   :  { %v463_v63 = vmul.f32 1.442695, %v460_v62 }
 0x2be   :  { %3576 = vpow2.f32 %v463_v63 }
 0x2c1   :  { %v524_v5 = vpop.permute.xlu2 %523 }
 0x2c4   :  { %v3577_v0 = vpop.eup %3576 }
 0x2c5   :  { %v468_v1 = vsel %vm452_vm9, %v3577_v0, 0.0 }
 0x2c6   :  { %469 = vadd.xlane.f32.xlu1 %v468_v1 }
 0x2c9   :  { %v550_v13 = vpop.permute.xlu2 %549 }
 0x2cc   :  { %521 = vrot.lane.b32.xlu0 %v4115_v21, %s3958_s17 }
 0x2df   :  { %551 = vrot.lane.b32.xlu1 %v4119_v41, %s3958_s17 }
 0x32b   :  { %v467_v2 = vpop.xlane.xlu0 %466 }
 0x32c   :  { %3578 = vrcp.f32 %v467_v2 }
 0x332   :  { %v3579_v3 = vpop.eup %3578 }
 0x333   :  { %v473_v4 = vmul.f32 %v3579_v3, %v3575_v59 }
 0x335   :  { %3454 = vmatmul.msk.f32.vlgmr.msrb.gmra.mxu3 %vm452_vm9, %v473_v4 }
 0x336   :  { %3456 = vmatpush.xpose.msk.msrb.mxu3 %vm395_vm7, %v524_v5 }
 0x339   :  { %v470_v6 = vpop.xlane.xlu1 %469 }
 0x33a   :  { %3580 = vrcp.f32 %v470_v6 }
 0x33e   :  { %v522_v9 = vpop.permute.xlu0 %521 }
 0x340   :  { %v3581_v7 = vpop.eup %3580 }
 0x341   :  { %v474_v8 = vmul.f32 %v3581_v7, %v3577_v0 }
 0x343   :  { %3455 = vmatmul.msk.f32.vlgmr.msra.gmra.mxu3 %vm452_vm9, %v474_v8 }
 0x34b   :  { %3457 = vmatmul.msk.f32.vlgmr.msrb.gmra.mxu3 %vm395_vm7, %v522_v9 }
 0x351   :  { %v552_v11 = vpop.permute.xlu1 %551 }
 0x352   :  { %3458 = vmatpush.xpose.msk.msra.mxu3 %vm395_vm7, %v552_v11 }
 0x355   :  { %3459 = vmatmul.msk.f32.vlgmr.msra.gmra.mxu3 %vm395_vm7, %v550_v13 }
 0x356   :  { %702 = vmatpush.msrb.mxu3 %v382_v10 }
 0x358   :  { %703 = vmatpush.msrb.mxu3 %v381_v12 }
 0x35a   :  { %704 = vmatpush.msrb.mxu3 %v380_v15 }
 0x35c   :  { %705 = vmatpush.msrb.mxu3 %v379_v16 }
 0x3b8   :  { %v495_v18 = vpop.f32.mrf.mxu3 }
 0x3b9   :  { %3464 = vmatmul.msk.f32.vlgmr.msrb.gmra.mxu3 %vm395_vm7, %v495_v18 }
 0x3c6   :  { %v518_v19 = vpop.f32.mrf.mxu3 }
 0x3c7   :  { %3465 = vmatmul.msk.f32.gmra.mxu3 %vm395_vm7, %v518_v19 }
 0x3ce   :  { %v546_v20 = vpop.f32.mrf.mxu3 }
 0x3cf   :  { %v577_v22 = vsel %vm4133_vm8, %v546_v20, -1e+09 }
 0x3d0   :  { %v579_v23 = vsel %vm452_vm9, %v577_v22, -inf }
 0x3d1   :  { %580 = vmax.xlane.f32.xlu0 %v579_v23 }
 0x3d8   :  { %v574_v24 = vpop.f32.mrf.mxu3 }
 0x3d9   :  { %v578_v25 = vsel %vm4133_vm8, %v574_v24, -1e+09 }
 0x3da   :  { %v582_v27 = vsel %vm452_vm9, %v578_v25, -inf }
 0x3db   :  { %583 = vmax.xlane.f32.xlu1 %v582_v27 }
 0x3e5   :  { %602 = vrot.lane.b32.xlu0 %v4121_v42, %s3958_s17 }
 0x3f4   :  { %713 = vrot.lane.b32.xlu1 %v4115_v21, %s3959_s18 }
 0x3fc   :  { %743 = vrot.lane.b32.xlu1 %v4119_v41, %s3959_s18 }
 0x404   :  { %741 = vrot.lane.b32.xlu1 %v4125_v43, %s3959_s18 }
 0x43c   :  { %v4200_v2 = vpop.f32.mrf.mxu3 }
 0x444   :  { %v581_v28 = vpop.xlane.xlu0 %580 }
 0x445   :  { %v585_v29 = vsub.f32 %v577_v22, %v581_v28 }
 0x447   :  { %v587_v17 = vmul.f32 1.442695, %v585_v29 }
 0x449   :  { %3582 = vpow2.f32 %v587_v17 }
 0x44a   :  { %v4205_v6 = vpop.f32.mrf.mxu3 }
 0x44e   :  { %v584_v31 = vpop.xlane.xlu1 %583 }
 0x44f   :  { %v3583_v32 = vpop.eup %3582  ;;  %v586_v33 = vsub.f32 %v578_v25, %v584_v31 }
 0x450   :  { %v591_v34 = vsel %vm452_vm9, %v3583_v32, 0.0 }
 0x451   :  { %v589_v35 = vmul.f32 1.442695, %v586_v33  ;;  %592 = vadd.xlane.f32.xlu2 %v591_v34 }
 0x453   :  { %3584 = vpow2.f32 %v589_v35 }
 0x457   :  { %v603_v37 = vpop.permute.xlu0 %602 }
 0x458   :  { %623 = vmatpush.msrb.mxu0 %v603_v37  ;;  %v390_v37 = vld [vmem:[#allocation8 + $0x58] sm:$0xff] }
 0x459   :  { %v3585_v38 = vpop.eup %3584  ;;  %863 = vmatpush.msra.mxu2 %v390_v37  ;;  %v1139_v37 = vld [vmem:[#allocation13 + $0x140] sm:$0xff] }
 0x45a   :  { %v594_v39 = vsel %vm452_vm9, %v3585_v38, 0.0 }
 0x45b   :  { %595 = vadd.xlane.f32.xlu0 %v594_v39  ;;  %v388_v39 = vld [vmem:[#allocation8 + $0x48] sm:$0xff] }
 0x466   :  { %v714_v50 = vpop.permute.xlu1 %713 }
 0x469   :  { %715 = vrot.lane.b32.xlu2 %v4111_v36, %s3959_s18 }
 0x46e   :  { %v744_v54 = vpop.permute.xlu1 %743 }
 0x46f   :  { %793 = vrot.lane.b32.xlu0 %v4121_v42, %s3959_s18 }
 0x471   :  { %629 = vrot.lane.b32.xlu2 %v4130_v45, %s3958_s17 }
 0x476   :  { %v742_v57 = vpop.permute.xlu1 %741 }
 0x479   :  { %878 = vrot.lane.b32.xlu2 %v4111_v36, %s3955_s24 }
 0x481   :  { %876 = vrot.lane.b32.xlu2 %v4115_v21, %s3955_s24 }
 0x4c4   :  { %v593_v40 = vpop.xlane.xlu2 %592 }
 0x4c5   :  { %3586 = vrcp.f32 %v593_v40 }
 0x4cb   :  { %v3587_v48 = vpop.eup %3586 }
 0x4cc   :  { %v716_v51 = vpop.permute.xlu2 %715  ;;  %v599_v52 = vmul.f32 %v3587_v48, %v3583_v32  ;;  %v394_v48 = vld [vmem:[#allocation8 + $0x78] sm:$0xff] }
 0x4cd   :  { %3466 = vmatpush.xpose.msk.msra.mxu0 %vm395_vm7, %v716_v51  ;;  %v392_v51 = vld [vmem:[#allocation8 + $0x68] sm:$0xff] }
 0x4ce   :  { %v596_v53 = vpop.xlane.xlu0 %595  ;;  %3460 = vmatmul.msk.f32.vlgmr.msrb.gmra.mxu0 %vm452_vm9, %v599_v52 }
 0x4cf   :  { %3588 = vrcp.f32 %v596_v53 }
 0x4d4   :  { %v630_v36 = vpop.permute.xlu2 %629 }
 0x4d5   :  { %v3589_v21 = vpop.eup %3588  ;;  %650 = vmatpush.msra.mxu1 %v630_v36 }
 0x4d6   :  { %v600_v55 = vmul.f32 %v3589_v21, %v3585_v38  ;;  %3467 = vmatmul.msk.f32.vlgmr.msra.gmra.mxu0 %vm395_vm7, %v714_v50  ;;  %v389_v38 = vld [vmem:[#allocation8 + $0x50] sm:$0xff] }
 0x4d7   :  { %3468 = vmatpush.xpose.msk.msrb.mxu1 %vm395_vm7, %v744_v54  ;;  %864 = vmatpush.msra.mxu2 %v389_v38  ;;  %v393_v50 = vld [vmem:[#allocation8 + $0x70] sm:$0xff] }
 0x4d8   :  { %3461 = vmatmul.msk.f32.vlgmr.msra.gmra.mxu1 %vm452_vm9, %v600_v55  ;;  %v391_v55 = vld [vmem:[#allocation8 + $0x60] sm:$0xff]  ;;  %v1140_v38 = vld [vmem:[#allocation13 + $0x148] sm:$0xff] }
 0x4d9   :  { %865 = vmatpush.msra.mxu2 %v388_v39  ;;  %v1141_v39 = vld [vmem:[#allocation13 + $0x150] sm:$0xff] }
 0x4db   :  { %866 = vmatpush.msra.mxu2 %v387_v47  ;;  %v1137_v47 = vld [vmem:[#allocation13 + $0x130] sm:$0xff] }
 0x4dc   :  { %v879_v56 = vpop.permute.xlu2 %878 }
 0x4dd   :  { %3474 = vmatpush.xpose.msk.msra.mxu3 %vm395_vm7, %v879_v56 }
 0x4e0   :  { %3469 = vmatmul.msk.f32.vlgmr.msrb.gmra.mxu1 %vm395_vm7, %v742_v57 }
 0x4e1   :  { %v794_v58 = vpop.permute.xlu0 %793 }
 0x4e2   :  { %814 = vmatpush.msrb.mxu0 %v794_v58 }
 0x4e4   :  { %v877_v59 = vpop.permute.xlu2 %876 }
 0x4e5   :  { %3475 = vmatmul.msk.f32.vlgmr.msra.gmra.mxu3 %vm395_vm7, %v877_v59 }
 0x54b   :  { %v625_v61 = vpop.f32.mrf.mxu0 }
 0x54c   :  { %3462 = vmatmul.msk.f32.vlgmr.msrb.gmra.mxu2 %vm395_vm7, %v625_v61 }
 0x553   :  { %v738_v62 = vpop.f32.mrf.mxu0 }
 0x554   :  { %v769_v63 = vsel %vm4133_vm8, %v738_v62, -1e+09 }
 0x555   :  { %v652_v0 = vpop.f32.mrf.mxu1  ;;  %v771_v1 = vsel %vm452_vm9, %v769_v63, -inf }
 0x556   :  { %772 = vmax.xlane.f32.xlu1 %v771_v1  ;;  %3463 = vmatmul.msk.f32.gmra.mxu2 %vm395_vm7, %v652_v0 }
 0x55d   :  { %v766_v3 = vpop.f32.mrf.mxu1 }
 0x55e   :  { %v770_v4 = vsel %vm4133_vm8, %v766_v3, -1e+09 }
 0x55f   :  { %v774_v5 = vsel %vm452_vm9, %v770_v4, -inf }
 0x560   :  { %775 = vmax.xlane.f32.xlu0 %v774_v5 }
 0x568   :  { %v901_v7 = vpop.f32.mrf.mxu3 }
 0x569   :  { %v932_v8 = vsel %vm4133_vm8, %v901_v7, -1e+09  ;;  %v4241_v7 = vld [vmem:[%s5119_s4] ss:$0 sm:$0xff] }
 0x56a   :  { %v934_v9 = vsel %vm452_vm9, %v932_v8, -inf }
 0x56b   :  { %935 = vmax.xlane.f32.xlu0 %v934_v9 }
 0x56f   :  { %906 = vrot.lane.b32.xlu1 %v4119_v41, %s3955_s24 }
 0x57f   :  { %819 = vrot.lane.b32.xlu0 %v4130_v45, %s3959_s18 }
 0x587   :  { %956 = vrot.lane.b32.xlu0 %v4121_v42, %s3955_s24 }
 0x58f   :  { %982 = vrot.lane.b32.xlu0 %v4130_v45, %s3955_s24 }
 0x5c9   :  { %v773_v10 = vpop.xlane.xlu1 %772 }
 0x5ca   :  { %v777_v11 = vsub.f32 %v769_v63, %v773_v10 }
 0x5cc   :  { %v779_v12 = vmul.f32 1.442695, %v777_v11 }
 0x5ce   :  { %3590 = vpow2.f32 %v779_v12 }
 0x5cf   :  { %v678_v62 = vpop.f32.mrf.mxu2 }
 0x5d0   :  { %v708_v1 = vadd.f32 %v4200_v2, %v678_v62  ;;  %v1121_v62 = vld [vmem:[#allocation13 + $0xb0] sm:$0xff] }
 0x5d3   :  { %v776_v13 = vpop.xlane.xlu0 %775 }
 0x5d4   :  { %v3591_v15 = vpop.eup %3590  ;;  %v778_v16 = vsub.f32 %v770_v4, %v776_v13 }
 0x5d5   :  { %v783_v18 = vsel %vm452_vm9, %v3591_v15, 0.0 }
 0x5d6   :  { %v781_v19 = vmul.f32 1.442695, %v778_v16  ;;  %784 = vadd.xlane.f32.xlu2 %v783_v18  ;;  %v1159_v18 = vld [vmem:[#allocation13 + $0x1e0] sm:$0xff] }
 0x5d7   :  { %1163 = vmatpush.msrb.mxu2 %v1159_v18  ;;  %v1103_v18 = vld [vmem:[#allocation13 + $0x20] sm:$0xff] }
 0x5d8   :  { %3592 = vpow2.f32 %v781_v19  ;;  %v1161_v19 = vld [vmem:[#allocation13 + $0x1f0] sm:$0xff] }
 0x5d9   :  { %v4235_v63 = vpop.f32.mrf.mxu2 }
 0x5de   :  { %v3593_v41 = vpop.eup %3592  ;;  %v936_v45 = vpop.xlane.xlu0 %935 }
 0x5df   :  { %v786_v20 = vsel %vm452_vm9, %v3593_v41, 0.0  ;;  %v940_v25 = vsub.f32 %v932_v8, %v936_v45  ;;  %v1157_v45 = vld [vmem:[#allocation13 + $0x1d0] sm:$0xff] }
 0x5e0   :  { %787 = vadd.xlane.f32.xlu1 %v786_v20  ;;  %v1155_v20 = vld [vmem:[#allocation13 + $0x1c0] sm:$0xff] }
 0x5e1   :  { %v907_v42 = vpop.permute.xlu1 %906  ;;  %v942_v27 = vmul.f32 1.442695, %v940_v25  ;;  %1164 = vmatpush.msrb.mxu2 %v1155_v20  ;;  %v1152_v25 = vld [vmem:[#allocation13 + $0x1a8] sm:$0xff]  ;;  %v1099_v20 = vld [vmem:[#allocation13] sm:$0xff] }
 0x5e2   :  { %3476 = vmatpush.xpose.msk.msra.mxu0 %vm395_vm7, %v907_v42  ;;  %v1156_v42 = vld [vmem:[#allocation13 + $0x1c8] sm:$0xff] }
 0x5e3   :  { %3594 = vpow2.f32 %v942_v27  ;;  %v1153_v27 = vld [vmem:[#allocation13 + $0x1b0] sm:$0xff] }
 0x5e9   :  { %v3595_v28 = vpop.eup %3594 }
 0x5ea   :  { %v946_v29 = vsel %vm452_vm9, %v3595_v28, 0.0 }
 0x5ee   :  { %904 = vrot.lane.b32.xlu2 %v4125_v43, %s3955_s24 }
 0x5f1   :  { %v820_v22 = vpop.permute.xlu0 %819 }
 0x5f2   :  { %840 = vmatpush.msra.mxu1 %v820_v22  ;;  %v1158_v22 = vld [vmem:[#allocation13 + $0x1d8] sm:$0xff] }
 0x5f9   :  { %v957_v23 = vpop.permute.xlu0 %956 }
 0x5fa   :  { %977 = vmatpush.msrb.mxu1 %v957_v23 }
 0x601   :  { %v983_v24 = vpop.permute.xlu0 %982 }
 0x602   :  { %1003 = vmatpush.msrb.mxu3 %v983_v24  ;;  %v1151_v24 = vld [vmem:[#allocation13 + $0x1a0] sm:$0xff] }
 0x603   :  { %1165 = vmatpush.msrb.mxu2 %v1151_v24 }
 0x604   :  { %1209 = vmatpush.msra.mxu3 %v1161_v19  ;;  %v1105_v19 = vld [vmem:[#allocation13 + $0x30] sm:$0xff] }
 0x606   :  { %1210 = vmatpush.msra.mxu3 %v1157_v45  ;;  %v1101_v45 = vld [vmem:[#allocation13 + $0x10] sm:$0xff] }
 0x608   :  { %1211 = vmatpush.msra.mxu3 %v1153_v27 }
 0x617   :  { %947 = vadd.xlane.f32.xlu2 %v946_v29  ;;  %v1147_v29 = vld [vmem:[#allocation13 + $0x180] sm:$0xff] }
 0x618   :  { %1166 = vmatpush.msrb.mxu2 %v1147_v29 }
 0x649   :  { %v785_v17 = vpop.xlane.xlu2 %784 }
 0x64a   :  { %3596 = vrcp.f32 %v785_v17  ;;  %v1148_v17 = vld [vmem:[#allocation13 + $0x188] sm:$0xff] }
 0x650   :  { %v3597_v31 = vpop.eup %3596 }
 0x651   :  { %v791_v32 = vmul.f32 %v3597_v31, %v3591_v15  ;;  %v905_v34 = vpop.permute.xlu2 %904  ;;  %v1149_v31 = vld [vmem:[#allocation13 + $0x190] sm:$0xff] }
 0x652   :  { %1212 = vmatpush.msra.mxu3 %v1149_v31 }
 0x653   :  { %v788_v33 = vpop.xlane.xlu1 %787  ;;  %3470 = vmatmul.msk.f32.vlgmr.msrb.gmra.mxu0 %vm452_vm9, %v791_v32  ;;  %v1150_v32 = vld [vmem:[#allocation13 + $0x198] sm:$0xff] }
 0x654   :  { %3598 = vrcp.f32 %v788_v33  ;;  %1026 = vmatpush.msrb.mxu0 %v394_v48  ;;  %v1143_v33 = vld [vmem:[#allocation13 + $0x160] sm:$0xff]  ;;  %v1138_v48 = vld [vmem:[#allocation13 + $0x138] sm:$0xff] }
 0x655   :  { %1167 = vmatpush.msrb.mxu2 %v1143_v33  ;;  %v4256_v33 = vld [vmem:[%s5122_s7] ss:$0 sm:$0xff] }
 0x656   :  { %1027 = vmatpush.msrb.mxu0 %v393_v50  ;;  %v1131_v50 = vld [vmem:[#allocation13 + $0x100] sm:$0xff] }
 0x657   :  { %1168 = vmatpush.msrb.mxu2 %v1139_v37 }
 0x658   :  { %1028 = vmatpush.msrb.mxu0 %v392_v51  ;;  %v1132_v51 = vld [vmem:[#allocation13 + $0x108] sm:$0xff] }
 0x65a   :  { %v3599_v43 = vpop.eup %3598  ;;  %1029 = vmatpush.msrb.mxu0 %v391_v55  ;;  %v1130_v55 = vld [vmem:[#allocation13 + $0xf8] sm:$0xff] }
 0x65b   :  { %v792_v35 = vmul.f32 %v3599_v43, %v3593_v41  ;;  %3477 = vmatmul.msk.f32.vlgmr.msra.gmra.mxu0 %vm395_vm7, %v905_v34  ;;  %v1162_v41 = vld [vmem:[#allocation13 + $0x1f8] sm:$0xff]  ;;  %v1144_v43 = vld [vmem:[#allocation13 + $0x168] sm:$0xff]  ;;  %v1145_v34 = vld [vmem:[#allocation13 + $0x170] sm:$0xff] }
 0x65c   :  { %1232 = vmatpush.msra.mxu0 %v1162_v41  ;;  %1213 = vmatpush.msra.mxu3 %v1145_v34  ;;  %v1106_v41 = vld [vmem:[#allocation13 + $0x38] sm:$0xff] }
 0x65d   :  { %3471 = vmatmul.msk.f32.vlgmr.msra.gmra.mxu1 %vm452_vm9, %v792_v35  ;;  %v1146_v35 = vld [vmem:[#allocation13 + $0x178] sm:$0xff] }
 0x65e   :  { %1233 = vmatpush.msra.mxu0 %v1158_v22  ;;  %1214 = vmatpush.msra.mxu3 %v1141_v39  ;;  %v1102_v22 = vld [vmem:[#allocation13 + $0x18] sm:$0xff] }
 0x660   :  { %1215 = vmatpush.msra.mxu3 %v1137_v47 }
 0x68a   :  { %v948_v40 = vpop.xlane.xlu2 %947 }
 0x68b   :  { %3600 = vrcp.f32 %v948_v40  ;;  %v1142_v40 = vld [vmem:[#allocation13 + $0x158] sm:$0xff] }
 0x691   :  { %v3601_v44 = vpop.eup %3600 }
 0x692   :  { %v954_v46 = vmul.f32 %v3601_v44, %v3595_v28  ;;  %v1154_v28 = vld [vmem:[#allocation13 + $0x1b8] sm:$0xff]  ;;  %v1135_v44 = vld [vmem:[#allocation13 + $0x120] sm:$0xff] }
 0x693   :  { %1234 = vmatpush.msra.mxu0 %v1154_v28  ;;  %1169 = vmatpush.msrb.mxu2 %v1135_v44 }
 0x694   :  { %3478 = vmatmul.msk.f32.vlgmr.msrb.gmra.mxu1 %vm452_vm9, %v954_v46  ;;  %v1136_v46 = vld [vmem:[#allocation13 + $0x128] sm:$0xff] }
 0x695   :  { %1235 = vmatpush.msra.mxu0 %v1150_v32  ;;  %1170 = vmatpush.msrb.mxu2 %v1131_v50 }
 0x697   :  { %1236 = vmatpush.msra.mxu0 %v1146_v35  ;;  %v4259_v35 = vld [vmem:[#allocation11] ss:$0 sm:$0xff] }
 0x699   :  { %1237 = vmatpush.msra.mxu0 %v1142_v40  ;;  %v711_v40 = vadd.f32 %v4205_v6, %v4235_v63 }
 0x69b   :  { %1238 = vmatpush.msra.mxu0 %v1138_v48 }
 0x6d0   :  { %v816_v52 = vpop.f32.mrf.mxu0 }
 0x6d1   :  { %3472 = vmatmul.msk.f32.vlgmr.msra.gmra.mxu2 %vm395_vm7, %v816_v52  ;;  %v1133_v52 = vld [vmem:[#allocation13 + $0x110] sm:$0xff] }
 0x6d2   :  { %1216 = vmatpush.msra.mxu3 %v1133_v52 }
 0x6d8   :  { %v929_v53 = vpop.f32.mrf.mxu0 }
 0x6d9   :  { %v933_v36 = vsel %vm4133_vm8, %v929_v53, -1e+09  ;;  %v1134_v53 = vld [vmem:[#allocation13 + $0x118] sm:$0xff] }
 0x6da   :  { %v842_v21 = vpop.f32.mrf.mxu1  ;;  %v937_v54 = vsel %vm452_vm9, %v933_v36, -inf  ;;  %1239 = vmatpush.msra.mxu0 %v1134_v53 }
 0x6db   :  { %3473 = vmatmul.msk.f32.gmra.mxu2 %vm395_vm7, %v842_v21  ;;  %938 = vmax.xlane.f32.xlu1 %v937_v54  ;;  %v1128_v21 = vld [vmem:[#allocation13 + $0xe8] sm:$0xff]  ;;  %v1129_v54 = vld [vmem:[#allocation13 + $0xf0] sm:$0xff] }
 0x6dc   :  { %1217 = vmatpush.msra.mxu3 %v1129_v54  ;;  %1240 = vmatpush.msra.mxu0 %v1130_v55 }
 0x711   :  { %v979_v56 = vpop.f32.mrf.mxu1 }
 0x712   :  { %3480 = vmatmul.msk.f32.vlgmr.msrb.gmra.mxu0 %vm395_vm7, %v979_v56  ;;  %v1123_v56 = vld [vmem:[#allocation13 + $0xc0] sm:$0xff] }
 0x74e   :  { %v939_v57 = vpop.xlane.xlu1 %938 }
 0x74f   :  { %v941_v58 = vsub.f32 %v933_v36, %v939_v57  ;;  %v1127_v36 = vld [vmem:[#allocation13 + $0xe0] sm:$0xff]  ;;  %v1124_v57 = vld [vmem:[#allocation13 + $0xc8] sm:$0xff] }
 0x750   :  { %1171 = vmatpush.msrb.mxu2 %v1127_v36 }
 0x751   :  { %v944_v59 = vmul.f32 1.442695, %v941_v58  ;;  %v1125_v58 = vld [vmem:[#allocation13 + $0xd0] sm:$0xff] }
 0x752   :  { %1172 = vmatpush.msrb.mxu2 %v1123_v56  ;;  %1218 = vmatpush.msra.mxu3 %v1125_v58 }
 0x753   :  { %3602 = vpow2.f32 %v944_v59  ;;  %v1126_v59 = vld [vmem:[#allocation13 + $0xd8] sm:$0xff] }
 0x754   :  { %v868_v0 = vpop.f32.mrf.mxu2  ;;  %1241 = vmatpush.msra.mxu0 %v1126_v59  ;;  %1219 = vmatpush.msra.mxu3 %v1121_v62 }
 0x755   :  { %v874_v3 = vadd.f32 %v868_v0, %v708_v1  ;;  %v1122_v0 = vld [vmem:[#allocation13 + $0xb8] sm:$0xff]  ;;  %v1115_v1 = vld [vmem:[#allocation13 + $0x80] sm:$0xff] }
 0x756   :  { %1242 = vmatpush.msra.mxu0 %v1122_v0 }
 0x759   :  { %v3603_v60 = vpop.eup %3602 }
 0x75a   :  { %v949_v61 = vsel %vm452_vm9, %v3603_v60, 0.0 }
 0x75b   :  { %950 = vadd.xlane.f32.xlu2 %v949_v61  ;;  %v1120_v61 = vld [vmem:[#allocation13 + $0xa8] sm:$0xff] }
 0x75e   :  { %v871_v39 = vpop.f32.mrf.mxu2 }
 0x78f   :  { %v1031_v4 = vpop.f32.mrf.mxu0 }
 0x790   :  { %v1037_v5 = vadd.f32 %v1031_v4, %v874_v3  ;;  %v1116_v3 = vld [vmem:[#allocation13 + $0x88] sm:$0xff]  ;;  %v1117_v4 = vld [vmem:[#allocation13 + $0x90] sm:$0xff] }
 0x791   :  { %1220 = vmatpush.msra.mxu3 %v1117_v4 }
 0x792   :  { %v1039_v8 = vadd.f32 %v1037_v5, %v4100_v26  ;;  %v1160_v26 = vld [vmem:[#allocation13 + $0x1e8] sm:$0xff]  ;;  %v1118_v5 = vld [vmem:[#allocation13 + $0x98] sm:$0xff] }
 0x793   :  { %1186 = vmatpush.msra.mxu1 %v1160_v26  ;;  %1243 = vmatpush.msra.mxu0 %v1118_v5  ;;  %v1104_v26 = vld [vmem:[#allocation13 + $0x28] sm:$0xff] }
 0x794   :  { %v1045_v9 = vadd.f32 %v4241_v7, %v1039_v8  ;;  %v1111_v8 = vld [vmem:[#allocation13 + $0x60] sm:$0xff] }
 0x795   :  { %1187 = vmatpush.msra.mxu1 %v1156_v42  ;;  %v1100_v42 = vld [vmem:[#allocation13 + $0x8] sm:$0xff] }
 0x796   :  { %1049 = vadd.xlane.f32.xlu1 %v1045_v9 }
 0x797   :  { %1188 = vmatpush.msra.mxu1 %v1152_v25 }
 0x799   :  { %1189 = vmatpush.msra.mxu1 %v1148_v17 }
 0x79b   :  { %1190 = vmatpush.msra.mxu1 %v1144_v43 }
 0x79d   :  { %1191 = vmatpush.msra.mxu1 %v1140_v38 }
 0x79f   :  { %1192 = vmatpush.msra.mxu1 %v1136_v46 }
 0x7a1   :  { %1193 = vmatpush.msra.mxu1 %v1132_v51 }
 0x7a3   :  { %1194 = vmatpush.msra.mxu1 %v1128_v21 }
 0x7a5   :  { %1195 = vmatpush.msra.mxu1 %v1124_v57 }
 0x7a7   :  { %1196 = vmatpush.msra.mxu1 %v1120_v61 }
 0x7a9   :  { %1197 = vmatpush.msra.mxu1 %v1116_v3 }
 0x7ce   :  { %v951_v10 = vpop.xlane.xlu2 %950 }
 0x7cf   :  { %3604 = vrcp.f32 %v951_v10  ;;  %v1113_v10 = vld [vmem:[#allocation13 + $0x70] sm:$0xff] }
 0x7d0   :  { %1221 = vmatpush.msra.mxu3 %v1113_v10 }
 0x7d5   :  { %v3605_v11 = vpop.eup %3604 }
 0x7d6   :  { %v955_v12 = vmul.f32 %v3605_v11, %v3603_v60  ;;  %v1119_v60 = vld [vmem:[#allocation13 + $0xa0] sm:$0xff]  ;;  %v1114_v11 = vld [vmem:[#allocation13 + $0x78] sm:$0xff] }
 0x7d7   :  { %1173 = vmatpush.msrb.mxu2 %v1119_v60  ;;  %1244 = vmatpush.msra.mxu0 %v1114_v11 }
 0x7d8   :  { %3479 = vmatmul.msk.f32.vlgmr.msrb.gmra.mxu3 %vm452_vm9, %v955_v12  ;;  %v1107_v12 = vld [vmem:[#allocation13 + $0x40] sm:$0xff] }
 0x7d9   :  { %1174 = vmatpush.msrb.mxu2 %v1115_v1 }
 0x7db   :  { %1175 = vmatpush.msrb.mxu2 %v1111_v8 }
 0x7dd   :  { %1176 = vmatpush.msrb.mxu2 %v1107_v12 }
 0x7df   :  { %1177 = vmatpush.msrb.mxu2 %v1103_v18 }
 0x7e1   :  { %1178 = vmatpush.msrb.mxu2 %v1099_v20 }
 0x809   :  { %v1050_v2 = vpop.xlane.xlu1 %1049 }
 0x80a   :  { %v1053_v13 = vmul.f32 %v1050_v2, %v4082_v14  ;;  %v1108_v2 = vld [vmem:[#allocation13 + $0x48] sm:$0xff] }
 0x80c   :  { %v4247_v15 = vsub.f32 %v1045_v9, %v1053_v13  ;;  %v1112_v9 = vld [vmem:[#allocation13 + $0x68] sm:$0xff]  ;;  %v1109_v13 = vld [vmem:[#allocation13 + $0x50] sm:$0xff] }
 0x80d   :  { %1198 = vmatpush.msra.mxu1 %v1112_v9  ;;  %1222 = vmatpush.msra.mxu3 %v1109_v13 }
 0x80e   :  { %v1057_v16 = vmul.f32 %v4247_v15, %v4247_v15 }
 0x80f   :  { %1199 = vmatpush.msra.mxu1 %v1108_v2  ;;  %1223 = vmatpush.msra.mxu3 %v1105_v19 }
 0x810   :  { %1059 = vadd.xlane.f32.xlu2 %v1057_v16  ;;  %v1110_v16 = vld [vmem:[#allocation13 + $0x58] sm:$0xff] }
 0x811   :  { %1245 = vmatpush.msra.mxu0 %v1110_v16  ;;  %1200 = vmatpush.msra.mxu1 %v1104_v26 }
 0x812   :  { %1224 = vmatpush.msra.mxu3 %v1101_v45 }
 0x813   :  { %1246 = vmatpush.msra.mxu0 %v1106_v41  ;;  %1201 = vmatpush.msra.mxu1 %v1100_v42 }
 0x815   :  { %1247 = vmatpush.msra.mxu0 %v1102_v22 }
 0x85b   :  { %v1005_v23 = vpop.f32.mrf.mxu3 }
 0x85c   :  { %3481 = vmatmul.msk.f32.gmra.mxu0 %vm395_vm7, %v1005_v23 }
 0x883   :  { %v1060_v23 = vpop.xlane.xlu2 %1059 }
 0x884   :  { %v1063_v24 = vmul.f32 %v1060_v23, %v4082_v14 }
 0x886   :  { %v1065_v25 = vadd.f32 1e-05, %v1063_v24 }
 0x888   :  { %3606 = vrsqrt.f32 %v1065_v25  ;;  %vm1073_vm11 = vweird.f32 %v1065_v25 }
 0x88e   :  { %v3607_v27 = vpop.eup %3606 }
 0x88f   :  { %v1068_v28 = vmul.f32 %v3607_v27, %v1065_v25  ;;  %vm1074_vm10 = vweird.f32 %v3607_v27 }
 0x890   :  { %vm1075_vm12 = vmor %vm1073_vm11, %vm1074_vm10 }
 0x891   :  { %v1069_v29 = vmul.f32 %v3607_v27, %v1068_v28 }
 0x893   :  { %v1070_v17 = vmul.f32 0.5, %v1069_v29 }
 0x895   :  { %v1071_v31 = vsub.f32 1.5, %v1070_v17 }
 0x897   :  { %v1072_v32 = vmul.f32 %v3607_v27, %v1071_v31 }
 0x899   :  { %v1076_v43 = vsel %vm1075_vm12, %v3607_v27, %v1072_v32 }
 0x89a   :  { %v1087_v34 = vmul.f32 %v1076_v43, %v4247_v15  ;;  %v875_v15 = vadd.f32 %v871_v39, %v711_v40 }
 0x89c   :  { %v1092_v37 = vmul.f32 %v4256_v33, %v1087_v34 }
 0x89e   :  { %v4263_v38 = vadd.f32 %v4259_v35, %v1092_v37 }
 0x8a0   :  { %1179 = vmatmul.f32.vlgmr.msrb.gmra.mxu2 %v4263_v38  ;;  %1202 = vmatmul.f32.vlgmr.msra.gmra.mxu1 %v4263_v38 }
 0x8a1   :  { %1225 = vmatmul.f32.vlgmr.msra.gmra.mxu3 %v4263_v38  ;;  %1248 = vmatmul.f32.vlgmr.msra.gmra.mxu0 %v4263_v38 }
 0x8d9   :  { %v1034_v44 = vpop.f32.mrf.mxu0 }
 0x8da   :  { %v1038_v46 = vadd.f32 %v1034_v44, %v875_v15 }
 0x8dc   :  { %v1040_v47 = vadd.f32 %v1038_v46, %v4106_v30 }
 0x8de   :  { %v1046_v48 = vadd.f32 %v4241_v7, %v1040_v47 }
 0x8e0   :  { %1051 = vadd.xlane.f32.xlu0 %v1046_v48 }
 0x91d   :  { %v4278_v36 = vpop.f32.mrf.mxu1 }
 0x91e   :  { %v4280_v6 = vpop.f32.mrf.mxu0  ;;  %v4285_v30 = vmul.f32 0.70710677, %v4278_v36 }
 0x91f   :  { %v4290_v21 = vmul.f32 0.70710677, %v4280_v6 }
 0x920   :  { %v1311_v56 = vmul.f32 %v4285_v30, %v4285_v30 }
 0x921   :  { %v1391_v57 = vmul.f32 %v4290_v21, %v4290_v21 }
 0x922   :  { %v4306_v60 = vmin.f32 %v1311_v56, 16.0 }
 0x923   :  { %v4282_v63 = vpop.f32.mrf.mxu2  ;;  %v4308_v61 = vmin.f32 %v1391_v57, 16.0 }
 0x924   :  { %v4287_v7 = vpop.f32.mrf.mxu3  ;;  %v4293_v54 = vmul.f32 0.70710677, %v4282_v63  ;;  %v1324_v1 = vmul.f32 3.8918573e-05, %v4306_v60  ;;  %v1313_v24 = vmul.f32 2.1237322e-06, %v4306_v60 }
 0x925   :  { %v4296_v55 = vmul.f32 0.70710677, %v4287_v7  ;;  %v1404_v3 = vmul.f32 3.8918573e-05, %v4308_v61  ;;  %v1393_v25 = vmul.f32 2.1237322e-06, %v4308_v61 }
 0x926   :  { %v1271_v58 = vmul.f32 %v4293_v54, %v4293_v54  ;;  %v1325_v8 = vadd.f32 0.001143296, %v1324_v1  ;;  %v1314_v31 = vadd.f32 0.00028619796, %v1313_v24 }
 0x927   :  { %v1351_v59 = vmul.f32 %v4296_v55, %v4296_v55  ;;  %v1405_v9 = vadd.f32 0.001143296, %v1404_v3  ;;  %v1394_v32 = vadd.f32 0.00028619796, %v1393_v25 }
 0x928   :  { %v4310_v62 = vmin.f32 %v1271_v58, 16.0  ;;  %v1326_v12 = vmul.f32 %v1325_v8, %v4306_v60  ;;  %v1315_v40 = vmul.f32 %v1314_v31, %v4306_v60  ;;  %v1638_v8 = vld [vmem:[#allocation14 + $0xf8] sm:$0xff]  ;;  %v1651_v31 = vld [vmem:[#allocation14 + $0x160] sm:$0xff] }
 0x929   :  { %v4312_v0 = vmin.f32 %v1351_v59, 16.0  ;;  %v1406_v2 = vmul.f32 %v1405_v9, %v4308_v61  ;;  %v1395_v15 = vmul.f32 %v1394_v32, %v4308_v61  ;;  %v1654_v9 = vld [vmem:[#allocation14 + $0x178] sm:$0xff]  ;;  %1694 = vmatpush.msrb.mxu1 %v1638_v8  ;;  %v1615_v8 = vld [vmem:[#allocation14 + $0x40] sm:$0xff] }
 0x92a   :  { %v1284_v4 = vmul.f32 3.8918573e-05, %v4310_v62  ;;  %v1327_v18 = vadd.f32 0.014752088, %v1326_v12  ;;  %v1273_v46 = vmul.f32 2.1237322e-06, %v4310_v62  ;;  %1717 = vmatpush.msrb.mxu3 %v1654_v9 }
 0x92b   :  { %v1364_v5 = vmul.f32 3.8918573e-05, %v4312_v0  ;;  %v1407_v26 = vadd.f32 0.014752088, %v1406_v2  ;;  %v1396_v56 = vadd.f32 0.0036580483, %v1395_v15 }
 0x92c   :  { %v1285_v10 = vadd.f32 0.001143296, %v1284_v4  ;;  %v1328_v20 = vmul.f32 %v1327_v18, %v4306_v60  ;;  %v1274_v58 = vadd.f32 0.00028619796, %v1273_v46  ;;  %v1670_v2 = vld [vmem:[#allocation14 + $0x1f8] sm:$0xff]  ;;  %v1621_v18 = vld [vmem:[#allocation14 + $0x70] sm:$0xff] }
 0x92d   :  { %v1365_v11 = vadd.f32 0.001143296, %v1364_v5  ;;  %v1408_v42 = vmul.f32 %v1407_v26, %v4308_v61  ;;  %v1622_v5 = vld [vmem:[#allocation14 + $0x78] sm:$0xff]  ;;  %1740 = vmatpush.msrb.mxu0 %v1670_v2  ;;  %v1637_v26 = vld [vmem:[#allocation14 + $0xf0] sm:$0xff]  ;;  %v1631_v9 = vld [vmem:[#allocation14 + $0xc0] sm:$0xff] }
 0x92e   :  { %v1286_v13 = vmul.f32 %v1285_v10, %v4310_v62  ;;  %v1329_v23 = vadd.f32 0.112945676, %v1328_v20  ;;  %1671 = vmatpush.msra.mxu2 %v1622_v5  ;;  %1695 = vmatpush.msrb.mxu1 %v1637_v26  ;;  %v1617_v15 = vld [vmem:[#allocation14 + $0x50] sm:$0xff]  ;;  %v1663_v2 = vld [vmem:[#allocation14 + $0x1c0] sm:$0xff] }
 0x92f   :  { %v1366_v16 = vmul.f32 %v1365_v11, %v4312_v0  ;;  %v1409_v27 = vadd.f32 0.112945676, %v1408_v42  ;;  %v1397_v11 = vmul.f32 %v1396_v56, %v4308_v61  ;;  %v1669_v42 = vld [vmem:[#allocation14 + $0x1f0] sm:$0xff]  ;;  %v1632_v56 = vld [vmem:[#allocation14 + $0xc8] sm:$0xff] }
 0x930   :  { %v1287_v19 = vadd.f32 0.014752088, %v1286_v13  ;;  %v1330_v17 = vmul.f32 %v1329_v23, %v4306_v60  ;;  %v1275_v13 = vmul.f32 %v1274_v58, %v4310_v62  ;;  %1672 = vmatpush.msra.mxu2 %v1621_v18  ;;  %1741 = vmatpush.msrb.mxu0 %v1669_v42  ;;  %v1652_v23 = vld [vmem:[#allocation14 + $0x168] sm:$0xff]  ;;  %v1649_v46 = vld [vmem:[#allocation14 + $0x150] sm:$0xff]  ;;  %v1630_v42 = vld [vmem:[#allocation14 + $0xb8] sm:$0xff] }
 0x931   :  { %v1367_v41 = vadd.f32 0.014752088, %v1366_v16  ;;  %v1410_v43 = vmul.f32 %v1409_v27, %v4308_v61  ;;  %v1398_v25 = vadd.f32 0.05243302, %v1397_v11  ;;  %v1668_v27 = vld [vmem:[#allocation14 + $0x1e8] sm:$0xff]  ;;  %v1647_v11 = vld [vmem:[#allocation14 + $0x140] sm:$0xff] }
 0x932   :  { %v1288_v45 = vmul.f32 %v1287_v19, %v4310_v62  ;;  %v1331_v39 = vadd.f32 0.4994258, %v1330_v17  ;;  %v1653_v19 = vld [vmem:[#allocation14 + $0x170] sm:$0xff]  ;;  %1742 = vmatpush.msrb.mxu0 %v1668_v27  ;;  %v1635_v17 = vld [vmem:[#allocation14 + $0xe0] sm:$0xff]  ;;  %v1662_v27 = vld [vmem:[#allocation14 + $0x1b8] sm:$0xff] }
 0x933   :  { %v1368_v22 = vmul.f32 %v1367_v41, %v4312_v0  ;;  %v1411_v44 = vadd.f32 0.4994258, %v1410_v43  ;;  %1718 = vmatpush.msrb.mxu3 %v1653_v19  ;;  %v1667_v43 = vld [vmem:[#allocation14 + $0x1e0] sm:$0xff]  ;;  %v1399_v58 = vmul.f32 %v1398_v25, %v4308_v61  ;;  %v1646_v25 = vld [vmem:[#allocation14 + $0x138] sm:$0xff] }
 0x934   :  { %v1289_v28 = vadd.f32 0.112945676, %v1288_v45  ;;  %v1620_v45 = vld [vmem:[#allocation14 + $0x68] sm:$0xff]  ;;  %1743 = vmatpush.msrb.mxu0 %v1667_v43  ;;  %v1645_v43 = vld [vmem:[#allocation14 + $0x130] sm:$0xff] }
 0x935   :  { %v1369_v29 = vadd.f32 0.112945676, %v1368_v22  ;;  %v1412_v57 = vmul.f32 %v1411_v44, %v4308_v61  ;;  %v1636_v22 = vld [vmem:[#allocation14 + $0xe8] sm:$0xff]  ;;  %1673 = vmatpush.msra.mxu2 %v1620_v45  ;;  %1719 = vmatpush.msrb.mxu3 %v1652_v23  ;;  %v1633_v44 = vld [vmem:[#allocation14 + $0xd0] sm:$0xff]  ;;  %v1400_v45 = vadd.f32 0.18741608, %v1399_v58 }
 0x936   :  { %v1290_v34 = vmul.f32 %v1289_v28, %v4310_v62  ;;  %1696 = vmatpush.msrb.mxu1 %v1636_v22  ;;  %v1276_v28 = vadd.f32 0.0036580483, %v1275_v13 }
 0x937   :  { %v1370_v37 = vmul.f32 %v1369_v29, %v4312_v0  ;;  %v4344_v12 = vadd.f32 1.0, %v1412_v57  ;;  %v1619_v29 = vld [vmem:[#allocation14 + $0x60] sm:$0xff]  ;;  %1720 = vmatpush.msrb.mxu3 %v1651_v31  ;;  %v1629_v31 = vld [vmem:[#allocation14 + $0xb0] sm:$0xff] }
 0x938   :  { %v1291_v47 = vadd.f32 0.4994258, %v1290_v34  ;;  %1674 = vmatpush.msra.mxu2 %v1619_v29  ;;  %1697 = vmatpush.msrb.mxu1 %v1635_v17  ;;  %v1618_v34 = vld [vmem:[#allocation14 + $0x58] sm:$0xff]  ;;  %v1613_v17 = vld [vmem:[#allocation14 + $0x30] sm:$0xff] }
 0x939   :  { %vm1419_vm15 = vweird.f32 %v4344_v12 }
 0x93a   :  { %v1292_v59 = vmul.f32 %v1291_v47, %v4310_v62  ;;  %1675 = vmatpush.msra.mxu2 %v1618_v34  ;;  %v1665_v47 = vld [vmem:[#allocation14 + $0x1d0] sm:$0xff] }
 0x93b   :  { %v1661_v34 = vld [vmem:[#allocation14 + $0x1b0] sm:$0xff] }
 0x93c   :  { %v4347_v16 = vadd.f32 1.0, %v1292_v59  ;;  %1676 = vmatpush.msra.mxu2 %v1617_v15  ;;  %v1612_v15 = vld [vmem:[#allocation14 + $0x28] sm:$0xff] }
 0x93e   :  { %vm1299_vm10 = vweird.f32 %v4347_v16 }
 0x953   :  { %v1052_v50 = vpop.xlane.xlu0 %1051 }
 0x954   :  { %v1054_v51 = vmul.f32 %v1052_v50, %v4082_v14  ;;  %v1371_v50 = vadd.f32 0.4994258, %v1370_v37  ;;  %v1634_v37 = vld [vmem:[#allocation14 + $0xd8] sm:$0xff] }
 0x955   :  { %1698 = vmatpush.msrb.mxu1 %v1634_v37 }
 0x956   :  { %v4274_v52 = vsub.f32 %v1046_v48, %v1054_v51  ;;  %v1353_v48 = vmul.f32 2.1237322e-06, %v4312_v0  ;;  %v1332_v51 = vmul.f32 %v1331_v39, %v4306_v60  ;;  %v1372_v3 = vmul.f32 %v1371_v50, %v4312_v0  ;;  %v1650_v39 = vld [vmem:[#allocation14 + $0x158] sm:$0xff] }
 0x957   :  { %1721 = vmatpush.msrb.mxu3 %v1650_v39  ;;  %1699 = vmatpush.msrb.mxu1 %v1633_v44  ;;  %v1628_v44 = vld [vmem:[#allocation14 + $0xa8] sm:$0xff] }
 0x958   :  { %v1058_v53 = vmul.f32 %v4274_v52, %v4274_v52  ;;  %v1354_v1 = vadd.f32 0.00028619796, %v1353_v48  ;;  %v4340_v4 = vadd.f32 1.0, %v1332_v51  ;;  %v4350_v20 = vadd.f32 1.0, %v1372_v3  ;;  %v1664_v3 = vld [vmem:[#allocation14 + $0x1c8] sm:$0xff] }
 0x959   :  { %v1277_v51 = vmul.f32 %v1276_v28, %v4310_v62  ;;  %1722 = vmatpush.msrb.mxu3 %v1649_v46  ;;  %1700 = vmatpush.msrb.mxu1 %v1632_v56  ;;  %v1401_v46 = vmul.f32 %v1400_v45, %v4308_v61  ;;  %v1643_v61 = vld [vmem:[#allocation14 + $0x120] sm:$0xff]  ;;  %v1658_v45 = vld [vmem:[#allocation14 + $0x198] sm:$0xff] }
 0x95a   :  { %1061 = vadd.xlane.f32.xlu1 %v1058_v53  ;;  %v1316_v53 = vadd.f32 0.0036580483, %v1315_v40  ;;  %v1355_v41 = vmul.f32 %v1354_v1, %v4312_v0  ;;  %3608 = vrcp.f32 %v4340_v4  ;;  %v1666_v40 = vld [vmem:[#allocation14 + $0x1d8] sm:$0xff]  ;;  %v1648_v1 = vld [vmem:[#allocation14 + $0x148] sm:$0xff]  ;;  %vm1339_vm13 = vweird.f32 %v4340_v4 }
 0x95b   :  { %3610 = vrcp.f32 %v4344_v12  ;;  %1744 = vmatpush.msrb.mxu0 %v1666_v40  ;;  %v1278_v26 = vadd.f32 0.05243302, %v1277_v51  ;;  %1723 = vmatpush.msrb.mxu3 %v1648_v1  ;;  %v1644_v51 = vld [vmem:[#allocation14 + $0x128] sm:$0xff]  ;;  %v1627_v1 = vld [vmem:[#allocation14 + $0xa0] sm:$0xff]  ;;  %vm1379_vm12 = vweird.f32 %v4350_v20 }
 0x95c   :  { %v1317_v10 = vmul.f32 %v1316_v53, %v4306_v60  ;;  %3612 = vrcp.f32 %v4347_v16  ;;  %v1356_v32 = vadd.f32 0.0036580483, %v1355_v41  ;;  %v1616_v53 = vld [vmem:[#allocation14 + $0x48] sm:$0xff]  ;;  %v1614_v41 = vld [vmem:[#allocation14 + $0x38] sm:$0xff]  ;;  %1701 = vmatpush.msrb.mxu1 %v1631_v9 }
 0x95d   :  { %3614 = vrcp.f32 %v4350_v20  ;;  %1745 = vmatpush.msrb.mxu0 %v1665_v47  ;;  %1677 = vmatpush.msra.mxu2 %v1616_v53  ;;  %v1279_v40 = vmul.f32 %v1278_v26, %v4310_v62  ;;  %v1660_v53 = vld [vmem:[#allocation14 + $0x1a8] sm:$0xff]  ;;  %v4390_v26 = vadd.f32 1.1283791, %v1401_v46 }
 0x95e   :  { %v1318_v24 = vadd.f32 0.05243302, %v1317_v10  ;;  %v1357_v59 = vmul.f32 %v1356_v32, %v4312_v0  ;;  %1724 = vmatpush.msrb.mxu3 %v1647_v11  ;;  %1702 = vmatpush.msrb.mxu1 %v1630_v42  ;;  %v1642_v42 = vld [vmem:[#allocation14 + $0x118] sm:$0xff] }
 0x95f   :  { %1746 = vmatpush.msrb.mxu0 %v1664_v3  ;;  %1678 = vmatpush.msra.mxu2 %v1615_v8  ;;  %v1345_v3 = vand.u32 2147483648, %v4340_v4  ;;  %v1659_v8 = vld [vmem:[#allocation14 + $0x1a0] sm:$0xff] }
 0x960   :  { %v4356_v48 = vpop.eup %3608  ;;  %v1319_v50 = vmul.f32 %v1318_v24, %v4306_v60  ;;  %v1358_v23 = vadd.f32 0.05243302, %v1357_v59  ;;  %1725 = vmatpush.msrb.mxu3 %v1646_v25  ;;  %1703 = vmatpush.msrb.mxu1 %v1629_v31  ;;  %v1611_v59 = vld [vmem:[#allocation14 + $0x20] sm:$0xff]  ;;  %v1609_v25 = vld [vmem:[#allocation14 + $0x10] sm:$0xff]  ;;  %v1425_v31 = vand.u32 2147483648, %v4344_v12 }
 0x961   :  { %v4360_v57 = vpop.eup %3610  ;;  %v1335_v18 = vmul.f32 %v4356_v48, %v4340_v4  ;;  %1747 = vmatpush.msrb.mxu0 %v1663_v2  ;;  %1679 = vmatpush.msra.mxu2 %v1614_v41  ;;  %v1280_v2 = vadd.f32 0.18741608, %v1279_v40  ;;  %vm1340_vm0 = vweird.f32 %v4356_v48 }
 0x962   :  { %v4364_v5 = vpop.eup %3612  ;;  %v1320_v13 = vadd.f32 0.18741608, %v1319_v50  ;;  %v1415_v28 = vmul.f32 %v4360_v57, %v4344_v12  ;;  %v1359_v50 = vmul.f32 %v1358_v23, %v4312_v0  ;;  %1726 = vmatpush.msrb.mxu3 %v1645_v43  ;;  %1704 = vmatpush.msrb.mxu1 %v1628_v44  ;;  %v1641_v43 = vld [vmem:[#allocation14 + $0x110] sm:$0xff]  ;;  %vm1420_vm1 = vweird.f32 %v4360_v57  ;;  %v1624_v44 = vld [vmem:[#allocation14 + $0x88] sm:$0xff]  ;;  %vm4418_vm3 = vmor %vm1339_vm13, %vm1340_vm0 }
 0x963   :  { %v4366_v10 = vpop.eup %3614  ;;  %v1295_v22 = vmul.f32 %v4364_v5, %v4347_v16  ;;  %v1336_v39 = vsub.f32 1.0, %v1335_v18  ;;  %1748 = vmatpush.msrb.mxu0 %v1662_v27  ;;  %1680 = vmatpush.msra.mxu2 %v1613_v17  ;;  %v1626_v18 = vld [vmem:[#allocation14 + $0x98] sm:$0xff]  ;;  %v1625_v27 = vld [vmem:[#allocation14 + $0x90] sm:$0xff]  ;;  %v1423_v17 = vand.u32 2147483647, %v4344_v12  ;;  %vm1300_vm2 = vweird.f32 %v4364_v5  ;;  %vm4430_vm5 = vmor %vm1419_vm15, %vm1420_vm1 }
 0x964   :  { %v1375_v29 = vmul.f32 %v4366_v10, %v4350_v20  ;;  %v1321_v37 = vmul.f32 %v1320_v13, %v4306_v60  ;;  %v1343_v60 = vand.u32 2147483647, %v4340_v4  ;;  %v1416_v56 = vsub.f32 1.0, %v1415_v28  ;;  %1727 = vmatpush.msrb.mxu3 %v1644_v51  ;;  %v1610_v13 = vld [vmem:[#allocation14 + $0x18] sm:$0xff]  ;;  %1705 = vmatpush.msrb.mxu1 %v1627_v1  ;;  %v1640_v51 = vld [vmem:[#allocation14 + $0x108] sm:$0xff]  ;;  %vm4446_vm11 = vmor %vm1299_vm10, %vm1300_vm2 }
 0x965   :  { %v1296_v47 = vsub.f32 1.0, %v1295_v22  ;;  %1749 = vmatpush.msrb.mxu0 %v1661_v34  ;;  %1681 = vmatpush.msra.mxu2 %v1612_v15  ;;  %v1337_v11 = vmul.f32 %v4356_v48, %v1336_v39  ;;  %v1360_v41 = vadd.f32 0.18741608, %v1359_v50  ;;  %v1657_v34 = vld [vmem:[#allocation14 + $0x190] sm:$0xff]  ;;  %v1281_v39 = vmul.f32 %v1280_v2, %v4310_v62  ;;  %v1608_v15 = vld [vmem:[#allocation14 + $0x8] sm:$0xff] }
 0x966   :  { %v1376_v58 = vsub.f32 1.0, %v1375_v29  ;;  %v4386_v9 = vadd.f32 1.1283791, %v1321_v37  ;;  %vm4393_vm14 = vcmp.eq.f32.partialorder %v1343_v60, 8.507059e+37  ;;  %v1417_v23 = vmul.f32 %v4360_v57, %v1416_v56  ;;  %1728 = vmatpush.msrb.mxu3 %v1643_v61  ;;  %1706 = vmatpush.msrb.mxu1 %v1626_v18 }
 0x967   :  { %1750 = vmatpush.msrb.mxu0 %v1660_v53  ;;  %1682 = vmatpush.msra.mxu2 %v1611_v59  ;;  %v1346_v29 = vor.u32 1.1754944e-38, %v1345_v3  ;;  %v1338_v37 = vadd.f32 %v4356_v48, %v1337_v11  ;;  %v1361_v50 = vmul.f32 %v1360_v41, %v4312_v0  ;;  %v1656_v53 = vld [vmem:[#allocation14 + $0x188] sm:$0xff]  ;;  %vm1380_vm4 = vweird.f32 %v4366_v10  ;;  %v1623_v59 = vld [vmem:[#allocation14 + $0x80] sm:$0xff] }
 0x968   :  { %1729 = vmatpush.msrb.mxu3 %v1642_v42  ;;  %1707 = vmatpush.msrb.mxu1 %v1625_v27  ;;  %v1418_v60 = vadd.f32 %v4360_v57, %v1417_v23  ;;  %vm4434_vm6 = vcmp.eq.f32.partialorder %v1423_v17, 8.507059e+37  ;;  %v1303_v3 = vand.u32 2147483647, %v4347_v16  ;;  %v1385_v61 = vand.u32 2147483648, %v4350_v20  ;;  %v1655_v11 = vld [vmem:[#allocation14 + $0x180] sm:$0xff]  ;;  %vm4457_vm13 = vmor %vm1379_vm12, %vm1380_vm4 }
 0x969   :  { %1751 = vmatpush.msrb.mxu0 %v1659_v8  ;;  %1683 = vmatpush.msra.mxu2 %v1610_v13  ;;  %v1639_v8 = vld [vmem:[#allocation14 + $0x100] sm:$0xff]  ;;  %v1342_v12 = vsel %vm4418_vm3, %v4356_v48, %v1338_v37  ;;  %v1282_v18 = vadd.f32 1.1283791, %v1281_v39  ;;  %v1362_v48 = vadd.f32 1.1283791, %v1361_v50  ;;  %v1403_v22 = vmul.f32 %v4390_v26, %v4290_v21 }
 0x96a   :  { %1730 = vmatpush.msrb.mxu3 %v1641_v43  ;;  %1708 = vmatpush.msrb.mxu1 %v1624_v44  ;;  %vm1304_vm0 = vcmp.eq.f32.partialorder %v1303_v3, 8.507059e+37  ;;  %v1257_v50 = vmul.f32 0.5, %v4287_v7 }
 0x96b   :  { %1752 = vmatpush.msrb.mxu0 %v1658_v45  ;;  %1684 = vmatpush.msra.mxu2 %v1609_v25  ;;  %v1386_v25 = vor.u32 1.1754944e-38, %v1385_v61  ;;  %v1283_v43 = vmul.f32 %v1282_v18, %v4293_v54 }
 0x96c   :  { %1731 = vmatpush.msrb.mxu3 %v1640_v51  ;;  %1709 = vmatpush.msrb.mxu1 %v1623_v59 }
 0x96d   :  { %1753 = vmatpush.msrb.mxu0 %v1657_v34  ;;  %1685 = vmatpush.msra.mxu2 %v1608_v15 }
 0x96e   :  { %1732 = vmatpush.msrb.mxu3 %v1639_v8 }
 0x96f   :  { %1754 = vmatpush.msrb.mxu0 %v1656_v53 }
 0x971   :  { %1755 = vmatpush.msrb.mxu0 %v1655_v11 }
 0x9cd   :  { %v1062_v19 = vpop.xlane.xlu1 %1061 }
 0x9ce   :  { %v1064_v24 = vmul.f32 %v1062_v19, %v4082_v14  ;;  %v1297_v19 = vmul.f32 %v4364_v5, %v1296_v47  ;;  %v1305_v47 = vand.u32 2147483648, %v4347_v16  ;;  %v1383_v16 = vand.u32 2147483647, %v4350_v20 }
 0x9cf   :  { %v1422_v20 = vsel %vm4430_vm5, %v4360_v57, %v1418_v60  ;;  %v1323_v57 = vmul.f32 %v4386_v9, %v4285_v30 }
 0x9d0   :  { %v4377_v32 = vadd.f32 1e-05, %v1064_v24  ;;  %v1377_v24 = vmul.f32 %v4366_v10, %v1376_v58  ;;  %v1298_v46 = vadd.f32 %v4364_v5, %v1297_v19  ;;  %v1607_v58 = vld [vmem:[#allocation14] sm:$0xff]  ;;  %v1306_v41 = vor.u32 1.1754944e-38, %v1305_v47 }
 0x9d1   :  { %1686 = vmatpush.msra.mxu2 %v1607_v58  ;;  %vm1384_vm1 = vcmp.eq.f32.partialorder %v1383_v16, 8.507059e+37 }
 0x9d2   :  { %3616 = vrsqrt.f32 %v4377_v32  ;;  %v1378_v56 = vadd.f32 %v4366_v10, %v1377_v24  ;;  %v1302_v19 = vsel %vm4446_vm11, %v4364_v5, %v1298_v46  ;;  %v1347_v5 = vsel %vm4393_vm14, %v1346_v29, %v1342_v12 }
 0x9d3   :  { %v1426_v24 = vor.u32 1.1754944e-38, %v1425_v31  ;;  %v1307_v27 = vsel %vm1304_vm0, %v1306_v41, %v1302_v19  ;;  %vm1083_vm2 = vweird.f32 %v4377_v32  ;;  %v1363_v29 = vmul.f32 %v1362_v48, %v4296_v55 }
 0x9d4   :  { %v1382_v45 = vsel %vm4457_vm13, %v4366_v10, %v1378_v56  ;;  %v1308_v37 = vmul.f32 %v1307_v27, %v1283_v43 }
 0x9d5   :  { %v1427_v10 = vsel %vm4434_vm6, %v1426_v24, %v1422_v20  ;;  %v1387_v34 = vsel %vm1384_vm1, %v1386_v25, %v1382_v45 }
 0x9d6   :  { %v1428_v9 = vmul.f32 %v1427_v10, %v1403_v22  ;;  %v1388_v39 = vmul.f32 %v1387_v34, %v1363_v29  ;;  %v3482_v15 = vclamps-f32 %v1308_v37, 1.0 }
 0x9d8   :  { %v4400_v28 = vpop.eup %3616  ;;  %v3485_v46 = vclamps-f32 %v1428_v9, 1.0  ;;  %v3484_v47 = vclamps-f32 %v1388_v39, 1.0  ;;  %v1591_v21 = vadd.f32 1.0, %v3482_v15 }
 0x9d9   :  { %v1078_v40 = vmul.f32 %v4400_v28, %v4377_v32  ;;  %vm1084_vm15 = vweird.f32 %v4400_v28  ;;  %v1348_v32 = vmul.f32 %v1347_v5, %v1323_v57 }
 0x9da   :  { %vm1085_vm14 = vmor %vm1083_vm2, %vm1084_vm15  ;;  %v1594_v55 = vadd.f32 1.0, %v3485_v46  ;;  %v1593_v26 = vadd.f32 1.0, %v3484_v47 }
 0x9db   :  { %v1079_v0 = vmul.f32 %v4400_v28, %v1078_v40  ;;  %v3483_v54 = vclamps-f32 %v1348_v32, 1.0 }
 0x9dc   :  { %v1601_v60 = vmul.f32 %v1593_v26, %v1257_v50 }
 0x9dd   :  { %v1080_v13 = vmul.f32 0.5, %v1079_v0 }
 0x9df   :  { %v1081_v23 = vsub.f32 1.5, %v1080_v13 }
 0x9e1   :  { %v1082_v17 = vmul.f32 %v4400_v28, %v1081_v23 }
 0x9e3   :  { %v1086_v31 = vsel %vm1085_vm14, %v4400_v28, %v1082_v17  ;;  %v1255_v28 = vmul.f32 0.5, %v4282_v63 }
 0x9e4   :  { %v1088_v30 = vmul.f32 %v1086_v31, %v4274_v52  ;;  %v1592_v52 = vadd.f32 1.0, %v3483_v54 }
 0x9e5   :  { %v1599_v53 = vmul.f32 %v1591_v21, %v1255_v28 }
 0x9e6   :  { %v1093_v40 = vmul.f32 %v4256_v33, %v1088_v30  ;;  %v1256_v33 = vmul.f32 0.5, %v4278_v36 }
 0x9e8   :  { %v4486_v44 = vadd.f32 %v4259_v35, %v1093_v40  ;;  %v1258_v35 = vmul.f32 0.5, %v4280_v6  ;;  %v1600_v51 = vmul.f32 %v1592_v52, %v1256_v33 }
 0x9ea   :  { %1182 = vmatmul.f32.gmra.mxu2 %v4486_v44  ;;  %1205 = vmatmul.f32.gmra.mxu1 %v4486_v44  ;;  %v1602_v62 = vmul.f32 %v1594_v55, %v1258_v35 }
 0x9eb   :  { %1228 = vmatmul.f32.gmra.mxu3 %v4486_v44  ;;  %1251 = vmatmul.f32.gmra.mxu0 %v4486_v44 }
 0x9f2   :  { %1687 = vmatmul.f32.vlgmr.msra.gmra.mxu2 %v1599_v53  ;;  %1710 = vmatmul.f32.vlgmr.msrb.gmra.mxu1 %v1600_v51 }
 0x9f3   :  { %1733 = vmatmul.f32.vlgmr.msrb.gmra.mxu3 %v1601_v60  ;;  %1756 = vmatmul.f32.vlgmr.msrb.gmra.mxu0 %v1602_v62 }
 0xa67   :  { %v4496_v56 = vpop.f32.mrf.mxu1 }
 0xa68   :  { %v4499_v0 = vmul.f32 0.70710677, %v4496_v56  ;;  %v4501_v36 = vpop.f32.mrf.mxu0 }
 0xa69   :  { %v4504_v63 = vmul.f32 0.70710677, %v4501_v36 }
 0xa6a   :  { %v1471_v6 = vmul.f32 %v4499_v0, %v4499_v0 }
 0xa6b   :  { %v1551_v7 = vmul.f32 %v4504_v63, %v4504_v63 }
 0xa6c   :  { %v4510_v58 = vmin.f32 %v1471_v6, 16.0 }
 0xa6d   :  { %v4512_v59 = vmin.f32 %v1551_v7, 16.0  ;;  %v4514_v4 = vpop.f32.mrf.mxu2 }
 0xa6e   :  { %v1473_v1 = vmul.f32 2.1237322e-06, %v4510_v58  ;;  %v4518_v3 = vmul.f32 0.70710677, %v4514_v4  ;;  %v4520_v61 = vpop.f32.mrf.mxu3  ;;  %v1484_v16 = vmul.f32 3.8918573e-05, %v4510_v58 }
 0xa6f   :  { %v1553_v8 = vmul.f32 2.1237322e-06, %v4512_v59  ;;  %v4524_v11 = vmul.f32 0.70710677, %v4520_v61  ;;  %v1564_v13 = vmul.f32 3.8918573e-05, %v4512_v59  ;;  %v1711_v10 = vpop.f32.mrf.mxu1 }
 0xa70   :  { %v1474_v12 = vadd.f32 0.00028619796, %v1473_v1  ;;  %v1431_v2 = vmul.f32 %v4518_v3, %v4518_v3  ;;  %v1485_v42 = vadd.f32 0.001143296, %v1484_v16  ;;  %v1757_v52 = vpop.f32.mrf.mxu0 }
 0xa71   :  { %v1554_v18 = vadd.f32 0.00028619796, %v1553_v8  ;;  %v1511_v19 = vmul.f32 %v4524_v11, %v4524_v11  ;;  %v1565_v20 = vadd.f32 0.001143296, %v1564_v13 }
 0xa72   :  { %v1475_v41 = vmul.f32 %v1474_v12, %v4510_v58  ;;  %v4533_v48 = vmin.f32 %v1431_v2, 16.0  ;;  %v1486_v25 = vmul.f32 %v1485_v42, %v4510_v58 }
 0xa73   :  { %v1555_v45 = vmul.f32 %v1554_v18, %v4512_v59  ;;  %v4536_v23 = vmin.f32 %v1511_v19, 16.0  ;;  %v1566_v27 = vmul.f32 %v1565_v20, %v4512_v59 }
 0xa74   :  { %v1476_v5 = vadd.f32 0.0036580483, %v1475_v41  ;;  %v1433_v24 = vmul.f32 2.1237322e-06, %v4533_v48  ;;  %v1444_v34 = vmul.f32 3.8918573e-05, %v4533_v48 }
 0xa75   :  { %v1556_v17 = vadd.f32 0.0036580483, %v1555_v45  ;;  %v1513_v57 = vmul.f32 2.1237322e-06, %v4536_v23  ;;  %v1688_v43 = vpop.f32.mrf.mxu2  ;;  %v1487_v32 = vadd.f32 0.014752088, %v1486_v25 }
 0xa76   :  { %v1477_v22 = vmul.f32 %v1476_v5, %v4510_v58  ;;  %v1434_v29 = vadd.f32 0.00028619796, %v1433_v24  ;;  %v1712_v31 = vadd.f32 %v1711_v10, %v1688_v43  ;;  %v1734_v37 = vpop.f32.mrf.mxu3  ;;  %v1567_v30 = vadd.f32 0.014752088, %v1566_v27 }
 0xa77   :  { %v1445_v9 = vadd.f32 0.001143296, %v1444_v34  ;;  %v1557_v39 = vmul.f32 %v1556_v17, %v4512_v59  ;;  %v1488_v15 = vmul.f32 %v1487_v32, %v4510_v58  ;;  %v1514_v47 = vadd.f32 0.00028619796, %v1513_v57 }
 0xa78   :  { %v1435_v40 = vmul.f32 %v1434_v29, %v4533_v48  ;;  %v1735_v54 = vadd.f32 %v1734_v37, %v1712_v31  ;;  %v1478_v46 = vadd.f32 0.05243302, %v1477_v22  ;;  %v1568_v21 = vmul.f32 %v1567_v30, %v4512_v59 }
 0xa79   :  { %v1446_v55 = vmul.f32 %v1445_v9, %v4533_v48  ;;  %v1489_v28 = vadd.f32 0.112945676, %v1488_v15  ;;  %v1558_v51 = vadd.f32 0.05243302, %v1557_v39  ;;  %v1515_v6 = vmul.f32 %v1514_v47, %v4536_v23 }
 0xa7a   :  { %v1436_v26 = vadd.f32 0.0036580483, %v1435_v40  ;;  %v1758_v33 = vadd.f32 %v1757_v52, %v1735_v54  ;;  %v1569_v35 = vadd.f32 0.112945676, %v1568_v21  ;;  %v1479_v60 = vmul.f32 %v1478_v46, %v4510_v58 }
 0xa7b   :  { %v1447_v50 = vadd.f32 0.014752088, %v1446_v55  ;;  %v1490_v62 = vmul.f32 %v1489_v28, %v4510_v58  ;;  %v1524_v2 = vmul.f32 3.8918573e-05, %v4536_v23  ;;  %v1559_v13 = vmul.f32 %v1558_v51, %v4512_v59 }
 0xa7c   :  { %v4550_v53 = vadd.f32 %v1758_v33, %v4263_v38  ;;  %v1570_v7 = vmul.f32 %v1569_v35, %v4512_v59  ;;  %v1437_v8 = vmul.f32 %v1436_v26, %v4533_v48  ;;  %v1480_v41 = vadd.f32 0.18741608, %v1479_v60 }
 0xa7d   :  { %v1448_v1 = vmul.f32 %v1447_v50, %v4533_v48  ;;  %v1491_v12 = vadd.f32 0.4994258, %v1490_v62  ;;  %v1525_v19 = vadd.f32 0.001143296, %v1524_v2  ;;  %v1516_v42 = vadd.f32 0.0036580483, %v1515_v6 }
 0xa7e   :  { %1769 = vadd.xlane.f32.xlu2 %v4550_v53  ;;  %v1571_v16 = vadd.f32 0.4994258, %v1570_v7  ;;  %v1438_v5 = vadd.f32 0.05243302, %v1437_v8  ;;  %v1560_v57 = vadd.f32 0.18741608, %v1559_v13  ;;  %v1481_v10 = vmul.f32 %v1480_v41, %v4510_v58 }
 0xa7f   :  { %v1449_v38 = vadd.f32 0.112945676, %v1448_v1  ;;  %v1492_v18 = vmul.f32 %v1491_v12, %v4510_v58  ;;  %v1526_v17 = vmul.f32 %v1525_v19, %v4536_v23  ;;  %v1517_v43 = vmul.f32 %v1516_v42, %v4536_v23 }
 0xa80   :  { %v1572_v20 = vmul.f32 %v1571_v16, %v4512_v59  ;;  %v1439_v34 = vmul.f32 %v1438_v5, %v4533_v48  ;;  %v1561_v31 = vmul.f32 %v1560_v57, %v4512_v59  ;;  %v1482_v32 = vadd.f32 1.1283791, %v1481_v10 }
 0xa81   :  { %v1450_v45 = vmul.f32 %v1449_v38, %v4533_v48  ;;  %v1493_v24 = vadd.f32 1.0, %v1492_v18  ;;  %v1527_v29 = vadd.f32 0.014752088, %v1526_v17  ;;  %v1518_v37 = vadd.f32 0.05243302, %v1517_v43 }
 0xa82   :  { %v1573_v25 = vadd.f32 1.0, %v1572_v20  ;;  %v1440_v40 = vadd.f32 0.18741608, %v1439_v34  ;;  %v1562_v15 = vadd.f32 1.1283791, %v1561_v31  ;;  %v1483_v47 = vmul.f32 %v1482_v32, %v4499_v0 }
 0xa83   :  { %v1451_v27 = vadd.f32 0.4994258, %v1450_v45  ;;  %3618 = vrcp.f32 %v1493_v24  ;;  %v1528_v9 = vmul.f32 %v1527_v29, %v4536_v23  ;;  %v1519_v52 = vmul.f32 %v1518_v37, %v4536_v23 }
 0xa84   :  { %3620 = vrcp.f32 %v1573_v25  ;;  %v1441_v55 = vmul.f32 %v1440_v40, %v4533_v48  ;;  %v1503_v26 = vand.u32 2147483647, %v1493_v24  ;;  %v1505_v33 = vand.u32 2147483648, %v1493_v24 }
 0xa85   :  { %v1452_v22 = vmul.f32 %v1451_v27, %v4533_v48  ;;  %v1529_v59 = vadd.f32 0.112945676, %v1528_v9  ;;  %v1585_v50 = vand.u32 2147483648, %v1573_v25  ;;  %v1563_v62 = vmul.f32 %v1562_v15, %v4504_v63 }
 0xa86   :  { %v1583_v6 = vand.u32 2147483647, %v1573_v25  ;;  %vm1499_vm5 = vweird.f32 %v1493_v24  ;;  %vm1579_vm6 = vweird.f32 %v1573_v25  ;;  %v1442_v8 = vadd.f32 1.1283791, %v1441_v55 }
 0xa87   :  { %v4570_v30 = vadd.f32 1.0, %v1452_v22  ;;  %v1530_v51 = vmul.f32 %v1529_v59, %v4536_v23  ;;  %v1506_v48 = vor.u32 1.1754944e-38, %v1505_v33  ;;  %vm1504_vm11 = vcmp.eq.f32.partialorder %v1503_v26, 8.507059e+37 }
 0xa88   :  { %v1586_v38 = vor.u32 1.1754944e-38, %v1585_v50  ;;  %vm1584_vm13 = vcmp.eq.f32.partialorder %v1583_v6, 8.507059e+37  ;;  %v1260_v17 = vmul.f32 0.5, %v4496_v56  ;;  %v1262_v43 = vmul.f32 0.5, %v4501_v36 }
 0xa89   :  { %v3619_v39 = vpop.eup %3618  ;;  %3622 = vrcp.f32 %v4570_v30  ;;  %v1531_v1 = vadd.f32 0.4994258, %v1530_v51  ;;  %v1465_v20 = vand.u32 2147483648, %v4570_v30  ;;  %vm1459_vm0 = vweird.f32 %v4570_v30 }
 0xa8a   :  { %v3621_v54 = vpop.eup %3620  ;;  %v1495_v58 = vmul.f32 %v3619_v39, %v1493_v24  ;;  %vm1500_vm3 = vweird.f32 %v3619_v39  ;;  %v1520_v34 = vadd.f32 0.18741608, %v1519_v52  ;;  %v1443_v31 = vmul.f32 %v1442_v8, %v4518_v3  ;;  %v1866_v8 = vld [vmem:[#allocation5 + $0x2f0] sm:$0xff] }
 0xa8b   :  { %v1575_v46 = vmul.f32 %v3621_v54, %v1573_v25  ;;  %vm1580_vm4 = vweird.f32 %v3621_v54  ;;  %vm1501_vm10 = vmor %vm1499_vm5, %vm1500_vm3  ;;  %v1532_v63 = vmul.f32 %v1531_v1, %v4536_v23  ;;  %v1463_v25 = vand.u32 2147483647, %v4570_v30  ;;  %1900 = vmatpush.msra.mxu1 %v1866_v8 }
 0xa8c   :  { %v1496_v21 = vsub.f32 1.0, %v1495_v58  ;;  %vm1581_vm12 = vmor %vm1579_vm6, %vm1580_vm4  ;;  %v1466_v29 = vor.u32 1.1754944e-38, %v1465_v20  ;;  %v1521_v58 = vmul.f32 %v1520_v34, %v4536_v23  ;;  %v1259_v15 = vmul.f32 0.5, %v4514_v4  ;;  %v1860_v20 = vld [vmem:[#allocation5 + $0x2c0] sm:$0xff]  ;;  %v1847_v34 = vld [vmem:[#allocation5 + $0x258] sm:$0xff] }
 0xa8d   :  { %v1576_v28 = vsub.f32 1.0, %v1575_v46  ;;  %v1533_v45 = vadd.f32 1.0, %v1532_v63  ;;  %vm1464_vm2 = vcmp.eq.f32.partialorder %v1463_v25, 8.507059e+37  ;;  %v1261_v51 = vmul.f32 0.5, %v4520_v61  ;;  %v1863_v61 = vld [vmem:[#allocation5 + $0x2d8] sm:$0xff]  ;;  %v1858_v25 = vld [vmem:[#allocation5 + $0x2b0] sm:$0xff] }
 0xa8e   :  { %v1497_v35 = vmul.f32 %v3619_v39, %v1496_v21  ;;  %v1522_v52 = vadd.f32 1.1283791, %v1521_v58  ;;  %1901 = vmatpush.msra.mxu1 %v1863_v61  ;;  %v1840_v58 = vld [vmem:[#allocation5 + $0x220] sm:$0xff]  ;;  %v3561_v61 = vld [vmem:[%s5120_s5 + $0x1] ss:$0 sm:$0xff] }
 0xa8f   :  { %v1577_v60 = vmul.f32 %v3621_v54, %v1576_v28  ;;  %v3623_v0 = vpop.eup %3622  ;;  %3624 = vrcp.f32 %v1533_v45  ;;  %v1545_v3 = vand.u32 2147483648, %v1533_v45  ;;  %v1543_v55 = vand.u32 2147483647, %v1533_v45 }
 0xa90   :  { %v1498_v7 = vadd.f32 %v3619_v39, %v1497_v35  ;;  %v1455_v2 = vmul.f32 %v3623_v0, %v4570_v30  ;;  %vm1460_vm15 = vweird.f32 %v3623_v0  ;;  %vm1539_vm3 = vweird.f32 %v1533_v45  ;;  %1902 = vmatpush.msra.mxu1 %v1860_v20  ;;  %v1869_v20 = vld [vmem:[#allocation7 + $0x3] sm:$0x7] }
 0xa91   :  { %v1578_v12 = vadd.f32 %v3621_v54, %v1577_v60  ;;  %vm1461_vm1 = vmor %vm1459_vm0, %vm1460_vm15  ;;  %v1546_v33 = vor.u32 1.1754944e-38, %v1545_v3  ;;  %v1523_v23 = vmul.f32 %v1522_v52, %v4524_v11  ;;  %vm1544_vm5 = vcmp.eq.f32.partialorder %v1543_v55, 8.507059e+37  ;;  %v1865_v11 = vld [vmem:[#allocation5 + $0x2e8] sm:$0xff]  ;;  %v1832_v52 = vld [vmem:[#allocation5 + $0x1e0] sm:$0xff] }
 0xa92   :  { %v1502_v16 = vsel %vm1501_vm10, %v3619_v39, %v1498_v7  ;;  %v1456_v19 = vsub.f32 1.0, %v1455_v2  ;;  %1877 = vmatpush.msrb.mxu2 %v1865_v11  ;;  %v1864_v2 = vld [vmem:[#allocation5 + $0x2e0] sm:$0xff]  ;;  %v1833_v3 = vld [vmem:[#allocation5 + $0x1e8] sm:$0xff] }
 0xa93   :  { %v1507_v13 = vsel %vm1504_vm11, %v1506_v48, %v1502_v16  ;;  %v1582_v18 = vsel %vm1581_vm12, %v3621_v54, %v1578_v12  ;;  %v1867_v48 = vld [vmem:[#allocation5 + $0x2f8] sm:$0xff]  ;;  %v1862_v12 = vld [vmem:[#allocation5 + $0x2d0] sm:$0xff]  ;;  %v1829_v55 = vld [vmem:[#allocation5 + $0x1c8] sm:$0xff] }
 0xa94   :  { %v1508_v41 = vmul.f32 %v1507_v13, %v1483_v47  ;;  %v1587_v42 = vsel %vm1584_vm13, %v1586_v38, %v1582_v18  ;;  %v1457_v24 = vmul.f32 %v3623_v0, %v1456_v19  ;;  %1923 = vmatpush.msra.mxu3 %v1867_v48  ;;  %1878 = vmatpush.msrb.mxu2 %v1862_v12 }
 0xa95   :  { %v1588_v5 = vmul.f32 %v1587_v42, %v1563_v62  ;;  %v3625_v56 = vpop.eup %3624  ;;  %v1859_v42 = vld [vmem:[#allocation5 + $0x2b8] sm:$0xff] }
 0xa96   :  { %v3487_v27 = vclamps-f32 %v1508_v41, 1.0  ;;  %v1458_v10 = vadd.f32 %v3623_v0, %v1457_v24  ;;  %v1535_v36 = vmul.f32 %v3625_v56, %v1533_v45  ;;  %vm1540_vm14 = vweird.f32 %v3625_v56  ;;  %1924 = vmatpush.msra.mxu3 %v1864_v2  ;;  %v1861_v45 = vld [vmem:[#allocation5 + $0x2c8] sm:$0xff]  ;;  %1879 = vmatpush.msrb.mxu2 %v1859_v42 }
 0xa97   :  { %v3489_v57 = vclamps-f32 %v1588_v5, 1.0  ;;  %vm1541_vm4 = vmor %vm1539_vm3, %vm1540_vm14  ;;  %v1856_v5 = vld [vmem:[#allocation5 + $0x2a0] sm:$0xff]  ;;  %v1857_v24 = vld [vmem:[#allocation5 + $0x2a8] sm:$0xff] }
 0xa98   :  { %v1596_v22 = vadd.f32 1.0, %v3487_v27  ;;  %v1462_v37 = vsel %vm1461_vm1, %v3623_v0, %v1458_v10  ;;  %v1536_v47 = vsub.f32 1.0, %v1535_v36  ;;  %1925 = vmatpush.msra.mxu3 %v1861_v45  ;;  %1880 = vmatpush.msrb.mxu2 %v1856_v5  ;;  %v1853_v27 = vld [vmem:[#allocation5 + $0x288] sm:$0xff]  ;;  %v1851_v10 = vld [vmem:[#allocation5 + $0x278] sm:$0xff]  ;;  %v1836_v36 = vld [vmem:[#allocation5 + $0x200] sm:$0xff]  ;;  %v1872_v45 = vperm.slane %v1869_v20, 1 }
 0xa99   :  { %v1598_v32 = vadd.f32 1.0, %v3489_v57  ;;  %v1467_v39 = vsel %vm1464_vm2, %v1466_v29, %v1462_v37  ;;  %1903 = vmatpush.msra.mxu1 %v1857_v24  ;;  %v1855_v57 = vld [vmem:[#allocation5 + $0x298] sm:$0xff]  ;;  %v1849_v29 = vld [vmem:[#allocation5 + $0x268] sm:$0xff]  ;;  %v1846_v37 = vld [vmem:[#allocation5 + $0x250] sm:$0xff]  ;;  %v1871_v24 = vperm.slane %v1869_v20, 0 }
 0xa9a   :  { %v1604_v9 = vmul.f32 %v1596_v22, %v1260_v17  ;;  %v1468_v54 = vmul.f32 %v1467_v39, %v1443_v31  ;;  %v1537_v59 = vmul.f32 %v3625_v56, %v1536_v47  ;;  %1926 = vmatpush.msra.mxu3 %v1858_v25  ;;  %v1854_v17 = vld [vmem:[#allocation5 + $0x290] sm:$0xff]  ;;  %1881 = vmatpush.msrb.mxu2 %v1853_v27  ;;  %v1848_v22 = vld [vmem:[#allocation5 + $0x260] sm:$0xff] }
 0xa9b   :  { %v1606_v40 = vmul.f32 %v1598_v32, %v1262_v43  ;;  %1904 = vmatpush.msra.mxu1 %v1854_v17  ;;  %v1852_v43 = vld [vmem:[#allocation5 + $0x280] sm:$0xff]  ;;  %v1845_v32 = vld [vmem:[#allocation5 + $0x248] sm:$0xff]  ;;  %v1842_v39 = vld [vmem:[#allocation5 + $0x230] sm:$0xff] }
 0xa9c   :  { %1713 = vmatmul.f32.gmra.mxu1 %v1604_v9  ;;  %v3486_v30 = vclamps-f32 %v1468_v54, 1.0  ;;  %v1538_v26 = vadd.f32 %v3625_v56, %v1537_v59  ;;  %1927 = vmatpush.msra.mxu3 %v1855_v57  ;;  %v1844_v31 = vld [vmem:[#allocation5 + $0x240] sm:$0xff]  ;;  %v1841_v9 = vld [vmem:[#allocation5 + $0x228] sm:$0xff]  ;;  %v1838_v54 = vld [vmem:[#allocation5 + $0x210] sm:$0xff] }
 0xa9d   :  { %1759 = vmatmul.f32.gmra.mxu0 %v1606_v40  ;;  %1905 = vmatpush.msra.mxu1 %v1851_v10  ;;  %v1843_v40 = vld [vmem:[#allocation5 + $0x238] sm:$0xff] }
 0xa9e   :  { %v1595_v46 = vadd.f32 1.0, %v3486_v30  ;;  %v1542_v28 = vsel %vm1541_vm4, %v3625_v56, %v1538_v26  ;;  %1928 = vmatpush.msra.mxu3 %v1852_v43  ;;  %v1839_v56 = vld [vmem:[#allocation5 + $0x218] sm:$0xff]  ;;  %v1830_v26 = vld [vmem:[#allocation5 + $0x1d0] sm:$0xff] }
 0xa9f   :  { %v1547_v35 = vsel %vm1544_vm5, %v1546_v33, %v1542_v28  ;;  %1906 = vmatpush.msra.mxu1 %v1848_v22  ;;  %v1835_v30 = vld [vmem:[#allocation5 + $0x1f8] sm:$0xff] }
 0xaa0   :  { %v1603_v21 = vmul.f32 %v1595_v46, %v1259_v15  ;;  %v1548_v50 = vmul.f32 %v1547_v35, %v1523_v23  ;;  %1929 = vmatpush.msra.mxu3 %v1849_v29  ;;  %v1837_v46 = vld [vmem:[#allocation5 + $0x208] sm:$0xff]  ;;  %v1831_v33 = vld [vmem:[#allocation5 + $0x1d8] sm:$0xff]  ;;  %v1826_v23 = vld [vmem:[#allocation5 + $0x1b0] sm:$0xff] }
 0xaa1   :  { %1907 = vmatpush.msra.mxu1 %v1845_v32  ;;  %v1827_v28 = vld [vmem:[#allocation5 + $0x1b8] sm:$0xff]  ;;  %v1828_v35 = vld [vmem:[#allocation5 + $0x1c0] sm:$0xff] }
 0xaa2   :  { %1690 = vmatmul.f32.gmra.mxu2 %v1603_v21  ;;  %v3488_v4 = vclamps-f32 %v1548_v50, 1.0  ;;  %1930 = vmatpush.msra.mxu3 %v1846_v37  ;;  %v1834_v21 = vld [vmem:[#allocation5 + $0x1f0] sm:$0xff]  ;;  %v1823_v50 = vld [vmem:[#allocation5 + $0x198] sm:$0xff] }
 0xaa3   :  { %1908 = vmatpush.msra.mxu1 %v1842_v39 }
 0xaa4   :  { %v1597_v62 = vadd.f32 1.0, %v3488_v4  ;;  %1931 = vmatpush.msra.mxu3 %v1843_v40  ;;  %v1824_v4 = vld [vmem:[#allocation5 + $0x1a0] sm:$0xff] }
 0xaa5   :  { %1909 = vmatpush.msra.mxu1 %v1839_v56  ;;  %v1873_v56 = vperm.slane %v1869_v20, 2 }
 0xaa6   :  { %v1605_v60 = vmul.f32 %v1597_v62, %v1261_v51  ;;  %1932 = vmatpush.msra.mxu3 %v1840_v58  ;;  %v1825_v51 = vld [vmem:[#allocation5 + $0x1a8] sm:$0xff]  ;;  %v1820_v62 = vld [vmem:[#allocation5 + $0x180] sm:$0xff] }
 0xaa7   :  { %1910 = vmatpush.msra.mxu1 %v1836_v36 }
 0xaa8   :  { %1736 = vmatmul.f32.gmra.mxu3 %v1605_v60  ;;  %v1821_v60 = vld [vmem:[#allocation5 + $0x188] sm:$0xff] }
 0xaa9   :  { %1933 = vmatpush.msra.mxu3 %v1837_v46  ;;  %1911 = vmatpush.msra.mxu1 %v1833_v3 }
 0xaab   :  { %1934 = vmatpush.msra.mxu3 %v1834_v21  ;;  %1912 = vmatpush.msra.mxu1 %v1830_v26 }
 0xaad   :  { %1935 = vmatpush.msra.mxu3 %v1831_v33  ;;  %1913 = vmatpush.msra.mxu1 %v1827_v28 }
 0xaaf   :  { %1936 = vmatpush.msra.mxu3 %v1828_v35  ;;  %1914 = vmatpush.msra.mxu1 %v1824_v4 }
 0xab1   :  { %1937 = vmatpush.msra.mxu3 %v1825_v51  ;;  %1915 = vmatpush.msra.mxu1 %v1821_v60 }
 0xaf1   :  { %v1770_v6 = vpop.xlane.xlu2 %1769 }
 0xaf2   :  { %v1773_v0 = vmul.f32 %v1770_v6, %v4082_v14  ;;  %v1822_v6 = vld [vmem:[#allocation5 + $0x190] sm:$0xff] }
 0xaf3   :  { %1938 = vmatpush.msra.mxu3 %v1822_v6 }
 0xaf4   :  { %v4593_v7 = vsub.f32 %v4550_v53, %v1773_v0 }
 0xaf6   :  { %v1777_v1 = vmul.f32 %v4593_v7, %v4593_v7 }
 0xaf8   :  { %1779 = vadd.xlane.f32.xlu1 %v1777_v1 }
 0xb19   :  { %v1714_v38 = vpop.f32.mrf.mxu1 }
 0xb1a   :  { %v1760_v18 = vpop.f32.mrf.mxu0 }
 0xb25   :  { %v1691_v16 = vpop.f32.mrf.mxu2 }
 0xb26   :  { %v1715_v53 = vadd.f32 %v1714_v38, %v1691_v16  ;;  %v3562_v38 = vld [vmem:[#allocation10 + $0x1] ss:$0 sm:$0xff] }
 0xb2b   :  { %v1737_v63 = vpop.f32.mrf.mxu3 }
 0xb2c   :  { %v1738_v13 = vadd.f32 %v1737_v63, %v1715_v53 }
 0xb2e   :  { %v1761_v19 = vadd.f32 %v1760_v18, %v1738_v13 }
 0xb30   :  { %v4598_v41 = vadd.f32 %v1761_v19, %v4486_v44  ;;  %v1850_v44 = vld [vmem:[#allocation5 + $0x270] sm:$0xff] }
 0xb31   :  { %1882 = vmatpush.msrb.mxu2 %v1850_v44 }
 0xb32   :  { %1771 = vadd.xlane.f32.xlu2 %v4598_v41 }
 0xb33   :  { %1883 = vmatpush.msrb.mxu2 %v1847_v34 }
 0xb35   :  { %1884 = vmatpush.msrb.mxu2 %v1844_v31 }
 0xb37   :  { %1885 = vmatpush.msrb.mxu2 %v1841_v9 }
 0xb39   :  { %1886 = vmatpush.msrb.mxu2 %v1838_v54 }
 0xb3b   :  { %1887 = vmatpush.msrb.mxu2 %v1835_v30 }
 0xb3d   :  { %1888 = vmatpush.msrb.mxu2 %v1832_v52 }
 0xb3f   :  { %1889 = vmatpush.msrb.mxu2 %v1829_v55 }
 0xb41   :  { %1890 = vmatpush.msrb.mxu2 %v1826_v23 }
 0xb43   :  { %1891 = vmatpush.msrb.mxu2 %v1823_v50 }
 0xb45   :  { %1892 = vmatpush.msrb.mxu2 %v1820_v62 }
 0xb6b   :  { %v1780_v15 = vpop.xlane.xlu1 %1779 }
 0xb6c   :  { %v1783_v47 = vmul.f32 %v1780_v15, %v4082_v14 }
 0xb6e   :  { %v1785_v59 = vadd.f32 1e-05, %v1783_v47 }
 0xb70   :  { %3626 = vrsqrt.f32 %v1785_v59  ;;  %vm1793_vm10 = vweird.f32 %v1785_v59 }
 0xb76   :  { %v3627_v0 = vpop.eup %3626 }
 0xb77   :  { %v1788_v1 = vmul.f32 %v3627_v0, %v1785_v59  ;;  %vm1794_vm6 = vweird.f32 %v3627_v0 }
 0xb78   :  { %vm1795_vm11 = vmor %vm1793_vm10, %vm1794_vm6 }
 0xb79   :  { %v1789_v11 = vmul.f32 %v3627_v0, %v1788_v1 }
 0xb7b   :  { %v1790_v8 = vmul.f32 0.5, %v1789_v11 }
 0xb7d   :  { %v1791_v48 = vsub.f32 1.5, %v1790_v8  ;;  %v1950_v8 = vld [vmem:[#allocation8 + $0x98] sm:$0xff] }
 0xb7f   :  { %v1792_v12 = vmul.f32 %v3627_v0, %v1791_v48  ;;  %v1949_v48 = vld [vmem:[#allocation8 + $0x90] sm:$0xff] }
 0xb81   :  { %v1796_v2 = vsel %vm1795_vm11, %v3627_v0, %v1792_v12 }
 0xb82   :  { %v1807_v16 = vmul.f32 %v1796_v2, %v4593_v7 }
 0xb84   :  { %v1812_v53 = vmul.f32 %v3561_v61, %v1807_v16 }
 0xb86   :  { %v4606_v63 = vadd.f32 %v3562_v38, %v1812_v53 }
 0xb88   :  { %1893 = vmatmul.f32.vlgmr.msrb.gmra.mxu2 %v4606_v63  ;;  %1916 = vmatmul.f32.vlgmr.msra.gmra.mxu1 %v4606_v63 }
 0xb89   :  { %1939 = vmatmul.f32.vlgmr.msra.gmra.mxu3 %v4606_v63 }
 0xba5   :  { %v1772_v13 = vpop.xlane.xlu2 %1771 }
 0xba6   :  { %v1774_v18 = vmul.f32 %v1772_v13, %v4082_v14 }
 0xba8   :  { %v1776_v19 = vsub.f32 %v4598_v41, %v1774_v18 }
 0xbaa   :  { %v1778_v42 = vmul.f32 %v1776_v19, %v1776_v19 }
 0xbac   :  { %1781 = vadd.xlane.f32.xlu1 %v1778_v42 }
 0xc05   :  { %v1917_v7 = vpop.f32.mrf.mxu1 }
 0xc06   :  { %v4613_v5 = vadd.f32 %v1917_v7, %v1872_v45 }
 0xc08   :  { %3491 = vmatpush.xpose.msk.msra.mxu0 %vm395_vm7, %v4613_v5 }
 0xc0b   :  { %v1894_v25 = vpop.f32.mrf.mxu2 }
 0xc0c   :  { %v4617_v27 = vadd.f32 %v1894_v25, %v1871_v24  ;;  %v1940_v58 = vpop.f32.mrf.mxu3 }
 0xc0d   :  { %v4634_v15 = vadd.f32 %v1940_v58, %v1873_v56 }
 0xc0e   :  { %3492 = vmatmul.msk.f32.vlgmr.msra.gmra.mxu0 %vm395_vm7, %v4617_v27 }
 0xc1f   :  { %v1782_v17 = vpop.xlane.xlu1 %1781 }
 0xc20   :  { %v1784_v41 = vmul.f32 %v1782_v17, %v4082_v14 }
 0xc22   :  { %v1786_v57 = vadd.f32 1e-05, %v1784_v41 }
 0xc24   :  { %3628 = vrsqrt.f32 %v1786_v57  ;;  %vm1803_vm13 = vweird.f32 %v1786_v57 }
 0xc2a   :  { %v3629_v44 = vpop.eup %3628 }
 0xc2b   :  { %v1798_v10 = vmul.f32 %v3629_v44, %v1786_v57  ;;  %vm1804_vm12 = vweird.f32 %v3629_v44 }
 0xc2c   :  { %vm1805_vm15 = vmor %vm1803_vm13, %vm1804_vm12 }
 0xc2d   :  { %v1799_v43 = vmul.f32 %v3629_v44, %v1798_v10 }
 0xc2f   :  { %v1800_v34 = vmul.f32 0.5, %v1799_v43 }
 0xc31   :  { %v1801_v22 = vsub.f32 1.5, %v1800_v34 }
 0xc33   :  { %v1802_v29 = vmul.f32 %v3629_v44, %v1801_v22 }
 0xc35   :  { %v1806_v31 = vsel %vm1805_vm15, %v3629_v44, %v1802_v29 }
 0xc36   :  { %v1808_v32 = vmul.f32 %v1806_v31, %v1776_v19 }
 0xc38   :  { %v1813_v37 = vmul.f32 %v3561_v61, %v1808_v32  ;;  %v1948_v61 = vld [vmem:[#allocation8 + $0x88] sm:$0xff] }
 0xc3a   :  { %v4622_v9 = vadd.f32 %v3562_v38, %v1813_v37  ;;  %v1947_v38 = vld [vmem:[#allocation8 + $0x80] sm:$0xff] }
 0xc3c   :  { %1896 = vmatmul.f32.gmra.mxu2 %v4622_v9  ;;  %1919 = vmatmul.f32.gmra.mxu1 %v4622_v9 }
 0xc3d   :  { %1942 = vmatmul.f32.gmra.mxu3 %v4622_v9 }
 0xc8b   :  { %v1986_v39 = vpop.f32.mrf.mxu0 }
 0xc8c   :  { %v2015_v40 = vsel %vm4133_vm8, %v1986_v39, -1e+09 }
 0xc8d   :  { %v2017_v54 = vsel %vm452_vm9, %v2015_v40, -inf }
 0xc8e   :  { %2018 = vmax.xlane.f32.xlu2 %v2017_v54 }
 0xca6   :  { %2087 = vrot.lane.b32.xlu2 %v4613_v5, %s3958_s17 }
 0xcb9   :  { %v1920_v30 = vpop.f32.mrf.mxu1 }
 0xcba   :  { %v4632_v36 = vadd.f32 %v1920_v30, %v1872_v45 }
 0xcbc   :  { %2115 = vrot.lane.b32.xlu0 %v4632_v36, %s3958_s17  ;;  %3493 = vmatpush.xpose.msk.msrb.mxu0 %vm395_vm7, %v4632_v36 }
 0xcbf   :  { %v1897_v46 = vpop.f32.mrf.mxu2 }
 0xcc0   :  { %2057 = vmatpush.msra.mxu0 %v4634_v15  ;;  %v4641_v47 = vadd.f32 %v1897_v46, %v1871_v24  ;;  %v1943_v52 = vpop.f32.mrf.mxu3 }
 0xcc1   :  { %v4643_v3 = vadd.f32 %v1943_v52, %v1873_v56 }
 0xcc2   :  { %2113 = vrot.lane.b32.xlu2 %v4641_v47, %s3958_s17  ;;  %3494 = vmatmul.msk.f32.vlgmr.msrb.gmra.mxu0 %vm395_vm7, %v4641_v47 }
 0xcc3   :  { %2080 = vmatpush.msra.mxu2 %v4643_v3 }
 0xd01   :  { %v2019_v21 = vpop.xlane.xlu2 %2018 }
 0xd02   :  { %v2023_v59 = vsub.f32 %v2015_v40, %v2019_v21 }
 0xd04   :  { %v2025_v55 = vmul.f32 1.442695, %v2023_v59 }
 0xd06   :  { %3630 = vpow2.f32 %v2025_v55 }
 0xd09   :  { %v2088_v26 = vpop.permute.xlu2 %2087 }
 0xd0a   :  { %3497 = vmatpush.xpose.msk.msrb.mxu0 %vm395_vm7, %v2088_v26  ;;  %v1954_v26 = vld [vmem:[#allocation8 + $0xb8] sm:$0xff] }
 0xd0c   :  { %v3631_v33 = vpop.eup %3630 }
 0xd0d   :  { %v2029_v23 = vsel %vm452_vm9, %v3631_v33, 0.0 }
 0xd0e   :  { %2030 = vadd.xlane.f32.xlu1 %v2029_v23  ;;  %v1952_v23 = vld [vmem:[#allocation8 + $0xa8] sm:$0xff] }
 0xd1c   :  { %v2114_v35 = vpop.permute.xlu2 %2113 }
 0xd27   :  { %2085 = vrot.lane.b32.xlu1 %v4617_v27, %s3958_s17 }
 0xd2e   :  { %v2116_v28 = vpop.permute.xlu0 %2115 }
 0xd2f   :  { %3499 = vmatpush.xpose.msk.msrb.mxu1 %vm395_vm7, %v2116_v28  ;;  %v1951_v28 = vld [vmem:[#allocation8 + $0xa0] sm:$0xff] }
 0xd32   :  { %3500 = vmatmul.msk.f32.vlgmr.msrb.gmra.mxu1 %vm395_vm7, %v2114_v35 }
 0xd33   :  { %2266 = vmatpush.msra.mxu1 %v1950_v8 }
 0xd35   :  { %2267 = vmatpush.msra.mxu1 %v1949_v48 }
 0xd37   :  { %2268 = vmatpush.msra.mxu1 %v1948_v61 }
 0xd39   :  { %2269 = vmatpush.msra.mxu1 %v1947_v38 }
 0xd3f   :  { %v2012_v50 = vpop.f32.mrf.mxu0 }
 0xd40   :  { %v2016_v4 = vsel %vm4133_vm8, %v2012_v50, -1e+09 }
 0xd41   :  { %v2020_v51 = vsel %vm452_vm9, %v2016_v4, -inf }
 0xd51   :  { %2021 = vmax.xlane.f32.xlu1 %v2020_v51 }
 0xd81   :  { %v2031_v62 = vpop.xlane.xlu1 %2030 }
 0xd82   :  { %3632 = vrcp.f32 %v2031_v62 }
 0xd88   :  { %v3633_v60 = vpop.eup %3632 }
 0xd89   :  { %v2037_v6 = vmul.f32 %v3633_v60, %v3631_v33  ;;  %v1953_v33 = vld [vmem:[#allocation8 + $0xb0] sm:$0xff] }
 0xd8b   :  { %3495 = vmatmul.msk.f32.vlgmr.msra.gmra.mxu0 %vm452_vm9, %v2037_v6 }
 0xd99   :  { %v2086_v0 = vpop.permute.xlu1 %2085 }
 0xd9a   :  { %3498 = vmatmul.msk.f32.vlgmr.msrb.gmra.mxu0 %vm395_vm7, %v2086_v0 }
 0xdaf   :  { %v2138_v53 = vpop.f32.mrf.mxu1 }
 0xdb0   :  { %v2142_v18 = vsel %vm4133_vm8, %v2138_v53, -1e+09 }
 0xdb1   :  { %v2146_v19 = vsel %vm452_vm9, %v2142_v18, -inf }
 0xdc4   :  { %v2022_v1 = vpop.xlane.xlu1 %2021 }
 0xdc5   :  { %v2024_v11 = vsub.f32 %v2016_v4, %v2022_v1 }
 0xdc7   :  { %v2027_v12 = vmul.f32 1.442695, %v2024_v11 }
 0xdc9   :  { %3634 = vpow2.f32 %v2027_v12 }
 0xdcf   :  { %v3635_v2 = vpop.eup %3634 }
 0xdd0   :  { %v2032_v16 = vsel %vm452_vm9, %v3635_v2, 0.0 }
 0xdd1   :  { %2033 = vadd.xlane.f32.xlu0 %v2032_v16 }
 0xde5   :  { %2279 = vrot.lane.b32.xlu0 %v4613_v5, %s3959_s18 }
 0xe08   :  { %v2059_v13 = vpop.f32.mrf.mxu0 }
 0xe09   :  { %3505 = vmatmul.msk.f32.vlgmr.msra.gmra.mxu1 %vm395_vm7, %v2059_v13 }
 0xe0f   :  { %2147 = vmax.xlane.f32.xlu0 %v2146_v19 }
 0xe17   :  { %v2110_v42 = vpop.f32.mrf.mxu0 }
 0xe18   :  { %v2141_v20 = vsel %vm4133_vm8, %v2110_v42, -1e+09  ;;  %v1958_v42 = vld [vmem:[#allocation8 + $0xd8] sm:$0xff] }
 0xe19   :  { %v2143_v45 = vsel %vm452_vm9, %v2141_v20, -inf  ;;  %2427 = vmatpush.msra.mxu0 %v1958_v42 }
 0xe1a   :  { %2144 = vmax.xlane.f32.xlu2 %v2143_v45 }
 0xe23   :  { %2307 = vrot.lane.b32.xlu0 %v4632_v36, %s3959_s18 }
 0xe2b   :  { %2442 = vrot.lane.b32.xlu0 %v4613_v5, %s3955_s24 }
 0xe32   :  { %2166 = vrot.lane.b32.xlu2 %v4634_v15, %s3958_s17 }
 0xe33   :  { %2470 = vrot.lane.b32.xlu0 %v4632_v36, %s3955_s24 }
 0xe44   :  { %v2034_v7 = vpop.xlane.xlu0 %2033 }
 0xe45   :  { %3636 = vrcp.f32 %v2034_v7 }
 0xe4b   :  { %v3637_v24 = vpop.eup %3636 }
 0xe4c   :  { %v2038_v25 = vmul.f32 %v3637_v24, %v3635_v2  ;;  %v1956_v24 = vld [vmem:[#allocation8 + $0xc8] sm:$0xff] }
 0xe4e   :  { %3496 = vmatmul.msk.f32.vlgmr.msra.gmra.mxu2 %vm452_vm9, %v2038_v25 }
 0xe57   :  { %v2280_v17 = vpop.permute.xlu0 %2279 }
 0xe82   :  { %v2148_v41 = vpop.xlane.xlu0 %2147 }
 0xe83   :  { %v2150_v57 = vsub.f32 %v2142_v18, %v2148_v41 }
 0xe85   :  { %v2153_v44 = vmul.f32 1.442695, %v2150_v57 }
 0xe86   :  { %v4722_v41 = vpop.f32.mrf.mxu1 }
 0xe87   :  { %3638 = vpow2.f32 %v2153_v44 }
 0xe8d   :  { %v3639_v10 = vpop.eup %3638  ;;  %v2145_v43 = vpop.xlane.xlu2 %2144 }
 0xe8e   :  { %v2149_v5 = vsub.f32 %v2141_v20, %v2145_v43  ;;  %v2158_v34 = vsel %vm452_vm9, %v3639_v10, 0.0  ;;  %v1957_v20 = vld [vmem:[#allocation8 + $0xd0] sm:$0xff] }
 0xe8f   :  { %2159 = vadd.xlane.f32.xlu2 %v2158_v34  ;;  %2428 = vmatpush.msra.mxu0 %v1957_v20  ;;  %v2727_v20 = vld [vmem:[#allocation13 + $0x3e0] sm:$0xff] }
 0xe90   :  { %v2151_v22 = vmul.f32 1.442695, %v2149_v5 }
 0xe91   :  { %2429 = vmatpush.msra.mxu0 %v1956_v24  ;;  %v2730_v24 = vld [vmem:[#allocation13 + $0x3f8] sm:$0xff] }
 0xe92   :  { %3640 = vpow2.f32 %v2151_v22 }
 0xe95   :  { %v2308_v29 = vpop.permute.xlu0 %2307  ;;  %v2167_v31 = vpop.permute.xlu2 %2166 }
 0xe96   :  { %2187 = vmatpush.msrb.mxu2 %v2167_v31 }
 0xe98   :  { %3507 = vmatpush.xpose.msk.msra.mxu2 %vm395_vm7, %v2280_v17  ;;  %v3641_v32 = vpop.eup %3640  ;;  %v1955_v17 = vld [vmem:[#allocation8 + $0xc0] sm:$0xff] }
 0xe99   :  { %v2155_v37 = vsel %vm452_vm9, %v3641_v32, 0.0  ;;  %2430 = vmatpush.msra.mxu0 %v1955_v17 }
 0xe9a   :  { %2156 = vadd.xlane.f32.xlu1 %v2155_v37 }
 0xe9b   :  { %2731 = vmatpush.msrb.mxu0 %v2727_v20  ;;  %v2675_v20 = vld [vmem:[#allocation13 + $0x240] sm:$0xff] }
 0xe9d   :  { %v2443_v39 = vpop.permute.xlu0 %2442 }
 0xe9e   :  { %3515 = vmatpush.xpose.msk.msrb.mxu1 %vm395_vm7, %v2443_v39 }
 0xea5   :  { %v2471_v21 = vpop.permute.xlu0 %2470 }
 0xea7   :  { %2305 = vrot.lane.b32.xlu2 %v4641_v47, %s3959_s18 }
 0xeaf   :  { %2357 = vrot.lane.b32.xlu2 %v4634_v15, %s3959_s18 }
 0xeb3   :  { %2277 = vrot.lane.b32.xlu1 %v4617_v27, %s3959_s18 }
 0xeb7   :  { %2468 = vrot.lane.b32.xlu2 %v4641_v47, %s3955_s24 }
 0xebb   :  { %2193 = vrot.lane.b32.xlu1 %v4643_v3, %s3958_s17 }
 0xed1   :  { %v2082_v40 = vpop.f32.mrf.mxu2 }
 0xed2   :  { %3506 = vmatmul.msk.f32.gmra.mxu1 %vm395_vm7, %v2082_v40 }
 0xf02   :  { %v2160_v54 = vpop.xlane.xlu2 %2159 }
 0xf0a   :  { %v2306_v56 = vpop.permute.xlu2 %2305 }
 0xf0d   :  { %v2157_v58 = vpop.xlane.xlu1 %2156 }
 0xf0e   :  { %3642 = vrcp.f32 %v2157_v58 }
 0xf0f   :  { %3644 = vrcp.f32 %v2160_v54 }
 0xf12   :  { %v2358_v46 = vpop.permute.xlu2 %2357 }
 0xf14   :  { %v3643_v30 = vpop.eup %3642 }
 0xf15   :  { %v2163_v36 = vmul.f32 %v3643_v30, %v3641_v32  ;;  %v3645_v47 = vpop.eup %3644 }
 0xf16   :  { %v2164_v59 = vmul.f32 %v3645_v47, %v3639_v10 }
 0xf17   :  { %3501 = vmatmul.msk.f32.vlgmr.msrb.gmra.mxu2 %vm452_vm9, %v2163_v36 }
 0xf18   :  { %2378 = vmatpush.msrb.mxu2 %v2358_v46 }
 0xf1a   :  { %v2469_v13 = vpop.permute.xlu2 %2468 }
 0xf25   :  { %v2278_v52 = vpop.permute.xlu1 %2277 }
 0xf26   :  { %3508 = vmatmul.msk.f32.vlgmr.msra.gmra.mxu2 %vm395_vm7, %v2278_v52 }
 0xf27   :  { %3517 = vmatpush.xpose.msk.msra.mxu2 %vm395_vm7, %v2471_v21 }
 0xf2d   :  { %v2194_v55 = vpop.permute.xlu1 %2193 }
 0xf2e   :  { %2214 = vmatpush.msrb.mxu3 %v2194_v55  ;;  %v1962_v55 = vld [vmem:[#allocation8 + $0xf8] sm:$0xff] }
 0xf2f   :  { %3502 = vmatmul.msk.f32.vlgmr.msrb.gmra.mxu3 %vm452_vm9, %v2164_v59 }
 0xf30   :  { %2237 = vmatpush.msra.mxu3 %v1954_v26  ;;  %v1961_v26 = vld [vmem:[#allocation8 + $0xf0] sm:$0xff] }
 0xf32   :  { %2238 = vmatpush.msra.mxu3 %v1953_v33  ;;  %v1960_v33 = vld [vmem:[#allocation8 + $0xe8] sm:$0xff] }
 0xf34   :  { %2239 = vmatpush.msra.mxu3 %v1952_v23 }
 0xf36   :  { %2240 = vmatpush.msra.mxu3 %v1951_v28 }
 0xf38   :  { %3509 = vmatpush.xpose.msk.msrb.mxu3 %vm395_vm7, %v2308_v29 }
 0xf4f   :  { %v4724_v44 = vpop.f32.mrf.mxu1 }
 0xf9a   :  { %v2189_v35 = vpop.f32.mrf.mxu2 }
 0xf9b   :  { %3503 = vmatmul.msk.f32.vlgmr.msra.gmra.mxu3 %vm395_vm7, %v2189_v35 }
 0xfa9   :  { %v2302_v50 = vpop.f32.mrf.mxu2 }
 0xfaa   :  { %v2333_v4 = vsel %vm4133_vm8, %v2302_v50, -1e+09 }
 0xfab   :  { %v2335_v51 = vsel %vm452_vm9, %v2333_v4, -inf }
 0xfac   :  { %2336 = vmax.xlane.f32.xlu1 %v2335_v51 }
 0xfb2   :  { %v2216_v62 = vpop.f32.mrf.mxu3 }
 0xfb3   :  { %3504 = vmatmul.msk.f32.gmra.mxu3 %vm395_vm7, %v2216_v62 }
 0xfbb   :  { %3510 = vmatmul.msk.f32.vlgmr.msrb.gmra.mxu3 %vm395_vm7, %v2306_v56 }
0x101e   :  { %v4707_v8 = vpop.f32.mrf.mxu3 }
0x101f   :  { %v2337_v60 = vpop.xlane.xlu1 %2336 }
0x1020   :  { %v2341_v6 = vsub.f32 %v2333_v4, %v2337_v60 }
0x1022   :  { %v2343_v0 = vmul.f32 1.442695, %v2341_v6 }
0x1024   :  { %3646 = vpow2.f32 %v2343_v0  ;;  %v2272_v0 = vadd.f32 %v4722_v41, %v4707_v8 }
0x102a   :  { %v3647_v1 = vpop.eup %3646 }
0x102b   :  { %v2347_v11 = vsel %vm452_vm9, %v3647_v1, 0.0 }
0x102c   :  { %2348 = vadd.xlane.f32.xlu1 %v2347_v11 }
0x1036   :  { %v4709_v48 = vpop.f32.mrf.mxu3 }
0x103e   :  { %v2330_v12 = vpop.f32.mrf.mxu3 }
0x103f   :  { %v2334_v61 = vsel %vm4133_vm8, %v2330_v12, -1e+09 }
0x1040   :  { %v2338_v2 = vsel %vm452_vm9, %v2334_v61, -inf }
0x1041   :  { %2339 = vmax.xlane.f32.xlu0 %v2338_v2 }
0x1045   :  { %2440 = vrot.lane.b32.xlu1 %v4617_v27, %s3955_s24 }
0x109f   :  { %v2349_v16 = vpop.xlane.xlu1 %2348 }
0x10a0   :  { %3648 = vrcp.f32 %v2349_v16 }
0x10a6   :  { %v3649_v38 = vpop.eup %3648 }
0x10a7   :  { %v2355_v53 = vmul.f32 %v3649_v38, %v3647_v1 }
0x10a9   :  { %3511 = vmatmul.msk.f32.vlgmr.msrb.gmra.mxu2 %vm452_vm9, %v2355_v53  ;;  %v2275_v53 = vadd.f32 %v4724_v44, %v4709_v48  ;;  %v2726_v48 = vld [vmem:[#allocation13 + $0x3d8] sm:$0xff] }
0x10aa   :  { %2590 = vmatpush.msrb.mxu2 %v1962_v55  ;;  %v2706_v55 = vld [vmem:[#allocation13 + $0x338] sm:$0xff] }
0x10ac   :  { %2591 = vmatpush.msrb.mxu2 %v1961_v26  ;;  %v2699_v26 = vld [vmem:[#allocation13 + $0x300] sm:$0xff] }
0x10ae   :  { %2592 = vmatpush.msrb.mxu2 %v1960_v33  ;;  %v2700_v33 = vld [vmem:[#allocation13 + $0x308] sm:$0xff] }
0x10b1   :  { %3518 = vmatmul.msk.f32.vlgmr.msra.gmra.mxu2 %vm395_vm7, %v2469_v13 }
0x10b4   :  { %v2340_v18 = vpop.xlane.xlu0 %2339 }
0x10b5   :  { %v2342_v19 = vsub.f32 %v2334_v61, %v2340_v18  ;;  %v3563_v61 = vld [vmem:[%s5119_s4 + $0x1] ss:$0 sm:$0xff] }
0x10b7   :  { %v2345_v45 = vmul.f32 1.442695, %v2342_v19  ;;  %v2441_v7 = vpop.permute.xlu1 %2440 }
0x10b8   :  { %3516 = vmatmul.msk.f32.vlgmr.msrb.gmra.mxu1 %vm395_vm7, %v2441_v7  ;;  %v2729_v7 = vld [vmem:[#allocation13 + $0x3f0] sm:$0xff] }
0x10b9   :  { %3650 = vpow2.f32 %v2345_v45  ;;  %v2728_v45 = vld [vmem:[#allocation13 + $0x3e8] sm:$0xff] }
0x10bf   :  { %v3651_v27 = vpop.eup %3650 }
0x10c0   :  { %v2350_v25 = vsel %vm452_vm9, %v3651_v27, 0.0 }
0x10c1   :  { %2351 = vadd.xlane.f32.xlu0 %v2350_v25  ;;  %v2725_v25 = vld [vmem:[#allocation13 + $0x3d0] sm:$0xff] }
0x10d5   :  { %2383 = vrot.lane.b32.xlu0 %v4643_v3, %s3959_s18 }
0x112c   :  { %v2380_v57 = vpop.f32.mrf.mxu2 }
0x112d   :  { %3513 = vmatmul.msk.f32.vlgmr.msra.gmra.mxu0 %vm395_vm7, %v2380_v57 }
0x1134   :  { %v2493_v10 = vpop.f32.mrf.mxu2  ;;  %v2352_v31 = vpop.xlane.xlu0 %2351 }
0x1135   :  { %v2497_v43 = vsel %vm4133_vm8, %v2493_v10, -1e+09  ;;  %v2465_v5 = vpop.f32.mrf.mxu1  ;;  %3652 = vrcp.f32 %v2352_v31  ;;  %v2722_v31 = vld [vmem:[#allocation13 + $0x3b8] sm:$0xff] }
0x1136   :  { %v2496_v34 = vsel %vm4133_vm8, %v2465_v5, -1e+09  ;;  %v2501_v22 = vsel %vm452_vm9, %v2497_v43, -inf }
0x1137   :  { %2502 = vmax.xlane.f32.xlu1 %v2501_v22  ;;  %v2498_v29 = vsel %vm452_vm9, %v2496_v34, -inf  ;;  %v2720_v22 = vld [vmem:[#allocation13 + $0x3a8] sm:$0xff] }
0x1138   :  { %2499 = vmax.xlane.f32.xlu2 %v2498_v29  ;;  %v2721_v29 = vld [vmem:[#allocation13 + $0x3b0] sm:$0xff] }
0x113b   :  { %v3653_v32 = vpop.eup %3652 }
0x113c   :  { %v2356_v37 = vmul.f32 %v3653_v32, %v3651_v27  ;;  %v2724_v27 = vld [vmem:[#allocation13 + $0x3c8] sm:$0xff]  ;;  %v2715_v32 = vld [vmem:[#allocation13 + $0x380] sm:$0xff] }
0x1147   :  { %v2384_v39 = vpop.permute.xlu0 %2383 }
0x1148   :  { %2404 = vmatpush.msra.mxu3 %v2384_v39  ;;  %v2717_v39 = vld [vmem:[#allocation13 + $0x390] sm:$0xff] }
0x1149   :  { %3512 = vmatmul.msk.f32.vlgmr.msra.gmra.mxu3 %vm452_vm9, %v2356_v37  ;;  %v2716_v37 = vld [vmem:[#allocation13 + $0x388] sm:$0xff] }
0x11aa   :  { %v2503_v40 = vpop.xlane.xlu1 %2502  ;;  %v2432_v6 = vpop.f32.mrf.mxu0 }
0x11ab   :  { %v2505_v54 = vsub.f32 %v2497_v43, %v2503_v40  ;;  %v2500_v56 = vpop.xlane.xlu2 %2499  ;;  %v2438_v1 = vadd.f32 %v2432_v6, %v2272_v0  ;;  %v2718_v40 = vld [vmem:[#allocation13 + $0x398] sm:$0xff] }
0x11ac   :  { %v2504_v58 = vsub.f32 %v2496_v34, %v2500_v56  ;;  %v2719_v34 = vld [vmem:[#allocation13 + $0x3a0] sm:$0xff]  ;;  %v2712_v56 = vld [vmem:[#allocation13 + $0x368] sm:$0xff]  ;;  %v2694_v6 = vld [vmem:[#allocation13 + $0x2d8] sm:$0xff] }
0x11ad   :  { %v2508_v49 = vmul.f32 1.442695, %v2505_v54  ;;  %v2711_v54 = vld [vmem:[#allocation13 + $0x360] sm:$0xff] }
0x11ae   :  { %v2506_v30 = vmul.f32 1.442695, %v2504_v58  ;;  %v2713_v58 = vld [vmem:[#allocation13 + $0x370] sm:$0xff] }
0x11af   :  { %3654 = vpow2.f32 %v2508_v49  ;;  %v2714_v49 = vld [vmem:[#allocation13 + $0x378] sm:$0xff] }
0x11b0   :  { %3656 = vpow2.f32 %v2506_v30  ;;  %v2707_v30 = vld [vmem:[#allocation13 + $0x340] sm:$0xff] }
0x11b5   :  { %v3655_v36 = vpop.eup %3654 }
0x11b6   :  { %v3657_v46 = vpop.eup %3656  ;;  %v2513_v52 = vsel %vm452_vm9, %v3655_v36, 0.0 }
0x11b7   :  { %2514 = vadd.xlane.f32.xlu1 %v2513_v52  ;;  %v2510_v21 = vsel %vm452_vm9, %v3657_v46, 0.0  ;;  %v2710_v52 = vld [vmem:[#allocation13 + $0x358] sm:$0xff] }
0x11b8   :  { %2511 = vadd.xlane.f32.xlu2 %v2510_v21  ;;  %v2703_v21 = vld [vmem:[#allocation13 + $0x320] sm:$0xff] }
0x11cc   :  { %v2406_v47 = vpop.f32.mrf.mxu3 }
0x11cd   :  { %3514 = vmatmul.msk.f32.gmra.mxu0 %vm395_vm7, %v2406_v47  ;;  %v2704_v47 = vld [vmem:[#allocation13 + $0x328] sm:$0xff] }
0x11d0   :  { %2546 = vrot.lane.b32.xlu1 %v4643_v3, %s3955_s24  ;;  %2520 = vrot.lane.b32.xlu2 %v4634_v15, %s3955_s24  ;;  %v1959_v15 = vld [vmem:[#allocation8 + $0xe0] sm:$0xff]  ;;  %s3433_s24 = sshll.u32 %s5129_s14, 4  ;;  %s3434_s24 = int_to_ptr.hbm [resolvable:$true] %s3433_s24 }
0x11d1   :  { %2593 = vmatpush.msrb.mxu2 %v1959_v15  ;;  %v2692_v15 = vld [vmem:[#allocation13 + $0x2c8] sm:$0xff] }
0x11d3   :  { %2800 = vmatpush.msra.mxu2 %v2730_v24  ;;  %v2678_v24 = vld [vmem:[#allocation13 + $0x258] sm:$0xff] }
0x11d5   :  { %2801 = vmatpush.msra.mxu2 %v2726_v48  ;;  %v2674_v48 = vld [vmem:[#allocation13 + $0x238] sm:$0xff] }
0x11d7   :  { %2802 = vmatpush.msra.mxu2 %v2722_v31 }
0x11d9   :  { %2803 = vmatpush.msra.mxu2 %v2718_v40 }
0x11db   :  { %2804 = vmatpush.msra.mxu2 %v2714_v49 }
0x11dd   :  { %2805 = vmatpush.msra.mxu2 %v2710_v52 }
0x11df   :  { %2806 = vmatpush.msra.mxu2 %v2706_v55 }
0x122a   :  { %v2515_v50 = vpop.xlane.xlu1 %2514 }
0x122b   :  { %v2512_v59 = vpop.xlane.xlu2 %2511 }
0x122c   :  { %3658 = vrcp.f32 %v2512_v59  ;;  %v2705_v59 = vld [vmem:[#allocation13 + $0x330] sm:$0xff] }
0x122d   :  { %3660 = vrcp.f32 %v2515_v50  ;;  %v2696_v50 = vld [vmem:[#allocation13 + $0x2e8] sm:$0xff] }
0x1232   :  { %v3659_v23 = vpop.eup %3658 }
0x1233   :  { %v2518_v28 = vmul.f32 %v3659_v23, %v3657_v46  ;;  %v2521_v35 = vpop.permute.xlu2 %2520  ;;  %v3661_v3 = vpop.eup %3660  ;;  %v2709_v46 = vld [vmem:[#allocation13 + $0x350] sm:$0xff] }
0x1234   :  { %2541 = vmatpush.msrb.mxu3 %v2521_v35  ;;  %v2519_v4 = vmul.f32 %v3661_v3, %v3655_v36  ;;  %v2708_v36 = vld [vmem:[#allocation13 + $0x348] sm:$0xff]  ;;  %v2701_v23 = vld [vmem:[#allocation13 + $0x310] sm:$0xff]  ;;  %v2695_v35 = vld [vmem:[#allocation13 + $0x2e0] sm:$0xff] }
0x1235   :  { %3519 = vmatmul.msk.f32.vlgmr.msrb.gmra.mxu3 %vm452_vm9, %v2518_v28  ;;  %v2702_v28 = vld [vmem:[#allocation13 + $0x318] sm:$0xff]  ;;  %v2697_v3 = vld [vmem:[#allocation13 + $0x2f0] sm:$0xff] }
0x1236   :  { %2754 = vmatpush.msra.mxu3 %v2728_v45  ;;  %2807 = vmatpush.msra.mxu2 %v2702_v28  ;;  %v2676_v45 = vld [vmem:[#allocation13 + $0x248] sm:$0xff] }
0x1238   :  { %2755 = vmatpush.msra.mxu3 %v2724_v27  ;;  %v2672_v27 = vld [vmem:[#allocation13 + $0x228] sm:$0xff] }
0x123a   :  { %2756 = vmatpush.msra.mxu3 %v2720_v22 }
0x123c   :  { %2757 = vmatpush.msra.mxu3 %v2716_v37 }
0x123e   :  { %2758 = vmatpush.msra.mxu3 %v2712_v56 }
0x1240   :  { %2759 = vmatpush.msra.mxu3 %v2708_v36  ;;  %v3565_v36 = vld [vmem:[#allocation11 + $0x1] ss:$0 sm:$0xff] }
0x1242   :  { %v2547_v51 = vpop.permute.xlu1 %2546  ;;  %2760 = vmatpush.msra.mxu3 %v2704_v47 }
0x1243   :  { %2567 = vmatpush.msra.mxu1 %v2547_v51  ;;  %v2691_v51 = vld [vmem:[#allocation13 + $0x2c0] sm:$0xff] }
0x1244   :  { %3520 = vmatmul.msk.f32.vlgmr.msra.gmra.mxu1 %vm452_vm9, %v2519_v4  ;;  %2761 = vmatpush.msra.mxu3 %v2700_v33  ;;  %v2698_v4 = vld [vmem:[#allocation13 + $0x2f8] sm:$0xff] }
0x1245   :  { %2777 = vmatpush.msrb.mxu1 %v2729_v7  ;;  %2808 = vmatpush.msra.mxu2 %v2698_v4  ;;  %v2677_v7 = vld [vmem:[#allocation13 + $0x250] sm:$0xff] }
0x1246   :  { %2762 = vmatpush.msra.mxu3 %v2696_v50 }
0x1247   :  { %2778 = vmatpush.msrb.mxu1 %v2725_v25  ;;  %2809 = vmatpush.msra.mxu2 %v2694_v6  ;;  %v2673_v25 = vld [vmem:[#allocation13 + $0x230] sm:$0xff] }
0x1248   :  { %2763 = vmatpush.msra.mxu3 %v2692_v15 }
0x1249   :  { %2779 = vmatpush.msrb.mxu1 %v2721_v29 }
0x124a   :  { %v2435_v16 = vpop.f32.mrf.mxu0 }
0x124b   :  { %v2439_v13 = vadd.f32 %v2435_v16, %v2275_v53  ;;  %2780 = vmatpush.msrb.mxu1 %v2717_v39  ;;  %v2684_v16 = vld [vmem:[#allocation13 + $0x288] sm:$0xff]  ;;  %v2685_v53 = vld [vmem:[#allocation13 + $0x290] sm:$0xff] }
0x124d   :  { %2781 = vmatpush.msrb.mxu1 %v2713_v58 }
0x124f   :  { %2782 = vmatpush.msrb.mxu1 %v2709_v46 }
0x1251   :  { %2783 = vmatpush.msrb.mxu1 %v2705_v59 }
0x1253   :  { %2784 = vmatpush.msrb.mxu1 %v2701_v23 }
0x1255   :  { %2785 = vmatpush.msrb.mxu1 %v2697_v3 }
0x12b8   :  { %v2543_v62 = vpop.f32.mrf.mxu3 }
0x12b9   :  { %3521 = vmatmul.msk.f32.vlgmr.msrb.gmra.mxu2 %vm395_vm7, %v2543_v62  ;;  %v2693_v62 = vld [vmem:[#allocation13 + $0x2d0] sm:$0xff] }
0x12ba   :  { %2786 = vmatpush.msrb.mxu1 %v2693_v62 }
0x12c1   :  { %v2569_v60 = vpop.f32.mrf.mxu1 }
0x12c2   :  { %3522 = vmatmul.msk.f32.gmra.mxu2 %vm395_vm7, %v2569_v60 }
0x133c   :  { %v2595_v11 = vpop.f32.mrf.mxu2 }
0x133d   :  { %v2601_v12 = vadd.f32 %v2595_v11, %v2438_v1  ;;  %v2687_v1 = vld [vmem:[#allocation13 + $0x2a0] sm:$0xff]  ;;  %v2688_v11 = vld [vmem:[#allocation13 + $0x2a8] sm:$0xff] }
0x133e   :  { %2764 = vmatpush.msra.mxu3 %v2688_v11 }
0x133f   :  { %v2603_v2 = vadd.f32 %v2601_v12, %v4606_v63  ;;  %v2723_v63 = vld [vmem:[#allocation13 + $0x3c0] sm:$0xff]  ;;  %v2689_v12 = vld [vmem:[#allocation13 + $0x2b0] sm:$0xff] }
0x1340   :  { %2732 = vmatpush.msrb.mxu0 %v2723_v63  ;;  %2787 = vmatpush.msrb.mxu1 %v2689_v12  ;;  %v2671_v63 = vld [vmem:[#allocation13 + $0x220] sm:$0xff] }
0x1341   :  { %v2610_v38 = vadd.f32 %v3563_v61, %v2603_v2  ;;  %v2683_v2 = vld [vmem:[#allocation13 + $0x280] sm:$0xff]  ;;  %2765 = vmatpush.msra.mxu3 %v2684_v16 }
0x1342   :  { %2733 = vmatpush.msrb.mxu0 %v2719_v34  ;;  %2788 = vmatpush.msrb.mxu1 %v2685_v53 }
0x1343   :  { %2616 = vadd.xlane.f32.xlu0 %v2610_v38 }
0x1344   :  { %2734 = vmatpush.msrb.mxu0 %v2715_v32 }
0x1345   :  { %v2598_v18 = vpop.f32.mrf.mxu2 }
0x1346   :  { %v2602_v19 = vadd.f32 %v2598_v18, %v2439_v13  ;;  %2735 = vmatpush.msrb.mxu0 %v2711_v54  ;;  %v2686_v13 = vld [vmem:[#allocation13 + $0x298] sm:$0xff]  ;;  %v2679_v18 = vld [vmem:[#allocation13 + $0x260] sm:$0xff] }
0x1347   :  { %v3564_v54 = vld [vmem:[%s5122_s7 + $0x1] ss:$0 sm:$0xff] }
0x1348   :  { %v2604_v8 = vadd.f32 %v2602_v19, %v4622_v9  ;;  %2736 = vmatpush.msrb.mxu0 %v2707_v30  ;;  %v2680_v19 = vld [vmem:[#allocation13 + $0x268] sm:$0xff] }
0x1349   :  { %2766 = vmatpush.msra.mxu3 %v2680_v19 }
0x134a   :  { %v2611_v42 = vadd.f32 %v3563_v61, %v2604_v8  ;;  %2737 = vmatpush.msrb.mxu0 %v2703_v21  ;;  %v2690_v61 = vld [vmem:[#allocation13 + $0x2b8] sm:$0xff]  ;;  %v2681_v8 = vld [vmem:[#allocation13 + $0x270] sm:$0xff] }
0x134b   :  { %2810 = vmatpush.msra.mxu2 %v2690_v61  ;;  %2789 = vmatpush.msrb.mxu1 %v2681_v8 }
0x134c   :  { %2618 = vadd.xlane.f32.xlu2 %v2611_v42  ;;  %2738 = vmatpush.msrb.mxu0 %v2699_v26 }
0x134d   :  { %2811 = vmatpush.msra.mxu2 %v2686_v13  ;;  %2767 = vmatpush.msra.mxu3 %v2676_v45 }
0x134e   :  { %2739 = vmatpush.msrb.mxu0 %v2695_v35  ;;  %2790 = vmatpush.msrb.mxu1 %v2677_v7 }
0x134f   :  { %2768 = vmatpush.msra.mxu3 %v2672_v27 }
0x1350   :  { %2740 = vmatpush.msrb.mxu0 %v2691_v51  ;;  %2791 = vmatpush.msrb.mxu1 %v2673_v25 }
0x1352   :  { %2741 = vmatpush.msrb.mxu0 %v2687_v1 }
0x1354   :  { %2742 = vmatpush.msrb.mxu0 %v2683_v2 }
0x1356   :  { %2743 = vmatpush.msrb.mxu0 %v2679_v18 }
0x1358   :  { %2744 = vmatpush.msrb.mxu0 %v2675_v20 }
0x135a   :  { %2745 = vmatpush.msrb.mxu0 %v2671_v63 }
0x13b6   :  { %v2617_v17 = vpop.xlane.xlu0 %2616 }
0x13b7   :  { %v2620_v9 = vmul.f32 %v2617_v17, %v4082_v14 }
0x13b9   :  { %v4755_v41 = vsub.f32 %v2610_v38, %v2620_v9  ;;  %v2667_v9 = vld [vmem:[#allocation13 + $0x200] sm:$0xff] }
0x13ba   :  { %2746 = vmatpush.msrb.mxu0 %v2667_v9 }
0x13bb   :  { %v2624_v57 = vmul.f32 %v4755_v41, %v4755_v41 }
0x13bd   :  { %2626 = vadd.xlane.f32.xlu1 %v2624_v57  ;;  %v2668_v57 = vld [vmem:[#allocation13 + $0x208] sm:$0xff] }
0x13be   :  { %2769 = vmatpush.msra.mxu3 %v2668_v57 }
0x13bf   :  { %v2619_v44 = vpop.xlane.xlu2 %2618 }
0x13c0   :  { %v2621_v10 = vmul.f32 %v2619_v44, %v4082_v14 }
0x13c2   :  { %v4760_v43 = vsub.f32 %v2611_v42, %v2621_v10  ;;  %v2682_v42 = vld [vmem:[#allocation13 + $0x278] sm:$0xff]  ;;  %v2669_v10 = vld [vmem:[#allocation13 + $0x210] sm:$0xff] }
0x13c3   :  { %2812 = vmatpush.msra.mxu2 %v2682_v42  ;;  %2792 = vmatpush.msrb.mxu1 %v2669_v10 }
0x13c4   :  { %v2625_v5 = vmul.f32 %v4760_v43, %v4760_v43 }
0x13c5   :  { %2813 = vmatpush.msra.mxu2 %v2678_v24 }
0x13c6   :  { %2628 = vadd.xlane.f32.xlu0 %v2625_v5  ;;  %v2670_v5 = vld [vmem:[#allocation13 + $0x218] sm:$0xff] }
0x13c7   :  { %2814 = vmatpush.msra.mxu2 %v2674_v48 }
0x13c9   :  { %2815 = vmatpush.msra.mxu2 %v2670_v5 }
0x1430   :  { %v2627_v60 = vpop.xlane.xlu1 %2626 }
0x1431   :  { %v2630_v0 = vmul.f32 %v2627_v60, %v4082_v14 }
0x1433   :  { %v2632_v38 = vadd.f32 1e-05, %v2630_v0 }
0x1435   :  { %3662 = vrsqrt.f32 %v2632_v38  ;;  %vm2640_vm8 = vweird.f32 %v2632_v38 }
0x1439   :  { %v2629_v17 = vpop.xlane.xlu0 %2628 }
0x143a   :  { %v2631_v44 = vmul.f32 %v2629_v17, %v4082_v14 }
0x143b   :  { %v3663_v34 = vpop.eup %3662 }
0x143c   :  { %v2635_v22 = vmul.f32 %v3663_v34, %v2632_v38  ;;  %v2633_v29 = vadd.f32 1e-05, %v2631_v44  ;;  %vm2641_vm7 = vweird.f32 %v3663_v34 }
0x143d   :  { %vm2642_vm9 = vmor %vm2640_vm8, %vm2641_vm7 }
0x143e   :  { %v2636_v31 = vmul.f32 %v3663_v34, %v2635_v22  ;;  %3664 = vrsqrt.f32 %v2633_v29  ;;  %vm2650_vm1 = vweird.f32 %v2633_v29 }
0x1440   :  { %v2637_v32 = vmul.f32 0.5, %v2636_v31 }
0x1442   :  { %v2638_v37 = vsub.f32 1.5, %v2637_v32 }
0x1444   :  { %v3665_v39 = vpop.eup %3664  ;;  %v2639_v40 = vmul.f32 %v3663_v34, %v2638_v37 }
0x1445   :  { %v2645_v56 = vmul.f32 %v3665_v39, %v2633_v29  ;;  %vm2651_vm0 = vweird.f32 %v3665_v39 }
0x1446   :  { %v2643_v58 = vsel %vm2642_vm9, %v3663_v34, %v2639_v40  ;;  %vm2652_vm2 = vmor %vm2650_vm1, %vm2651_vm0 }
0x1447   :  { %v2654_v49 = vmul.f32 %v2643_v58, %v4755_v41  ;;  %v2646_v30 = vmul.f32 %v3665_v39, %v2645_v56 }
0x1449   :  { %v2659_v46 = vmul.f32 %v3564_v54, %v2654_v49  ;;  %v2647_v52 = vmul.f32 0.5, %v2646_v30 }
0x144b   :  { %v2648_v21 = vsub.f32 1.5, %v2647_v52  ;;  %v4770_v47 = vadd.f32 %v3565_v36, %v2659_v46 }
0x144d   :  { %v2649_v59 = vmul.f32 %v3665_v39, %v2648_v21  ;;  %2747 = vmatmul.f32.vlgmr.msrb.gmra.mxu0 %v4770_v47  ;;  %2770 = vmatmul.f32.vlgmr.msra.gmra.mxu3 %v4770_v47 }
0x144e   :  { %2793 = vmatmul.f32.vlgmr.msrb.gmra.mxu1 %v4770_v47  ;;  %2816 = vmatmul.f32.vlgmr.msra.gmra.mxu2 %v4770_v47 }
0x144f   :  { %v2653_v41 = vsel %vm2652_vm2, %v3665_v39, %v2649_v59 }
0x1450   :  { %v2655_v55 = vmul.f32 %v2653_v41, %v4760_v43 }
0x1452   :  { %v2660_v26 = vmul.f32 %v3564_v54, %v2655_v55 }
0x1454   :  { %v4777_v33 = vadd.f32 %v3565_v36, %v2660_v26 }
0x1456   :  { %2750 = vmatmul.f32.gmra.mxu0 %v4777_v33  ;;  %2773 = vmatmul.f32.gmra.mxu3 %v4777_v33 }
0x1457   :  { %2796 = vmatmul.f32.gmra.mxu1 %v4777_v33  ;;  %2819 = vmatmul.f32.gmra.mxu2 %v4777_v33 }
0x14ca   :  { %v4783_v23 = vpop.f32.mrf.mxu0 }
0x14cb   :  { %v4786_v28 = vmul.f32 0.70710677, %v4783_v23  ;;  %v4788_v35 = vpop.f32.mrf.mxu1 }
0x14cc   :  { %v4791_v43 = vmul.f32 0.70710677, %v4788_v35 }
0x14cd   :  { %v2839_v50 = vmul.f32 %v4786_v28, %v4786_v28 }
0x14ce   :  { %v2919_v3 = vmul.f32 %v4791_v43, %v4791_v43 }
0x14cf   :  { %v4797_v4 = vmin.f32 %v2839_v50, 16.0  ;;  %v3191_v50 = vld [vmem:[#allocation14 + $0x278] sm:$0xff] }
0x14d0   :  { %v4799_v51 = vmin.f32 %v2919_v3, 16.0  ;;  %v4801_v15 = vpop.f32.mrf.mxu3  ;;  %v3223_v3 = vld [vmem:[#allocation14 + $0x378] sm:$0xff]  ;;  %3240 = vmatpush.msra.mxu0 %v3191_v50 }
0x14d1   :  { %v2841_v62 = vmul.f32 2.1237322e-06, %v4797_v4  ;;  %v2852_v60 = vmul.f32 3.8918573e-05, %v4797_v4  ;;  %v4805_v6 = vpop.f32.mrf.mxu2  ;;  %v4810_v11 = vmul.f32 0.70710677, %v4801_v15  ;;  %3286 = vmatpush.msra.mxu1 %v3223_v3 }
0x14d2   :  { %v2921_v0 = vmul.f32 2.1237322e-06, %v4799_v51  ;;  %v2932_v1 = vmul.f32 3.8918573e-05, %v4799_v51  ;;  %v4815_v53 = vmul.f32 0.70710677, %v4805_v6 }
0x14d3   :  { %v2842_v12 = vadd.f32 0.00028619796, %v2841_v62  ;;  %v2853_v61 = vadd.f32 0.001143296, %v2852_v60  ;;  %v2879_v38 = vmul.f32 %v4810_v11, %v4810_v11  ;;  %v4825_v24 = vpop.f32.mrf.mxu0  ;;  %v3205_v3 = vld [vmem:[#allocation14 + $0x2e8] sm:$0xff] }
0x14d4   :  { %v2922_v2 = vadd.f32 0.00028619796, %v2921_v0  ;;  %v2933_v16 = vadd.f32 0.001143296, %v2932_v1  ;;  %v2959_v20 = vmul.f32 %v4815_v53, %v4815_v53  ;;  %v4836_v34 = vmul.f32 0.70710677, %v4825_v24 }
0x14d5   :  { %v2843_v13 = vmul.f32 %v2842_v12, %v4797_v4  ;;  %v2854_v18 = vmul.f32 %v2853_v61, %v4797_v4  ;;  %v4821_v42 = vmin.f32 %v2879_v38, 16.0  ;;  %v3190_v12 = vld [vmem:[#allocation14 + $0x270] sm:$0xff] }
0x14d6   :  { %v2923_v19 = vmul.f32 %v2922_v2, %v4799_v51  ;;  %v2934_v8 = vmul.f32 %v2933_v16, %v4799_v51  ;;  %v4831_v57 = vmin.f32 %v2959_v20, 16.0  ;;  %v3222_v61 = vld [vmem:[#allocation14 + $0x370] sm:$0xff]  ;;  %3241 = vmatpush.msra.mxu0 %v3190_v12 }
0x14d7   :  { %v2844_v45 = vadd.f32 0.0036580483, %v2843_v13  ;;  %v2855_v7 = vadd.f32 0.014752088, %v2854_v18  ;;  %v2881_v25 = vmul.f32 2.1237322e-06, %v4821_v42  ;;  %3287 = vmatpush.msra.mxu1 %v3222_v61 }
0x14d8   :  { %v2924_v63 = vadd.f32 0.0036580483, %v2923_v19  ;;  %v2935_v27 = vadd.f32 0.014752088, %v2934_v8  ;;  %v2892_v9 = vmul.f32 3.8918573e-05, %v4821_v42  ;;  %v2999_v19 = vmul.f32 %v4836_v34, %v4836_v34 }
0x14d9   :  { %v2845_v48 = vmul.f32 %v2844_v45, %v4797_v4  ;;  %v2856_v17 = vmul.f32 %v2855_v7, %v4797_v4  ;;  %v2882_v5 = vadd.f32 0.00028619796, %v2881_v25  ;;  %v2961_v40 = vmul.f32 2.1237322e-06, %v4831_v57  ;;  %v3189_v8 = vld [vmem:[#allocation14 + $0x268] sm:$0xff]  ;;  %v3188_v25 = vld [vmem:[#allocation14 + $0x260] sm:$0xff] }
0x14da   :  { %v2925_v44 = vmul.f32 %v2924_v63, %v4799_v51  ;;  %v2936_v10 = vmul.f32 %v2935_v27, %v4799_v51  ;;  %v2893_v31 = vadd.f32 0.001143296, %v2892_v9  ;;  %v2972_v49 = vmul.f32 3.8918573e-05, %v4831_v57  ;;  %v3221_v63 = vld [vmem:[#allocation14 + $0x368] sm:$0xff]  ;;  %3242 = vmatpush.msra.mxu0 %v3189_v8  ;;  %v3236_v8 = vld [vmem:[#allocation14 + $0x3e0] sm:$0xff] }
0x14db   :  { %v2846_v22 = vadd.f32 0.05243302, %v2845_v48  ;;  %v2857_v29 = vadd.f32 0.112945676, %v2856_v17  ;;  %v2883_v39 = vmul.f32 %v2882_v5, %v4821_v42  ;;  %v2962_v52 = vadd.f32 0.00028619796, %v2961_v40  ;;  %3288 = vmatpush.msra.mxu1 %v3221_v63  ;;  %v4905_v63 = vpop.f32.mrf.mxu3 }
0x14dc   :  { %v2926_v32 = vadd.f32 0.05243302, %v2925_v44  ;;  %v2937_v37 = vadd.f32 0.112945676, %v2936_v10  ;;  %v2894_v58 = vmul.f32 %v2893_v31, %v4821_v42  ;;  %v2973_v1 = vadd.f32 0.001143296, %v2972_v49  ;;  %3243 = vmatpush.msra.mxu0 %v3188_v25 }
0x14dd   :  { %v2847_v54 = vmul.f32 %v2846_v22, %v4797_v4  ;;  %v2858_v56 = vmul.f32 %v2857_v29, %v4797_v4  ;;  %v2884_v46 = vadd.f32 0.0036580483, %v2883_v39  ;;  %v2963_v26 = vmul.f32 %v2962_v52, %v4831_v57  ;;  %v3207_v48 = vld [vmem:[#allocation14 + $0x2f8] sm:$0xff]  ;;  %v3220_v17 = vld [vmem:[#allocation14 + $0x360] sm:$0xff]  ;;  %v3206_v40 = vld [vmem:[#allocation14 + $0x2f0] sm:$0xff] }
0x14de   :  { %v2927_v30 = vmul.f32 %v2926_v32, %v4799_v51  ;;  %v2938_v36 = vmul.f32 %v2937_v37, %v4799_v51  ;;  %v2895_v41 = vadd.f32 0.014752088, %v2894_v58  ;;  %3263 = vmatpush.msrb.mxu3 %v3207_v48  ;;  %v3239_v10 = vld [vmem:[#allocation14 + $0x3f8] sm:$0xff]  ;;  %v4863_v5 = vmin.f32 %v2999_v19, 16.0  ;;  %3289 = vmatpush.msra.mxu1 %v3220_v17  ;;  %v3216_v48 = vld [vmem:[#allocation14 + $0x340] sm:$0xff] }
0x14df   :  { %v2848_v21 = vadd.f32 0.18741608, %v2847_v54  ;;  %v2859_v59 = vadd.f32 0.4994258, %v2858_v56  ;;  %v2885_v38 = vmul.f32 %v2884_v46, %v4821_v42  ;;  %v2964_v13 = vadd.f32 0.0036580483, %v2963_v26  ;;  %3309 = vmatpush.msrb.mxu2 %v3239_v10 }
0x14e0   :  { %v2939_v55 = vadd.f32 0.4994258, %v2938_v36  ;;  %v2928_v60 = vadd.f32 0.18741608, %v2927_v30  ;;  %v2896_v0 = vmul.f32 %v2895_v41, %v4821_v42  ;;  %v4867_v32 = vmul.f32 0.5, %v4783_v23  ;;  %v3219_v54 = vld [vmem:[#allocation14 + $0x358] sm:$0xff]  ;;  %v4877_v36 = vpop.f32.mrf.mxu1  ;;  %3264 = vmatpush.msrb.mxu3 %v3206_v40 }
0x14e1   :  { %v2860_v62 = vmul.f32 %v2859_v59, %v4797_v4  ;;  %v2849_v2 = vmul.f32 %v2848_v21, %v4797_v4  ;;  %v2965_v7 = vmul.f32 %v2964_v13, %v4831_v57  ;;  %v2974_v4 = vmul.f32 %v2973_v1, %v4831_v57  ;;  %3290 = vmatpush.msra.mxu1 %v3219_v54  ;;  %v3238_v23 = vld [vmem:[#allocation14 + $0x3f0] sm:$0xff]  ;;  %v3203_v25 = vld [vmem:[#allocation14 + $0x2d8] sm:$0xff] }
0x14e2   :  { %v2940_v16 = vmul.f32 %v2939_v55, %v4799_v51  ;;  %v2897_v45 = vadd.f32 0.112945676, %v2896_v0  ;;  %v2929_v27 = vmul.f32 %v2928_v60, %v4799_v51  ;;  %v2886_v44 = vadd.f32 0.05243302, %v2885_v38  ;;  %v3187_v51 = vld [vmem:[#allocation14 + $0x258] sm:$0xff]  ;;  %v3186_v46 = vld [vmem:[#allocation14 + $0x250] sm:$0xff]  ;;  %3310 = vmatpush.msrb.mxu2 %v3238_v23  ;;  %3265 = vmatpush.msrb.mxu3 %v3205_v3 }
0x14e3   :  { %v4852_v18 = vadd.f32 1.0, %v2860_v62  ;;  %v2850_v9 = vadd.f32 1.1283791, %v2849_v2  ;;  %v2966_v29 = vadd.f32 0.05243302, %v2965_v7  ;;  %v4870_v37 = vmul.f32 0.5, %v4788_v35  ;;  %3244 = vmatpush.msra.mxu0 %v3187_v51 }
0x14e4   :  { %v4856_v20 = vadd.f32 1.0, %v2940_v16  ;;  %v2898_v22 = vmul.f32 %v2897_v45, %v4821_v42  ;;  %v2975_v31 = vadd.f32 0.014752088, %v2974_v4  ;;  %v2930_v39 = vadd.f32 1.1283791, %v2929_v27  ;;  %v3218_v62 = vld [vmem:[#allocation14 + $0x350] sm:$0xff] }
0x14e5   :  { %3666 = vrcp.f32 %v4852_v18  ;;  %v4873_v56 = vmul.f32 %v2850_v9, %v4786_v28  ;;  %v2887_v58 = vmul.f32 %v2886_v44, %v4821_v42  ;;  %vm2867_vm14 = vweird.f32 %v4852_v18  ;;  %3245 = vmatpush.msra.mxu0 %v3186_v46  ;;  %v3237_v60 = vld [vmem:[#allocation14 + $0x3e8] sm:$0xff]  ;;  %3291 = vmatpush.msra.mxu1 %v3218_v62  ;;  %v3204_v16 = vld [vmem:[#allocation14 + $0x2e0] sm:$0xff]  ;;  %v3235_v10 = vld [vmem:[#allocation14 + $0x3d8] sm:$0xff] }
0x14e6   :  { %3668 = vrcp.f32 %v4856_v20  ;;  %v2899_v49 = vadd.f32 0.4994258, %v2898_v22  ;;  %v2976_v30 = vmul.f32 %v2975_v31, %v4831_v57  ;;  %v2871_v52 = vand.u32 2147483647, %v4852_v18  ;;  %v3185_v2 = vld [vmem:[#allocation14 + $0x248] sm:$0xff]  ;;  %3311 = vmatpush.msrb.mxu2 %v3237_v60  ;;  %3266 = vmatpush.msrb.mxu3 %v3204_v16  ;;  %v3184_v27 = vld [vmem:[#allocation14 + $0x240] sm:$0xff] }
0x14e7   :  { %v2873_v28 = vand.u32 2147483648, %v4852_v18  ;;  %v3001_v21 = vmul.f32 2.1237322e-06, %v4863_v5  ;;  %v2951_v55 = vand.u32 2147483647, %v4856_v20  ;;  %v2967_v50 = vmul.f32 %v2966_v29, %v4831_v57  ;;  %3246 = vmatpush.msra.mxu0 %v3185_v2  ;;  %v3183_v22 = vld [vmem:[#allocation14 + $0x238] sm:$0xff] }
0x14e8   :  { %v2900_v26 = vmul.f32 %v2899_v49, %v4821_v42  ;;  %v4893_v0 = vmul.f32 %v2930_v39, %v4791_v43  ;;  %v2977_v12 = vadd.f32 0.112945676, %v2976_v30  ;;  %v4898_v61 = vmul.f32 0.70710677, %v4877_v36  ;;  %v3217_v43 = vld [vmem:[#allocation14 + $0x348] sm:$0xff]  ;;  %3312 = vmatpush.msrb.mxu2 %v3236_v8  ;;  %v3202_v29 = vld [vmem:[#allocation14 + $0x2d0] sm:$0xff]  ;;  %3267 = vmatpush.msrb.mxu3 %v3203_v25 }
0x14e9   :  { %v2888_v13 = vadd.f32 0.18741608, %v2887_v58  ;;  %v3002_v4 = vadd.f32 0.00028619796, %v3001_v21  ;;  %3292 = vmatpush.msra.mxu1 %v3217_v43  ;;  %v2953_v9 = vand.u32 2147483648, %v4856_v20  ;;  %3247 = vmatpush.msra.mxu0 %v3184_v27  ;;  %vm2947_vm6 = vweird.f32 %v4856_v20  ;;  %v3215_v54 = vld [vmem:[#allocation14 + $0x338] sm:$0xff]  ;;  %v4959_v43 = vpop.f32.mrf.mxu2 }
0x14ea   :  { %v4901_v19 = vadd.f32 1.0, %v2900_v26  ;;  %v2978_v7 = vmul.f32 %v2977_v12, %v4831_v57  ;;  %v2968_v44 = vadd.f32 0.18741608, %v2967_v50  ;;  %v3079_v40 = vmul.f32 %v4898_v61, %v4898_v61  ;;  %3313 = vmatpush.msrb.mxu2 %v3235_v10  ;;  %v3234_v46 = vld [vmem:[#allocation14 + $0x3d0] sm:$0xff]  ;;  %3268 = vmatpush.msrb.mxu3 %v3202_v29  ;;  %v3233_v62 = vld [vmem:[#allocation14 + $0x3c8] sm:$0xff]  ;;  %v3200_v12 = vld [vmem:[#allocation14 + $0x2c0] sm:$0xff] }
0x14eb   :  { %v4879_v35 = vpop.eup %3666  ;;  %3293 = vmatpush.msra.mxu1 %v3216_v48  ;;  %vm4923_vm10 = vcmp.eq.f32.partialorder %v2871_v52, 8.507059e+37  ;;  %v4935_v23 = vmul.f32 0.70710677, %v4905_v63  ;;  %3248 = vmatpush.msra.mxu0 %v3183_v22  ;;  %v3182_v21 = vld [vmem:[#allocation14 + $0x230] sm:$0xff]  ;;  %v2874_v52 = vor.u32 1.1754944e-38, %v2873_v28  ;;  %vm4940_vm12 = vcmp.eq.f32.partialorder %v2951_v55, 8.507059e+37 }
0x14ec   :  { %v4885_v59 = vpop.eup %3668  ;;  %v2863_v41 = vmul.f32 %v4879_v35, %v4852_v18  ;;  %vm2868_vm3 = vweird.f32 %v4879_v35  ;;  %3670 = vrcp.f32 %v4901_v19  ;;  %v2979_v39 = vadd.f32 0.4994258, %v2978_v7  ;;  %v3214_v3 = vld [vmem:[#allocation14 + $0x330] sm:$0xff]  ;;  %3314 = vmatpush.msrb.mxu2 %v3234_v46  ;;  %v3181_v55 = vld [vmem:[#allocation14 + $0x228] sm:$0xff]  ;;  %v3180_v8 = vld [vmem:[#allocation14 + $0x220] sm:$0xff] }
0x14ed   :  { %v2943_v1 = vmul.f32 %v4885_v59, %v4856_v20  ;;  %vm2948_vm4 = vweird.f32 %v4885_v59  ;;  %vm4914_vm5 = vmor %vm2867_vm14, %vm2868_vm3  ;;  %v2889_v20 = vmul.f32 %v2888_v13, %v4821_v42  ;;  %3294 = vmatpush.msra.mxu1 %v3215_v54  ;;  %v3201_v42 = vld [vmem:[#allocation14 + $0x2c8] sm:$0xff]  ;;  %v2969_v18 = vmul.f32 %v2968_v44, %v4831_v57  ;;  %3249 = vmatpush.msra.mxu0 %v3182_v21  ;;  %v3199_v25 = vld [vmem:[#allocation14 + $0x2b8] sm:$0xff] }
0x14ee   :  { %v2864_v38 = vsub.f32 1.0, %v2863_v41  ;;  %vm4929_vm11 = vmor %vm2947_vm6, %vm2948_vm4  ;;  %v2980_v50 = vmul.f32 %v2979_v39, %v4831_v57  ;;  %v3003_v28 = vmul.f32 %v3002_v4, %v4863_v5  ;;  %v3213_v2 = vld [vmem:[#allocation14 + $0x328] sm:$0xff]  ;;  %3269 = vmatpush.msrb.mxu3 %v3201_v42  ;;  %v3232_v57 = vld [vmem:[#allocation14 + $0x3c0] sm:$0xff]  ;;  %3315 = vmatpush.msrb.mxu2 %v3233_v62  ;;  %v2911_v44 = vand.u32 2147483647, %v4901_v19 }
0x14ef   :  { %v2944_v45 = vsub.f32 1.0, %v2943_v1  ;;  %v2954_v1 = vor.u32 1.1754944e-38, %v2953_v9  ;;  %3295 = vmatpush.msra.mxu1 %v3214_v3  ;;  %v2890_v27 = vadd.f32 1.1283791, %v2889_v20  ;;  %3250 = vmatpush.msra.mxu0 %v3181_v55  ;;  %v3212_v48 = vld [vmem:[#allocation14 + $0x320] sm:$0xff]  ;;  %v3179_v10 = vld [vmem:[#allocation14 + $0x218] sm:$0xff]  ;;  %vm2907_vm15 = vweird.f32 %v4901_v19 }
0x14f0   :  { %v2865_v17 = vmul.f32 %v4879_v35, %v2864_v38  ;;  %v4955_v13 = vadd.f32 1.0, %v2980_v50  ;;  %3270 = vmatpush.msrb.mxu3 %v3200_v12  ;;  %v2913_v29 = vand.u32 2147483648, %v4901_v19  ;;  %v4975_v31 = vmul.f32 0.70710677, %v4959_v43  ;;  %3316 = vmatpush.msrb.mxu2 %v3232_v57  ;;  %v3178_v49 = vld [vmem:[#allocation14 + $0x210] sm:$0xff]  ;;  %v3197_v21 = vld [vmem:[#allocation14 + $0x2a8] sm:$0xff] }
0x14f1   :  { %v2945_v51 = vmul.f32 %v4885_v59, %v2944_v45  ;;  %3296 = vmatpush.msra.mxu1 %v3213_v2  ;;  %3251 = vmatpush.msra.mxu0 %v3180_v8  ;;  %v4978_v30 = vadd.f32 1.1283791, %v2969_v18  ;;  %v4980_v20 = vadd.f32 0.0036580483, %v3003_v28  ;;  %v3210_v50 = vld [vmem:[#allocation14 + $0x310] sm:$0xff]  ;;  %v3229_v42 = vld [vmem:[#allocation14 + $0x3a8] sm:$0xff]  ;;  %v2891_v8 = vmul.f32 %v2890_v27, %v4810_v11 }
0x14f2   :  { %v2866_v58 = vadd.f32 %v4879_v35, %v2865_v17  ;;  %v4961_v45 = vpop.eup %3670  ;;  %3672 = vrcp.f32 %v4955_v13  ;;  %3271 = vmatpush.msrb.mxu3 %v3199_v25  ;;  %v3196_v18 = vld [vmem:[#allocation14 + $0x2a0] sm:$0xff]  ;;  %vm4994_vm7 = vcmp.eq.f32.partialorder %v2911_v44, 8.507059e+37  ;;  %v2914_v2 = vor.u32 1.1754944e-38, %v2913_v29 }
0x14f3   :  { %v2946_v41 = vadd.f32 %v4885_v59, %v2945_v51  ;;  %v2903_v9 = vmul.f32 %v4961_v45, %v4901_v19  ;;  %v3211_v51 = vld [vmem:[#allocation14 + $0x318] sm:$0xff]  ;;  %3297 = vmatpush.msra.mxu1 %v3212_v48  ;;  %3252 = vmatpush.msra.mxu0 %v3179_v10  ;;  %vm2908_vm13 = vweird.f32 %v4961_v45  ;;  %v3228_v57 = vld [vmem:[#allocation14 + $0x3a0] sm:$0xff]  ;;  %vm2987_vm0 = vweird.f32 %v4955_v13 }
0x14f4   :  { %v2870_v60 = vsel %vm4914_vm5, %v4879_v35, %v2866_v58  ;;  %v4957_v35 = vmin.f32 %v3079_v40, 16.0  ;;  %v3230_v58 = vld [vmem:[#allocation14 + $0x3b0] sm:$0xff]  ;;  %vm5005_vm8 = vmor %vm2907_vm15, %vm2908_vm13  ;;  %v3176_v48 = vld [vmem:[#allocation14 + $0x200] sm:$0xff] }
0x14f5   :  { %v2875_v16 = vsel %vm4923_vm10, %v2874_v52, %v2870_v60  ;;  %v2950_v38 = vsel %vm4929_vm11, %v4885_v59, %v2946_v41  ;;  %v3039_v59 = vmul.f32 %v4935_v23, %v4935_v23  ;;  %v2904_v40 = vsub.f32 1.0, %v2903_v9  ;;  %3298 = vmatpush.msra.mxu1 %v3211_v51  ;;  %3253 = vmatpush.msra.mxu0 %v3178_v49  ;;  %v3208_v44 = vld [vmem:[#allocation14 + $0x300] sm:$0xff]  ;;  %v3194_v51 = vld [vmem:[#allocation14 + $0x290] sm:$0xff] }
0x14f6   :  { %v2876_v7 = vmul.f32 %v2875_v16, %v4873_v56  ;;  %v2955_v4 = vsel %vm4940_vm12, %v2954_v1, %v2950_v38  ;;  %v3231_v56 = vld [vmem:[#allocation14 + $0x3b8] sm:$0xff]  ;;  %v3081_v54 = vmul.f32 2.1237322e-06, %v4957_v35  ;;  %v3119_v60 = vmul.f32 %v4975_v31, %v4975_v31  ;;  %v3177_v1 = vld [vmem:[#allocation14 + $0x208] sm:$0xff] }
0x14f7   :  { %v2956_v17 = vmul.f32 %v2955_v4, %v4893_v0  ;;  %v3198_v0 = vld [vmem:[#allocation14 + $0x2b0] sm:$0xff]  ;;  %v4982_v46 = vmin.f32 %v3039_v59, 16.0  ;;  %3317 = vmatpush.msrb.mxu2 %v3231_v56  ;;  %v2905_v26 = vmul.f32 %v4961_v45, %v2904_v40  ;;  %v3209_v38 = vld [vmem:[#allocation14 + $0x308] sm:$0xff]  ;;  %3299 = vmatpush.msra.mxu1 %v3210_v50  ;;  %v3227_v56 = vld [vmem:[#allocation14 + $0x398] sm:$0xff]  ;;  %v2824_v49 = vmul.f32 0.5, %v4801_v15 }
0x14f8   :  { %v3525_v22 = vclamps-f32 %v2876_v7, 1.0  ;;  %3272 = vmatpush.msrb.mxu3 %v3198_v0  ;;  %v4991_v28 = vpop.eup %3672  ;;  %v4998_v16 = vadd.f32 0.00028619796, %v3081_v54  ;;  %v5016_v27 = vmin.f32 %v3119_v60, 16.0  ;;  %3254 = vmatpush.msra.mxu0 %v3177_v1  ;;  %v2991_v0 = vand.u32 2147483647, %v4955_v13 }
0x14f9   :  { %v3527_v39 = vclamps-f32 %v2956_v17, 1.0  ;;  %v3041_v3 = vmul.f32 2.1237322e-06, %v4982_v46  ;;  %v3052_v62 = vmul.f32 3.8918573e-05, %v4982_v46  ;;  %3318 = vmatpush.msrb.mxu2 %v3230_v58  ;;  %v2906_v55 = vadd.f32 %v4961_v45, %v2905_v26  ;;  %v3195_v17 = vld [vmem:[#allocation14 + $0x298] sm:$0xff]  ;;  %3300 = vmatpush.msra.mxu1 %v3209_v38 }
0x14fa   :  { %v3159_v52 = vadd.f32 1.0, %v3525_v22  ;;  %3273 = vmatpush.msrb.mxu3 %v3197_v21  ;;  %v2983_v4 = vmul.f32 %v4991_v28, %v4955_v13  ;;  %3255 = vmatpush.msra.mxu0 %v3176_v48  ;;  %vm2988_vm9 = vweird.f32 %v4991_v28  ;;  %v3012_v58 = vmul.f32 3.8918573e-05, %v4863_v5  ;;  %v3225_v26 = vld [vmem:[#allocation14 + $0x388] sm:$0xff]  ;;  %v3192_v1 = vld [vmem:[#allocation14 + $0x280] sm:$0xff] }
0x14fb   :  { %v3161_v41 = vadd.f32 1.0, %v3527_v39  ;;  %v3042_v59 = vadd.f32 0.00028619796, %v3041_v3  ;;  %v3053_v25 = vadd.f32 0.001143296, %v3052_v62  ;;  %3319 = vmatpush.msrb.mxu2 %v3229_v42  ;;  %v2910_v19 = vsel %vm5005_vm8, %v4961_v45, %v2906_v55  ;;  %v3226_v39 = vld [vmem:[#allocation14 + $0x390] sm:$0xff]  ;;  %3301 = vmatpush.msra.mxu1 %v3208_v44  ;;  %vm2989_vm1 = vmor %vm2987_vm0, %vm2988_vm9 }
0x14fc   :  { %v3167_v9 = vmul.f32 %v3159_v52, %v4867_v32  ;;  %3274 = vmatpush.msrb.mxu3 %v3196_v18  ;;  %v2915_v10 = vsel %vm4994_vm7, %v2914_v2, %v2910_v19  ;;  %v2984_v22 = vsub.f32 1.0, %v2983_v4  ;;  %v2993_v45 = vand.u32 2147483648, %v4955_v13  ;;  %v3224_v18 = vld [vmem:[#allocation14 + $0x380] sm:$0xff] }
0x14fd   :  { %v3169_v11 = vmul.f32 %v3161_v41, %v4870_v37  ;;  %v3043_v29 = vmul.f32 %v3042_v59, %v4982_v46  ;;  %v3054_v32 = vmul.f32 %v3053_v25, %v4982_v46  ;;  %3320 = vmatpush.msrb.mxu2 %v3228_v57  ;;  %v2916_v37 = vmul.f32 %v2915_v10, %v2891_v8  ;;  %v3193_v41 = vld [vmem:[#allocation14 + $0x288] sm:$0xff] }
0x14fe   :  { %3275 = vmatpush.msrb.mxu3 %v3195_v17  ;;  %v2985_v40 = vmul.f32 %v4991_v28, %v2984_v22  ;;  %3256 = vmatmul.f32.vlgmr.msra.gmra.mxu0 %v3167_v9  ;;  %v3121_v3 = vmul.f32 2.1237322e-06, %v5016_v27  ;;  %v3013_v62 = vadd.f32 0.001143296, %v3012_v58  ;;  %v2971_v15 = vmul.f32 %v4978_v30, %v4815_v53 }
0x14ff   :  { %v3055_v54 = vadd.f32 0.014752088, %v3054_v32  ;;  %3321 = vmatpush.msrb.mxu2 %v3227_v56  ;;  %v3526_v21 = vclamps-f32 %v2916_v37, 1.0  ;;  %v3044_v52 = vadd.f32 0.0036580483, %v3043_v29  ;;  %3302 = vmatmul.f32.vlgmr.msra.gmra.mxu1 %v3169_v11  ;;  %v2994_v13 = vor.u32 1.1754944e-38, %v2993_v45 }
0x1500   :  { %v2986_v50 = vadd.f32 %v4991_v28, %v2985_v40  ;;  %3276 = vmatpush.msrb.mxu3 %v3194_v51  ;;  %v3092_v55 = vmul.f32 3.8918573e-05, %v4957_v35  ;;  %vm2992_vm2 = vcmp.eq.f32.partialorder %v2991_v0, 8.507059e+37  ;;  %v3014_v38 = vmul.f32 %v3013_v62, %v4863_v5 }
0x1501   :  { %v3056_v42 = vmul.f32 %v3055_v54, %v4982_v46  ;;  %3322 = vmatpush.msrb.mxu2 %v3226_v39  ;;  %v3160_v60 = vadd.f32 1.0, %v3526_v21  ;;  %v3083_v53 = vmul.f32 %v4998_v16, %v4957_v35  ;;  %v3045_v30 = vmul.f32 %v3044_v52, %v4982_v46 }
0x1502   :  { %v2990_v12 = vsel %vm2989_vm1, %v4991_v28, %v2986_v50  ;;  %3277 = vmatpush.msrb.mxu3 %v3193_v41  ;;  %v3122_v59 = vadd.f32 0.00028619796, %v3121_v3  ;;  %v3015_v28 = vadd.f32 0.014752088, %v3014_v38  ;;  %v2826_v25 = vmul.f32 0.5, %v4805_v6 }
0x1503   :  { %v3057_v2 = vadd.f32 0.112945676, %v3056_v42  ;;  %3323 = vmatpush.msrb.mxu2 %v3225_v26  ;;  %v3168_v57 = vmul.f32 %v3160_v60, %v2824_v49  ;;  %v2995_v8 = vsel %vm2992_vm2, %v2994_v13, %v2990_v12  ;;  %v3093_v48 = vadd.f32 0.001143296, %v3092_v55 }
0x1504   :  { %v2996_v7 = vmul.f32 %v2995_v8, %v2971_v15  ;;  %3278 = vmatpush.msrb.mxu3 %v3192_v1  ;;  %v3132_v17 = vmul.f32 3.8918573e-05, %v5016_v27  ;;  %v3005_v11 = vmul.f32 %v4980_v20, %v4863_v5  ;;  %v3016_v19 = vmul.f32 %v3015_v28, %v4863_v5 }
0x1505   :  { %v3058_v4 = vmul.f32 %v3057_v2, %v4982_v46  ;;  %3324 = vmatpush.msrb.mxu2 %v3224_v18  ;;  %3279 = vmatmul.f32.vlgmr.msrb.gmra.mxu3 %v3168_v57  ;;  %v3084_v44 = vadd.f32 0.0036580483, %v3083_v53  ;;  %v3046_v56 = vadd.f32 0.05243302, %v3045_v30  ;;  %v3094_v10 = vmul.f32 %v3093_v48, %v4957_v35 }
0x1506   :  { %v3528_v9 = vclamps-f32 %v2996_v7, 1.0  ;;  %v3133_v22 = vadd.f32 0.001143296, %v3132_v17  ;;  %v3123_v6 = vmul.f32 %v3122_v59, %v5016_v27  ;;  %v3017_v37 = vadd.f32 0.112945676, %v3016_v19 }
0x1507   :  { %v3059_v16 = vadd.f32 0.4994258, %v3058_v4  ;;  %v3095_v0 = vadd.f32 0.014752088, %v3094_v10  ;;  %v3006_v39 = vadd.f32 0.05243302, %v3005_v11  ;;  %v3047_v54 = vmul.f32 %v3046_v56, %v4982_v46 }
0x1508   :  { %v3162_v29 = vadd.f32 1.0, %v3528_v9  ;;  %v3134_v45 = vmul.f32 %v3133_v22, %v5016_v27  ;;  %v3018_v40 = vmul.f32 %v3017_v37, %v4863_v5  ;;  %v3085_v21 = vmul.f32 %v3084_v44, %v4957_v35 }
0x1509   :  { %v3060_v32 = vmul.f32 %v3059_v16, %v4982_v46  ;;  %v3096_v58 = vmul.f32 %v3095_v0, %v4957_v35  ;;  %v3124_v52 = vadd.f32 0.0036580483, %v3123_v6  ;;  %v3007_v50 = vmul.f32 %v3006_v39, %v4863_v5 }
0x150a   :  { %v3170_v51 = vmul.f32 %v3162_v29, %v2826_v25  ;;  %v3135_v49 = vadd.f32 0.014752088, %v3134_v45  ;;  %v3019_v41 = vadd.f32 0.4994258, %v3018_v40  ;;  %v3048_v3 = vadd.f32 0.18741608, %v3047_v54 }
0x150b   :  { %v3061_v20 = vadd.f32 1.0, %v3060_v32  ;;  %v3097_v26 = vadd.f32 0.112945676, %v3096_v58  ;;  %v3086_v15 = vadd.f32 0.05243302, %v3085_v21  ;;  %v3125_v13 = vmul.f32 %v3124_v52, %v5016_v27 }
0x150c   :  { %3325 = vmatmul.f32.vlgmr.msrb.gmra.mxu2 %v3170_v51  ;;  %v3136_v42 = vmul.f32 %v3135_v49, %v5016_v27  ;;  %v3020_v62 = vmul.f32 %v3019_v41, %v4863_v5  ;;  %v3008_v2 = vadd.f32 0.18741608, %v3007_v50  ;;  %v3049_v57 = vmul.f32 %v3048_v3, %v4982_v46 }
0x150d   :  { %3674 = vrcp.f32 %v3061_v20  ;;  %v3098_v60 = vmul.f32 %v3097_v26, %v4957_v35  ;;  %v3087_v53 = vmul.f32 %v3086_v15, %v4957_v35  ;;  %v3126_v30 = vadd.f32 0.05243302, %v3125_v13 }
0x150e   :  { %v3137_v1 = vadd.f32 0.112945676, %v3136_v42  ;;  %v3021_v18 = vadd.f32 1.0, %v3020_v62  ;;  %v3009_v28 = vmul.f32 %v3008_v2, %v4863_v5  ;;  %v3073_v25 = vand.u32 2147483648, %v3061_v20 }
0x150f   :  { %v3099_v55 = vadd.f32 0.4994258, %v3098_v60  ;;  %v3050_v9 = vadd.f32 1.1283791, %v3049_v57  ;;  %v3071_v46 = vand.u32 2147483647, %v3061_v20  ;;  %v3127_v19 = vmul.f32 %v3126_v30, %v5016_v27 }
0x1510   :  { %v3138_v38 = vmul.f32 %v3137_v1, %v5016_v27  ;;  %3676 = vrcp.f32 %v3021_v18  ;;  %v3088_v16 = vadd.f32 0.18741608, %v3087_v53  ;;  %vm3067_vm3 = vweird.f32 %v3061_v20 }
0x1511   :  { %v3100_v7 = vmul.f32 %v3099_v55, %v4957_v35  ;;  %v3010_v5 = vadd.f32 1.1283791, %v3009_v28  ;;  %v3074_v22 = vor.u32 1.1754944e-38, %v3073_v25  ;;  %v3051_v32 = vmul.f32 %v3050_v9, %v4935_v23 }
0x1512   :  { %v3139_v4 = vadd.f32 0.4994258, %v3138_v38  ;;  %vm3072_vm5 = vcmp.eq.f32.partialorder %v3071_v46, 8.507059e+37  ;;  %v3089_v37 = vmul.f32 %v3088_v16, %v4957_v35  ;;  %v3128_v45 = vadd.f32 0.18741608, %v3127_v19 }
0x1513   :  { %v3675_v12 = vpop.eup %3674  ;;  %v5066_v48 = vadd.f32 1.0, %v3100_v7  ;;  %v3033_v40 = vand.u32 2147483648, %v3021_v18  ;;  %v3031_v58 = vand.u32 2147483647, %v3021_v18  ;;  %v3011_v49 = vmul.f32 %v3010_v5, %v4836_v34 }
0x1514   :  { %v3063_v8 = vmul.f32 %v3675_v12, %v3061_v20  ;;  %v3140_v17 = vmul.f32 %v3139_v4, %v5016_v27  ;;  %vm3068_vm14 = vweird.f32 %v3675_v12  ;;  %v2828_v21 = vmul.f32 0.5, %v4905_v63 }
0x1515   :  { %3678 = vrcp.f32 %v5066_v48  ;;  %vm3069_vm4 = vmor %vm3067_vm3, %vm3068_vm14  ;;  %v3090_v41 = vadd.f32 1.1283791, %v3089_v37  ;;  %v3129_v26 = vmul.f32 %v3128_v45, %v5016_v27  ;;  %vm3027_vm10 = vweird.f32 %v3021_v18 }
0x1516   :  { %v3064_v59 = vsub.f32 1.0, %v3063_v8  ;;  %v3677_v44 = vpop.eup %3676  ;;  %v5071_v10 = vadd.f32 1.0, %v3140_v17  ;;  %v3034_v3 = vor.u32 1.1754944e-38, %v3033_v40  ;;  %v3113_v60 = vand.u32 2147483648, %v5066_v48 }
0x1517   :  { %v3023_v29 = vmul.f32 %v3677_v44, %v3021_v18  ;;  %vm3028_vm6 = vweird.f32 %v3677_v44  ;;  %vm3032_vm12 = vcmp.eq.f32.partialorder %v3031_v58, 8.507059e+37  ;;  %v3111_v34 = vand.u32 2147483647, %v5066_v48 }
0x1518   :  { %v3065_v11 = vmul.f32 %v3675_v12, %v3064_v59  ;;  %3680 = vrcp.f32 %v5071_v10  ;;  %vm3029_vm11 = vmor %vm3027_vm10, %vm3028_vm6  ;;  %v3130_v27 = vadd.f32 1.1283791, %v3129_v26  ;;  %vm3107_vm15 = vweird.f32 %v5066_v48 }
0x1519   :  { %v3024_v51 = vsub.f32 1.0, %v3023_v29  ;;  %v3114_v38 = vor.u32 1.1754944e-38, %v3113_v60  ;;  %v3153_v57 = vand.u32 2147483648, %v5071_v10  ;;  %v3151_v30 = vand.u32 2147483647, %v5071_v10 }
0x151a   :  { %v3066_v56 = vadd.f32 %v3675_v12, %v3065_v11  ;;  %v2827_v7 = vmul.f32 0.5, %v4825_v24  ;;  %v3091_v4 = vmul.f32 %v3090_v41, %v4898_v61  ;;  %vm3112_vm9 = vcmp.eq.f32.partialorder %v3111_v34, 8.507059e+37  ;;  %v3397_v34 = vld [vmem:[#allocation16 + $0x58] sm:$0xff] }
0x151b   :  { %v3679_v20 = vpop.eup %3678  ;;  %v3025_v54 = vmul.f32 %v3677_v44, %v3024_v51  ;;  %vm3147_vm0 = vweird.f32 %v5071_v10  ;;  %v3154_v9 = vor.u32 1.1754944e-38, %v3153_v57  ;;  %v3131_v11 = vmul.f32 %v3130_v27, %v4975_v31  ;;  %v3395_v27 = vld [vmem:[#allocation16 + $0x48] sm:$0xff] }
0x151c   :  { %v3070_v6 = vsel %vm3069_vm4, %v3675_v12, %v3066_v56  ;;  %v3103_v52 = vmul.f32 %v3679_v20, %v5066_v48  ;;  %vm3108_vm13 = vweird.f32 %v3679_v20  ;;  %vm3152_vm2 = vcmp.eq.f32.partialorder %v3151_v30, 8.507059e+37  ;;  %v3391_v30 = vld [vmem:[#allocation16 + $0x28] sm:$0xff] }
0x151d   :  { %v3075_v0 = vsel %vm3072_vm5, %v3074_v22, %v3070_v6  ;;  %v3026_v35 = vadd.f32 %v3677_v44, %v3025_v54  ;;  %vm3109_vm7 = vmor %vm3107_vm15, %vm3108_vm13  ;;  %v2829_v61 = vmul.f32 0.5, %v4877_v36  ;;  %v2830_v29 = vmul.f32 0.5, %v4959_v43 }
0x151e   :  { %v3076_v39 = vmul.f32 %v3075_v0, %v3051_v32  ;;  %v3681_v50 = vpop.eup %3680  ;;  %v3104_v62 = vsub.f32 1.0, %v3103_v52 }
0x151f   :  { %v3030_v15 = vsel %vm3029_vm11, %v3677_v44, %v3026_v35  ;;  %v3143_v63 = vmul.f32 %v3681_v50, %v5071_v10  ;;  %vm3148_vm8 = vweird.f32 %v3681_v50 }
0x1520   :  { %v3530_v23 = vclamps-f32 %v3076_v39, 1.0  ;;  %v3035_v1 = vsel %vm3032_vm12, %v3034_v3, %v3030_v15  ;;  %v3105_v55 = vmul.f32 %v3679_v20, %v3104_v62  ;;  %vm3149_vm1 = vmor %vm3147_vm0, %vm3148_vm8  ;;  %v3398_v15 = vld [vmem:[#allocation16 + $0x60] sm:$0xff] }
0x1521   :  { %v3036_v12 = vmul.f32 %v3035_v1, %v3011_v49  ;;  %v3144_v18 = vsub.f32 1.0, %v3143_v63  ;;  %v3396_v63 = vld [vmem:[#allocation16 + $0x50] sm:$0xff] }
0x1522   :  { %v3164_v42 = vadd.f32 1.0, %v3530_v23  ;;  %v3106_v2 = vadd.f32 %v3679_v20, %v3105_v55 }
0x1523   :  { %v3529_v8 = vclamps-f32 %v3036_v12, 1.0  ;;  %v3145_v53 = vmul.f32 %v3681_v50, %v3144_v18  ;;  %v3394_v18 = vld [vmem:[#allocation16 + $0x40] sm:$0xff] }
0x1524   :  { %v3172_v13 = vmul.f32 %v3164_v42, %v2828_v21  ;;  %v3110_v59 = vsel %vm3109_vm7, %v3679_v20, %v3106_v2  ;;  %v3400_v42 = vld [vmem:[#allocation16 + $0x70] sm:$0xff] }
0x1525   :  { %v3163_v28 = vadd.f32 1.0, %v3529_v8  ;;  %v3115_v25 = vsel %vm3112_vm9, %v3114_v38, %v3110_v59  ;;  %v3146_v17 = vadd.f32 %v3681_v50, %v3145_v53  ;;  %v3393_v38 = vld [vmem:[#allocation16 + $0x38] sm:$0xff]  ;;  %v3392_v8 = vld [vmem:[#allocation16 + $0x30] sm:$0xff] }
0x1526   :  { %3282 = vmatmul.f32.gmra.mxu3 %v3172_v13  ;;  %v3116_v48 = vmul.f32 %v3115_v25, %v3091_v4  ;;  %v3390_v4 = vld [vmem:[#allocation16 + $0x20] sm:$0xff] }
0x1527   :  { %v3171_v46 = vmul.f32 %v3163_v28, %v2827_v7  ;;  %v3150_v16 = vsel %vm3149_vm1, %v3681_v50, %v3146_v17  ;;  %v3401_v50 = vld [vmem:[#allocation16 + $0x78] sm:$0xff]  ;;  %v3388_v17 = vld [vmem:[#allocation16 + $0x10] sm:$0xff] }
0x1528   :  { %v3531_v19 = vclamps-f32 %v3116_v48, 1.0  ;;  %v3155_v44 = vsel %vm3152_vm2, %v3154_v9, %v3150_v16  ;;  %3402 = vmatpush.msrb.mxu0 %v3401_v50  ;;  %v3389_v28 = vld [vmem:[#allocation16 + $0x18] sm:$0xff]  ;;  %v3387_v9 = vld [vmem:[#allocation16 + $0x8] sm:$0xff]  ;;  %v3386_v16 = vld [vmem:[#allocation16] sm:$0xff] }
0x1529   :  { %3259 = vmatmul.f32.gmra.mxu0 %v3171_v46  ;;  %v3156_v24 = vmul.f32 %v3155_v44, %v3131_v11  ;;  %v3566_v11 = vld [vmem:[%s5126_s11] ss:$0 sm:$0xff]  ;;  %s3960_s11 = smov [#allocation17]  }
0x152a   :  { %v3165_v56 = vadd.f32 1.0, %v3531_v19  ;;  %3403 = vmatpush.msrb.mxu0 %v3400_v42  ;;  %v3567_v46 = vld [vmem:[%s5127_s12] ss:$0 sm:$0xff]  ;;  %s3431_s12 = sshll.u32 %s3960_s11, 4  ;;  %s3432_s12 = int_to_ptr.vmem [resolvable:$true] %s3431_s12 }
0x152b   :  { %v3532_v5 = vclamps-f32 %v3156_v24, 1.0 }
0x152c   :  { %v3173_v22 = vmul.f32 %v3165_v56, %v2829_v61 }
0x152d   :  { %v3166_v10 = vadd.f32 1.0, %v3532_v5 }
0x152e   :  { %3305 = vmatmul.f32.gmra.mxu1 %v3173_v22 }
0x152f   :  { %v3174_v32 = vmul.f32 %v3166_v10, %v2830_v29 }
0x1531   :  { %3328 = vmatmul.f32.gmra.mxu2 %v3174_v32 }
0x157b   :  { %v3257_v6 = vpop.f32.mrf.mxu0 }
0x157c   :  { %v3303_v0 = vpop.f32.mrf.mxu1 }
0x1588   :  { %v3280_v31 = vpop.f32.mrf.mxu3 }
0x1589   :  { %v3281_v37 = vadd.f32 %v3280_v31, %v3257_v6 }
0x158b   :  { %v3304_v45 = vadd.f32 %v3303_v0, %v3281_v37 }
0x158f   :  { %v3326_v51 = vpop.f32.mrf.mxu2 }
0x1590   :  { %v3327_v39 = vadd.f32 %v3326_v51, %v3304_v45 }
0x1592   :  { %v3332_v40 = vadd.f32 %v3327_v39, %v4770_v47 }
0x1594   :  { %3336 = vadd.xlane.f32.xlu2 %v3332_v40 }
0x15a6   :  { %v3260_v20 = vpop.f32.mrf.mxu0 }
0x15a9   :  { %v3283_v36 = vpop.f32.mrf.mxu3 }
0x15aa   :  { %v3284_v54 = vadd.f32 %v3283_v36, %v3260_v20 }
0x15ab   :  { %v3306_v58 = vpop.f32.mrf.mxu1 }
0x15ac   :  { %v3307_v49 = vadd.f32 %v3306_v58, %v3284_v54 }
0x15b4   :  { %v3329_v43 = vpop.f32.mrf.mxu2 }
0x15b5   :  { %v3330_v21 = vadd.f32 %v3329_v43, %v3307_v49 }
0x15b7   :  { %v3333_v23 = vadd.f32 %v3330_v21, %v4777_v33  ;;  %v3399_v33 = vld [vmem:[#allocation16 + $0x68] sm:$0xff] }
0x15b8   :  { %3404 = vmatpush.msrb.mxu0 %v3399_v33 }
0x15b9   :  { %3338 = vadd.xlane.f32.xlu0 %v3333_v23 }
0x15ba   :  { %3405 = vmatpush.msrb.mxu0 %v3398_v15 }
0x15bc   :  { %3406 = vmatpush.msrb.mxu0 %v3397_v34 }
0x15be   :  { %3407 = vmatpush.msrb.mxu0 %v3396_v63 }
0x15c0   :  { %3408 = vmatpush.msrb.mxu0 %v3395_v27 }
0x15c2   :  { %3409 = vmatpush.msrb.mxu0 %v3394_v18 }
0x15c4   :  { %3410 = vmatpush.msrb.mxu0 %v3393_v38 }
0x15c6   :  { %3411 = vmatpush.msrb.mxu0 %v3392_v8 }
0x15c8   :  { %3412 = vmatpush.msrb.mxu0 %v3391_v30 }
0x15ca   :  { %3413 = vmatpush.msrb.mxu0 %v3390_v4 }
0x15cc   :  { %3414 = vmatpush.msrb.mxu0 %v3389_v28 }
0x15ce   :  { %3415 = vmatpush.msrb.mxu0 %v3388_v17 }
0x15d0   :  { %3416 = vmatpush.msrb.mxu0 %v3387_v9 }
0x15d2   :  { %3417 = vmatpush.msrb.mxu0 %v3386_v16 }
0x1607   :  { %v3337_v52 = vpop.xlane.xlu2 %3336 }
0x1608   :  { %v3340_v41 = vmul.f32 %v3337_v52, %v4082_v14 }
0x160a   :  { %v3342_v26 = vsub.f32 %v3332_v40, %v3340_v41 }
0x160c   :  { %v3344_v35 = vmul.f32 %v3342_v26, %v3342_v26 }
0x160e   :  { %3346 = vadd.xlane.f32.xlu2 %v3344_v35 }
0x162c   :  { %v3339_v47 = vpop.xlane.xlu0 %3338 }
0x162d   :  { %v3341_v3 = vmul.f32 %v3339_v47, %v4082_v14 }
0x162f   :  { %v5096_v62 = vsub.f32 %v3333_v23, %v3341_v3 }
0x1631   :  { %v3345_v60 = vmul.f32 %v5096_v62, %v5096_v62 }
0x1633   :  { %3348 = vadd.xlane.f32.xlu0 %v3345_v60 }
0x1681   :  { %v3347_v13 = vpop.xlane.xlu2 %3346 }
0x1682   :  { %v3350_v1 = vmul.f32 %v3347_v13, %v4082_v14 }
0x1684   :  { %v3352_v55 = vadd.f32 1e-05, %v3350_v1 }
0x1686   :  { %3682 = vrsqrt.f32 %v3352_v55  ;;  %vm3360_vm3 = vweird.f32 %v3352_v55 }
0x168c   :  { %v3683_v12 = vpop.eup %3682 }
0x168d   :  { %v3355_v2 = vmul.f32 %v3683_v12, %v3352_v55  ;;  %vm3361_vm14 = vweird.f32 %v3683_v12 }
0x168e   :  { %vm3362_vm4 = vmor %vm3360_vm3, %vm3361_vm14 }
0x168f   :  { %v3356_v57 = vmul.f32 %v3683_v12, %v3355_v2 }
0x1691   :  { %v3357_v53 = vmul.f32 0.5, %v3356_v57 }
0x1693   :  { %v3358_v7 = vsub.f32 1.5, %v3357_v53 }
0x1695   :  { %v3359_v59 = vmul.f32 %v3683_v12, %v3358_v7 }
0x1697   :  { %v3363_v25 = vsel %vm3362_vm4, %v3683_v12, %v3359_v59 }
0x1698   :  { %v3374_v48 = vmul.f32 %v3363_v25, %v3342_v26 }
0x169a   :  { %v3379_v19 = vmul.f32 %v3566_v11, %v3374_v48 }
0x169c   :  { %v3384_v44 = vadd.f32 %v3567_v46, %v3379_v19 }
0x169e   :  { %3418 = vmatmul.f32.vlgmr.msrb.gmra.mxu0 %v3384_v44 }
0x16a6   :  { %v3349_v24 = vpop.xlane.xlu0 %3348 }
0x16a7   :  { %v3351_v61 = vmul.f32 %v3349_v24, %v4082_v14 }
0x16a9   :  { %v3353_v56 = vadd.f32 1e-05, %v3351_v61 }
0x16ab   :  { %3684 = vrsqrt.f32 %v3353_v56  ;;  %vm3370_vm6 = vweird.f32 %v3353_v56 }
0x16b1   :  { %v3685_v5 = vpop.eup %3684 }
0x16b2   :  { %v3365_v22 = vmul.f32 %v3685_v5, %v3353_v56  ;;  %vm3371_vm5 = vweird.f32 %v3685_v5 }
0x16b3   :  { %vm3372_vm10 = vmor %vm3370_vm6, %vm3371_vm5 }
0x16b4   :  { %v3366_v29 = vmul.f32 %v3685_v5, %v3365_v22 }
0x16b6   :  { %v3367_v10 = vmul.f32 0.5, %v3366_v29 }
0x16b8   :  { %v3368_v32 = vsub.f32 1.5, %v3367_v10 }
0x16ba   :  { %v3369_v6 = vmul.f32 %v3685_v5, %v3368_v32 }
0x16bc   :  { %v3373_v31 = vsel %vm3372_vm10, %v3685_v5, %v3369_v6 }
0x16bd   :  { %v3375_v37 = vmul.f32 %v3373_v31, %v5096_v62 }
0x16bf   :  { %v3380_v0 = vmul.f32 %v3566_v11, %v3375_v37 }
0x16c1   :  { %v3385_v45 = vadd.f32 %v3567_v46, %v3380_v0 }
0x16c3   :  { %3421 = vmatmul.f32.gmra.mxu0 %v3385_v45 }
0x171b   :  { %v3419_v51 = vpop.f32.mrf.mxu0 }
0x171c   :  { %3425 = vst [vmem:[#allocation17] sm:$0xff] %v3419_v51 }
0x1740   :  { %v3422_v14 = vpop.f32.mrf.mxu0 }
0x1741   :  { %3426 = vst [vmem:[#allocation17 + $0x8] sm:$0xff] %v3422_v14 }
0x1742   :  { %3439 = dma.vmem_to_hbm [thread:$0]  %s3432_s12, 256, %s3434_s24, [#allocation4], %s3942_s25, %s3942_s25, %s3943_s26  }
0x1743   :  { %3936 = dma.done.wait [#allocation4], 256  }
0x1744   :  { %3937 = vsyncadd [#allocation4], 4294967040 }
0x1745   :  { %3444 = vsyncpa [#allocation3], 1 }
0x1746   :  { %3445 = vsyncpa [#allocation6], 1 }
0x1747   :  { %3446 = vsyncpa [#allocation9], 1 }
0x1748   :  { %3447 = vsyncpa [#allocation12], 1 }
0x1749   :  { %3448 = vsyncpa [#allocation15], 1 }
0x174a   :  { %3449 = vsyncpa [#allocation4], 1 }

</bundles_post_ra>
